<compile_context>
chip_gen: v7x
topology: tpu7x:2x2x1
jax: 0.10.0
libtpu: 0.0.40
codegen_flags: <defaults>
</compile_context>

<pallas_src>
import functools
import math

import jax
import jax.numpy as jnp
import numpy as np
from jax.experimental import pallas as pl
from jax.experimental.pallas import tpu as pltpu


# ----------------------------------------------------------------------------
# Fused Pallas kernel: pos-add + all blocks + output head
# ----------------------------------------------------------------------------
def decoder_kernel(x_ref, pos_ref,
                   ln1w_ref, ln1b_ref, wqkv_ref, bqkv_ref, wproj_ref, bproj_ref,
                   ln2w_ref, ln2b_ref, wfc1_ref, bfc1_ref, wfc2_ref, bfc2_ref,
                   wout1_ref, bout1_ref, wconv_ref, bconv_ref,
                   o_ref,
                   attn_scratch,
                   *, depth, num_heads, batch, seq):
    D = x_ref.shape[-1]
    M = batch * seq
    hd = D // num_heads
    scale = 1.0 / math.sqrt(hd)
    eps = 1e-5

    def layernorm(v, w, b):
        mu = jnp.mean(v, axis=-1, keepdims=True)
        var = jnp.mean((v - mu) ** 2, axis=-1, keepdims=True)
        return (v - mu) * jax.lax.rsqrt(var + eps) * w + b

    # positional embedding (dropout = identity in eval), then fold B into M.
    x = (x_ref[...] + pos_ref[...][None]).reshape(M, D)

    for l in range(depth):                      # static unroll over layers
        # ---------------- multi-head self attention ----------------
        h = layernorm(x, ln1w_ref[l], ln1b_ref[l])
        qkv = (jnp.dot(h, wqkv_ref[l], preferred_element_type=jnp.float32)
               + bqkv_ref[l])                                   # (M, 3D)
        q = (qkv[:, :D] * scale).reshape(batch, seq, D)
        k = qkv[:, D:2 * D].reshape(batch, seq, D)
        v = qkv[:, 2 * D:].reshape(batch, seq, D)

        for hh in range(num_heads):             # static, small head count
            sl = slice(hh * hd, (hh + 1) * hd)
            s = jnp.einsum('bqd,bkd->bqk', q[:, :, sl], k[:, :, sl],
                           preferred_element_type=jnp.float32)  # (B, N, N)
            s = s - jnp.max(s, axis=-1, keepdims=True)
            p = jnp.exp(s)
            p = p * pl.reciprocal(jnp.sum(p, axis=-1, keepdims=True),
                                  approx=True)
            attn_scratch[:, :, sl] = jnp.einsum(
                'bqk,bkd->bqd', p, v[:, :, sl],
                preferred_element_type=jnp.float32)

        attn = attn_scratch[...].reshape(M, D)
        x = x + (jnp.dot(attn, wproj_ref[l],
                         preferred_element_type=jnp.float32) + bproj_ref[l])

        # --------------------------- MLP ----------------------------
        h2 = layernorm(x, ln2w_ref[l], ln2b_ref[l])
        h2 = (jnp.dot(h2, wfc1_ref[l], preferred_element_type=jnp.float32)
              + bfc1_ref[l])
        # exact GELU (PyTorch nn.GELU default)
        h2 = 0.5 * h2 * (1.0 + jax.lax.erf(h2 * (1.0 / math.sqrt(2.0))))
        x = x + (jnp.dot(h2, wfc2_ref[l], preferred_element_type=jnp.float32)
                 + bfc2_ref[l])

    # ---------------- output head: linear -> tanh -> linear ----------------
    y = jnp.tanh(jnp.dot(x, wout1_ref[...],
                         preferred_element_type=jnp.float32) + bout1_ref[...])
    y = jnp.dot(y, wconv_ref[...],
                preferred_element_type=jnp.float32) + bconv_ref[...]
    o_ref[...] = y


# ----------------------------------------------------------------------------
# Wrapper (single pallas_call for the whole forward)
# ----------------------------------------------------------------------------
_WEIGHT_ORDER = ["ln1_w", "ln1_b", "w_qkv", "b_qkv", "w_proj", "b_proj",
                 "ln2_w", "ln2_b", "w_fc1", "b_fc1", "w_fc2", "b_fc2",
                 "w_out1", "b_out1", "w_conv", "b_conv"]


def _full_spec(shape):
    nd = len(shape)
    return pl.BlockSpec(shape, lambda i, _nd=nd: (0,) * _nd)


def vit_decoder_forward(x, params, *, hw, patch_size, output_channel,
                        num_heads):
    B, N, D = x.shape
    depth = params["w_qkv"].shape[0]
    Dout = params["w_out1"].shape[1]

    args = [x, params["pos"]] + [params[k] for k in _WEIGHT_ORDER]

    # Explicit VMEM budget: inputs + output + scratch with generous headroom,
    # still far below every generation's physical VMEM at these sizes.
    total_bytes = (sum(int(np.prod(a.shape)) * a.dtype.itemsize for a in args)
                   + B * N * Dout * 4 + B * N * D * 4)
    vmem_limit = int(min(100 * (1 << 20), max(4 * total_bytes, 8 * (1 << 20))))

    y = pl.pallas_call(
        functools.partial(decoder_kernel, depth=depth, num_heads=num_heads,
                          batch=B, seq=N),
        grid=(1,),                              # single step: no HBM re-reads
        in_specs=[_full_spec(a.shape) for a in args],
        out_specs=_full_spec((B * N, Dout)),
        out_shape=jax.ShapeDtypeStruct((B * N, Dout), x.dtype),
        scratch_shapes=[pltpu.VMEM((B, N, D), jnp.float32)],
        compiler_params=pltpu.CompilerParams(
            dimension_semantics=("arbitrary",),
            vmem_limit_bytes=vmem_limit),
    )(*args)

    # rearrange 'B (h w) (h_size w_size c) -> B c (h h_size) (w w_size)'
    # (pure layout; done in JAX outside the kernel)
    P, C = patch_size, output_channel
    y = y.reshape(B, hw, hw, P, P, C)
    y = jnp.transpose(y, (0, 5, 1, 3, 2, 4))
    return y.reshape(B, C, hw * P, hw * P)


# ----------------------------------------------------------------------------
# Parameter construction (deterministic, synthetic; per-block weights stacked
# along a leading `depth` axis)
# ----------------------------------------------------------------------------
def init_params(key, embed_dim, depth, patch_size, output_channel, n_tokens,
                mlp_ratio=4):
    D = embed_dim
    Hm = mlp_ratio * D
    Dout = patch_size * patch_size * output_channel
    keys = jax.random.split(key, 7)

    def tn(k, shape, std=0.02):
        return (std * jax.random.truncated_normal(k, -2.0, 2.0, shape)
                ).astype(jnp.float32)

    return {
        "pos": tn(keys[0], (n_tokens, D)),
        "ln1_w": jnp.ones((depth, 1, D), jnp.float32),
        "ln1_b": jnp.zeros((depth, 1, D), jnp.float32),
        "w_qkv": tn(keys[1], (depth, D, 3 * D)),
        "b_qkv": jnp.zeros((depth, 1, 3 * D), jnp.float32),
        "w_proj": tn(keys[2], (depth, D, D)),
        "b_proj": jnp.zeros((depth, 1, D), jnp.float32),
        "ln2_w": jnp.ones((depth, 1, D), jnp.float32),
        "ln2_b": jnp.zeros((depth, 1, D), jnp.float32),
        "w_fc1": tn(keys[3], (depth, D, Hm)),
        "b_fc1": jnp.zeros((depth, 1, Hm), jnp.float32),
        "w_fc2": tn(keys[4], (depth, Hm, D)),
        "b_fc2": jnp.zeros((depth, 1, D), jnp.float32),
        "w_out1": tn(keys[5], (D, Dout)),
        "b_out1": jnp.zeros((1, Dout), jnp.float32),
        "w_conv": tn(keys[6], (Dout, Dout)),
        "b_conv": jnp.zeros((1, Dout), jnp.float32),
    }


# ----------------------------------------------------------------------------
# Pure-JAX reference (for correctness check)
# ----------------------------------------------------------------------------
def reference_forward(x, params, *, hw, patch_size, output_channel, num_heads):
    B, N, D = x.shape
    hd = D // num_heads
    eps = 1e-5
    depth = params["w_qkv"].shape[0]

    def ln(v, w, b):
        mu = v.mean(-1, keepdims=True)
        var = ((v - mu) ** 2).mean(-1, keepdims=True)
        return (v - mu) / jnp.sqrt(var + eps) * w + b

    x = x + params["pos"][None]
    for l in range(depth):
        h = ln(x, params["ln1_w"][l], params["ln1_b"][l])
        qkv = h @ params["w_qkv"][l] + params["b_qkv"][l]
        q, k, v = jnp.split(qkv, 3, axis=-1)
        q = q.reshape(B, N, num_heads, hd).transpose(0, 2, 1, 3)
        k = k.reshape(B, N, num_heads, hd).transpose(0, 2, 1, 3)
        v = v.reshape(B, N, num_heads, hd).transpose(0, 2, 1, 3)
        s = (q @ jnp.swapaxes(k, -1, -2)) / math.sqrt(hd)
        a = jax.nn.softmax(s, axis=-1)
        o = (a @ v).transpose(0, 2, 1, 3).reshape(B, N, D)
        x = x + o @ params["w_proj"][l] + params["b_proj"][l]
        h2 = ln(x, params["ln2_w"][l], params["ln2_b"][l])
        h2 = h2 @ params["w_fc1"][l] + params["b_fc1"][l]
        h2 = jax.nn.gelu(h2, approximate=False)
        x = x + h2 @ params["w_fc2"][l] + params["b_fc2"][l]
    y = jnp.tanh(x @ params["w_out1"] + params["b_out1"])
    y = y @ params["w_conv"] + params["b_conv"]
    P, C = patch_size, output_channel
    y = y.reshape(B, hw, hw, P, P, C).transpose(0, 5, 1, 3, 2, 4)
    return y.reshape(B, C, hw * P, hw * P)


# ----------------------------------------------------------------------------
if __name__ == "__main__":
    # small config consistent with the module
    image_size = 16
    patch_size = 4
    embed_dim = 32
    depth = 2
    num_heads = 4
    output_channel = 4
    hw = image_size // patch_size          # 4
    N = hw * hw                            # 16 tokens
    B = 2

    key = jax.random.PRNGKey(0)
    kx, kp = jax.random.split(key)
    x = jax.random.normal(kx, (B, N, embed_dim), dtype=jnp.float32)
    params = init_params(kp, embed_dim, depth, patch_size, output_channel, N)

    fwd = jax.jit(functools.partial(
        vit_decoder_forward, hw=hw, patch_size=patch_size,
        output_channel=output_channel, num_heads=num_heads))

    out = jax.block_until_ready(fwd(x, params))
    assert out.shape == (B, output_channel, image_size, image_size), out.shape

    ref = reference_forward(
        x, params, hw=hw, patch_size=patch_size,
        output_channel=output_channel, num_heads=num_heads)
    np.testing.assert_allclose(np.asarray(out), np.asarray(ref),
                               rtol=2e-3, atol=2e-3)

    print("KERNEL_OK")
</pallas_src>

<mosaic_0001>
module attributes {stable_mosaic.version = 11 : i64} {
  func.func @decoder_kernel(%arg0: i32, %arg1: memref<2x16x32xf32, #tpu.memory_space<vmem>>, %arg2: memref<16x32xf32, #tpu.memory_space<vmem>>, %arg3: memref<2x1x32xf32, #tpu.memory_space<vmem>>, %arg4: memref<2x1x32xf32, #tpu.memory_space<vmem>>, %arg5: memref<2x32x96xf32, #tpu.memory_space<vmem>>, %arg6: memref<2x1x96xf32, #tpu.memory_space<vmem>>, %arg7: memref<2x32x32xf32, #tpu.memory_space<vmem>>, %arg8: memref<2x1x32xf32, #tpu.memory_space<vmem>>, %arg9: memref<2x1x32xf32, #tpu.memory_space<vmem>>, %arg10: memref<2x1x32xf32, #tpu.memory_space<vmem>>, %arg11: memref<2x32x128xf32, #tpu.memory_space<vmem>>, %arg12: memref<2x1x128xf32, #tpu.memory_space<vmem>>, %arg13: memref<2x128x32xf32, #tpu.memory_space<vmem>>, %arg14: memref<2x1x32xf32, #tpu.memory_space<vmem>>, %arg15: memref<32x64xf32, #tpu.memory_space<vmem>>, %arg16: memref<1x64xf32, #tpu.memory_space<vmem>>, %arg17: memref<64x64xf32, #tpu.memory_space<vmem>>, %arg18: memref<1x64xf32, #tpu.memory_space<vmem>>, %arg19: memref<32x64xf32, #tpu.memory_space<vmem>>, %arg20: memref<2x16x32xf32, #tpu.memory_space<vmem>>) attributes {dimension_semantics = [#tpu.dimension_semantics<arbitrary>], iteration_bounds = array<i64: 1>, scalar_prefetch = 0 : i64, scratch_operands = 1 : i64, tpu.core_type = #tpu.core_type<tc>, window_params = [{pipeline_mode = #tpu.pipeline_mode<synchronous>, transform_indices = @transform_0, window_bounds = array<i64: 2, 16, 32>}, {pipeline_mode = #tpu.pipeline_mode<synchronous>, transform_indices = @transform_1, window_bounds = array<i64: 16, 32>}, {pipeline_mode = #tpu.pipeline_mode<synchronous>, transform_indices = @transform_2, window_bounds = array<i64: 2, 1, 32>}, {pipeline_mode = #tpu.pipeline_mode<synchronous>, transform_indices = @transform_3, window_bounds = array<i64: 2, 1, 32>}, {pipeline_mode = #tpu.pipeline_mode<synchronous>, transform_indices = @transform_4, window_bounds = array<i64: 2, 32, 96>}, {pipeline_mode = #tpu.pipeline_mode<synchronous>, transform_indices = @transform_5, window_bounds = array<i64: 2, 1, 96>}, {pipeline_mode = #tpu.pipeline_mode<synchronous>, transform_indices = @transform_6, window_bounds = array<i64: 2, 32, 32>}, {pipeline_mode = #tpu.pipeline_mode<synchronous>, transform_indices = @transform_7, window_bounds = array<i64: 2, 1, 32>}, {pipeline_mode = #tpu.pipeline_mode<synchronous>, transform_indices = @transform_8, window_bounds = array<i64: 2, 1, 32>}, {pipeline_mode = #tpu.pipeline_mode<synchronous>, transform_indices = @transform_9, window_bounds = array<i64: 2, 1, 32>}, {pipeline_mode = #tpu.pipeline_mode<synchronous>, transform_indices = @transform_10, window_bounds = array<i64: 2, 32, 128>}, {pipeline_mode = #tpu.pipeline_mode<synchronous>, transform_indices = @transform_11, window_bounds = array<i64: 2, 1, 128>}, {pipeline_mode = #tpu.pipeline_mode<synchronous>, transform_indices = @transform_12, window_bounds = array<i64: 2, 128, 32>}, {pipeline_mode = #tpu.pipeline_mode<synchronous>, transform_indices = @transform_13, window_bounds = array<i64: 2, 1, 32>}, {pipeline_mode = #tpu.pipeline_mode<synchronous>, transform_indices = @transform_14, window_bounds = array<i64: 32, 64>}, {pipeline_mode = #tpu.pipeline_mode<synchronous>, transform_indices = @transform_15, window_bounds = array<i64: 1, 64>}, {pipeline_mode = #tpu.pipeline_mode<synchronous>, transform_indices = @transform_16, window_bounds = array<i64: 64, 64>}, {pipeline_mode = #tpu.pipeline_mode<synchronous>, transform_indices = @transform_17, window_bounds = array<i64: 1, 64>}, {pipeline_mode = #tpu.pipeline_mode<synchronous>, transform_indices = @transform_18, window_bounds = array<i64: 32, 64>}]} {
    %c0 = arith.constant 0 : index
    %c0_0 = arith.constant 0 : index
    %c0_1 = arith.constant 0 : index
    %0 = vector.load %arg1[%c0, %c0_0, %c0_1] : memref<2x16x32xf32, #tpu.memory_space<vmem>>, vector<2x16x32xf32>
    %c0_2 = arith.constant 0 : index
    %c0_3 = arith.constant 0 : index
    %1 = vector.load %arg2[%c0_2, %c0_3] : memref<16x32xf32, #tpu.memory_space<vmem>>, vector<16x32xf32>
    %2 = vector.shape_cast %1 : vector<16x32xf32> to vector<1x16x32xf32>
    %3 = vector.broadcast %2 : vector<1x16x32xf32> to vector<2x16x32xf32>
    %4 = arith.addf %0, %3 : vector<2x16x32xf32>
    %5 = vector.shape_cast %4 : vector<2x16x32xf32> to vector<32x32xf32>
    %c0_4 = arith.constant 0 : index
    %c0_5 = arith.constant 0 : index
    %c0_6 = arith.constant 0 : index
    %6 = vector.load %arg3[%c0_4, %c0_5, %c0_6] : memref<2x1x32xf32, #tpu.memory_space<vmem>>, vector<1x1x32xf32>
    %7 = vector.shape_cast %6 : vector<1x1x32xf32> to vector<1x32xf32>
    %c0_7 = arith.constant 0 : index
    %c0_8 = arith.constant 0 : index
    %c0_9 = arith.constant 0 : index
    %8 = vector.load %arg4[%c0_7, %c0_8, %c0_9] : memref<2x1x32xf32, #tpu.memory_space<vmem>>, vector<1x1x32xf32>
    %9 = vector.shape_cast %8 : vector<1x1x32xf32> to vector<1x32xf32>
    %cst = arith.constant dense<0.000000e+00> : vector<32xf32>
    %10 = vector.multi_reduction <add>, %5, %cst [1] : vector<32x32xf32> to vector<32xf32>
    %11 = vector.shape_cast %10 : vector<32xf32> to vector<32x1xf32>
    %cst_10 = arith.constant 3.200000e+01 : f32
    %12 = vector.broadcast %cst_10 : f32 to vector<32x1xf32>
    %13 = arith.divf %11, %12 : vector<32x1xf32>
    %14 = vector.broadcast %13 : vector<32x1xf32> to vector<32x32xf32>
    %15 = arith.subf %5, %14 : vector<32x32xf32>
    %16 = arith.mulf %15, %15 : vector<32x32xf32>
    %cst_11 = arith.constant dense<0.000000e+00> : vector<32xf32>
    %17 = vector.multi_reduction <add>, %16, %cst_11 [1] : vector<32x32xf32> to vector<32xf32>
    %18 = vector.shape_cast %17 : vector<32xf32> to vector<32x1xf32>
    %cst_12 = arith.constant 3.200000e+01 : f32
    %19 = vector.broadcast %cst_12 : f32 to vector<32x1xf32>
    %20 = arith.divf %18, %19 : vector<32x1xf32>
    %21 = vector.broadcast %13 : vector<32x1xf32> to vector<32x32xf32>
    %22 = arith.subf %5, %21 : vector<32x32xf32>
    %cst_13 = arith.constant 9.99999974E-6 : f32
    %23 = vector.broadcast %cst_13 : f32 to vector<32x1xf32>
    %24 = arith.addf %20, %23 : vector<32x1xf32>
    %25 = math.rsqrt %24 : vector<32x1xf32>
    %26 = vector.broadcast %25 : vector<32x1xf32> to vector<32x32xf32>
    %27 = arith.mulf %22, %26 : vector<32x32xf32>
    %28 = vector.broadcast %7 : vector<1x32xf32> to vector<32x32xf32>
    %29 = arith.mulf %27, %28 : vector<32x32xf32>
    %30 = vector.broadcast %9 : vector<1x32xf32> to vector<32x32xf32>
    %31 = arith.addf %29, %30 : vector<32x32xf32>
    %c0_14 = arith.constant 0 : index
    %c0_15 = arith.constant 0 : index
    %c0_16 = arith.constant 0 : index
    %32 = vector.load %arg5[%c0_14, %c0_15, %c0_16] : memref<2x32x96xf32, #tpu.memory_space<vmem>>, vector<1x32x96xf32>
    %33 = vector.shape_cast %32 : vector<1x32x96xf32> to vector<32x96xf32>
    %cst_17 = arith.constant dense<0.000000e+00> : vector<32x96xf32>
    %34 = tpu.matmul %31, %33, %cst_17 {dimension_numbers = #tpu.dot_dimension_numbers<[1], [0], [0], [1], [0, 0, 1, 1], [], []>} : vector<32x32xf32>, vector<32x96xf32>, vector<32x96xf32> -> vector<32x96xf32>
    %c0_18 = arith.constant 0 : index
    %c0_19 = arith.constant 0 : index
    %c0_20 = arith.constant 0 : index
    %35 = vector.load %arg6[%c0_18, %c0_19, %c0_20] : memref<2x1x96xf32, #tpu.memory_space<vmem>>, vector<1x1x96xf32>
    %36 = vector.shape_cast %35 : vector<1x1x96xf32> to vector<1x96xf32>
    %37 = vector.broadcast %36 : vector<1x96xf32> to vector<32x96xf32>
    %38 = arith.addf %34, %37 : vector<32x96xf32>
    %39 = vector.extract_strided_slice %38 {offsets = [0, 0], sizes = [32, 32], strides = [1, 1]} : vector<32x96xf32> to vector<32x32xf32>
    %cst_21 = arith.constant 0.353553385 : f32
    %40 = vector.broadcast %cst_21 : f32 to vector<32x32xf32>
    %41 = arith.mulf %39, %40 : vector<32x32xf32>
    %42 = vector.shape_cast %41 : vector<32x32xf32> to vector<2x16x32xf32>
    %43 = vector.extract_strided_slice %38 {offsets = [0, 32], sizes = [32, 32], strides = [1, 1]} : vector<32x96xf32> to vector<32x32xf32>
    %44 = vector.shape_cast %43 : vector<32x32xf32> to vector<2x16x32xf32>
    %45 = vector.extract_strided_slice %38 {offsets = [0, 64], sizes = [32, 32], strides = [1, 1]} : vector<32x96xf32> to vector<32x32xf32>
    %46 = vector.shape_cast %45 : vector<32x32xf32> to vector<2x16x32xf32>
    %47 = vector.extract_strided_slice %42 {offsets = [0, 0, 0], sizes = [2, 16, 8], strides = [1, 1, 1]} : vector<2x16x32xf32> to vector<2x16x8xf32>
    %48 = vector.extract_strided_slice %44 {offsets = [0, 0, 0], sizes = [2, 16, 8], strides = [1, 1, 1]} : vector<2x16x32xf32> to vector<2x16x8xf32>
    "tpu.trace_start"() <{level = 10 : i32, message = "bqd,bkd->bqk"}> : () -> ()
    %cst_22 = arith.constant dense<0.000000e+00> : vector<2x16x16xf32>
    %49 = tpu.matmul %47, %48, %cst_22 {dimension_numbers = #tpu.dot_dimension_numbers<[2], [2], [1], [1], [0, 0, 0, 1, 1, 1], [0], [0]>} : vector<2x16x8xf32>, vector<2x16x8xf32>, vector<2x16x16xf32> -> vector<2x16x16xf32>
    "tpu.trace_stop"() : () -> ()
    %cst_23 = arith.constant dense<0xFF800000> : vector<2x16xf32>
    %50 = vector.multi_reduction <maximumf>, %49, %cst_23 [2] : vector<2x16x16xf32> to vector<2x16xf32>
    %51 = vector.shape_cast %50 : vector<2x16xf32> to vector<2x16x1xf32>
    %52 = vector.broadcast %51 : vector<2x16x1xf32> to vector<2x16x16xf32>
    %53 = arith.subf %49, %52 : vector<2x16x16xf32>
    %54 = math.exp %53 : vector<2x16x16xf32>
    %cst_24 = arith.constant dense<0.000000e+00> : vector<2x16xf32>
    %55 = vector.multi_reduction <add>, %54, %cst_24 [2] : vector<2x16x16xf32> to vector<2x16xf32>
    %56 = vector.shape_cast %55 : vector<2x16xf32> to vector<2x16x1xf32>
    %57 = tpu.reciprocal %56 {approx = true} : vector<2x16x1xf32> -> vector<2x16x1xf32>
    %58 = vector.broadcast %57 : vector<2x16x1xf32> to vector<2x16x16xf32>
    %59 = arith.mulf %54, %58 : vector<2x16x16xf32>
    %60 = vector.extract_strided_slice %46 {offsets = [0, 0, 0], sizes = [2, 16, 8], strides = [1, 1, 1]} : vector<2x16x32xf32> to vector<2x16x8xf32>
    "tpu.trace_start"() <{level = 10 : i32, message = "bqk,bkd->bqd"}> : () -> ()
    %cst_25 = arith.constant dense<0.000000e+00> : vector<2x16x8xf32>
    %61 = tpu.matmul %59, %60, %cst_25 {dimension_numbers = #tpu.dot_dimension_numbers<[2], [1], [1], [2], [0, 0, 0, 1, 1, 2], [0], [0]>} : vector<2x16x16xf32>, vector<2x16x8xf32>, vector<2x16x8xf32> -> vector<2x16x8xf32>
    "tpu.trace_stop"() : () -> ()
    %c0_26 = arith.constant 0 : index
    %c0_27 = arith.constant 0 : index
    %c0_28 = arith.constant 0 : index
    %62 = vector.load %arg20[%c0_26, %c0_27, %c0_28] : memref<2x16x32xf32, #tpu.memory_space<vmem>>, vector<2x16x8xf32>
    tpu.vector_store %arg20[%c0_26, %c0_27, %c0_28], %61 {strides = array<i32>} : memref<2x16x32xf32, #tpu.memory_space<vmem>>, vector<2x16x8xf32>,
    %63 = vector.extract_strided_slice %42 {offsets = [0, 0, 8], sizes = [2, 16, 8], strides = [1, 1, 1]} : vector<2x16x32xf32> to vector<2x16x8xf32>
    %64 = vector.extract_strided_slice %44 {offsets = [0, 0, 8], sizes = [2, 16, 8], strides = [1, 1, 1]} : vector<2x16x32xf32> to vector<2x16x8xf32>
    "tpu.trace_start"() <{level = 10 : i32, message = "bqd,bkd->bqk"}> : () -> ()
    %cst_29 = arith.constant dense<0.000000e+00> : vector<2x16x16xf32>
    %65 = tpu.matmul %63, %64, %cst_29 {dimension_numbers = #tpu.dot_dimension_numbers<[2], [2], [1], [1], [0, 0, 0, 1, 1, 1], [0], [0]>} : vector<2x16x8xf32>, vector<2x16x8xf32>, vector<2x16x16xf32> -> vector<2x16x16xf32>
    "tpu.trace_stop"() : () -> ()
    %cst_30 = arith.constant dense<0xFF800000> : vector<2x16xf32>
    %66 = vector.multi_reduction <maximumf>, %65, %cst_30 [2] : vector<2x16x16xf32> to vector<2x16xf32>
    %67 = vector.shape_cast %66 : vector<2x16xf32> to vector<2x16x1xf32>
    %68 = vector.broadcast %67 : vector<2x16x1xf32> to vector<2x16x16xf32>
    %69 = arith.subf %65, %68 : vector<2x16x16xf32>
    %70 = math.exp %69 : vector<2x16x16xf32>
    %cst_31 = arith.constant dense<0.000000e+00> : vector<2x16xf32>
    %71 = vector.multi_reduction <add>, %70, %cst_31 [2] : vector<2x16x16xf32> to vector<2x16xf32>
    %72 = vector.shape_cast %71 : vector<2x16xf32> to vector<2x16x1xf32>
    %73 = tpu.reciprocal %72 {approx = true} : vector<2x16x1xf32> -> vector<2x16x1xf32>
    %74 = vector.broadcast %73 : vector<2x16x1xf32> to vector<2x16x16xf32>
    %75 = arith.mulf %70, %74 : vector<2x16x16xf32>
    %76 = vector.extract_strided_slice %46 {offsets = [0, 0, 8], sizes = [2, 16, 8], strides = [1, 1, 1]} : vector<2x16x32xf32> to vector<2x16x8xf32>
    "tpu.trace_start"() <{level = 10 : i32, message = "bqk,bkd->bqd"}> : () -> ()
    %cst_32 = arith.constant dense<0.000000e+00> : vector<2x16x8xf32>
    %77 = tpu.matmul %75, %76, %cst_32 {dimension_numbers = #tpu.dot_dimension_numbers<[2], [1], [1], [2], [0, 0, 0, 1, 1, 2], [0], [0]>} : vector<2x16x16xf32>, vector<2x16x8xf32>, vector<2x16x8xf32> -> vector<2x16x8xf32>
    "tpu.trace_stop"() : () -> ()
    %c0_33 = arith.constant 0 : index
    %c0_34 = arith.constant 0 : index
    %c8 = arith.constant 8 : index
    %78 = vector.load %arg20[%c0_33, %c0_34, %c8] : memref<2x16x32xf32, #tpu.memory_space<vmem>>, vector<2x16x8xf32>
    tpu.vector_store %arg20[%c0_33, %c0_34, %c8], %77 {strides = array<i32>} : memref<2x16x32xf32, #tpu.memory_space<vmem>>, vector<2x16x8xf32>,
    %79 = vector.extract_strided_slice %42 {offsets = [0, 0, 16], sizes = [2, 16, 8], strides = [1, 1, 1]} : vector<2x16x32xf32> to vector<2x16x8xf32>
    %80 = vector.extract_strided_slice %44 {offsets = [0, 0, 16], sizes = [2, 16, 8], strides = [1, 1, 1]} : vector<2x16x32xf32> to vector<2x16x8xf32>
    "tpu.trace_start"() <{level = 10 : i32, message = "bqd,bkd->bqk"}> : () -> ()
    %cst_35 = arith.constant dense<0.000000e+00> : vector<2x16x16xf32>
    %81 = tpu.matmul %79, %80, %cst_35 {dimension_numbers = #tpu.dot_dimension_numbers<[2], [2], [1], [1], [0, 0, 0, 1, 1, 1], [0], [0]>} : vector<2x16x8xf32>, vector<2x16x8xf32>, vector<2x16x16xf32> -> vector<2x16x16xf32>
    "tpu.trace_stop"() : () -> ()
    %cst_36 = arith.constant dense<0xFF800000> : vector<2x16xf32>
    %82 = vector.multi_reduction <maximumf>, %81, %cst_36 [2] : vector<2x16x16xf32> to vector<2x16xf32>
    %83 = vector.shape_cast %82 : vector<2x16xf32> to vector<2x16x1xf32>
    %84 = vector.broadcast %83 : vector<2x16x1xf32> to vector<2x16x16xf32>
    %85 = arith.subf %81, %84 : vector<2x16x16xf32>
    %86 = math.exp %85 : vector<2x16x16xf32>
    %cst_37 = arith.constant dense<0.000000e+00> : vector<2x16xf32>
    %87 = vector.multi_reduction <add>, %86, %cst_37 [2] : vector<2x16x16xf32> to vector<2x16xf32>
    %88 = vector.shape_cast %87 : vector<2x16xf32> to vector<2x16x1xf32>
    %89 = tpu.reciprocal %88 {approx = true} : vector<2x16x1xf32> -> vector<2x16x1xf32>
    %90 = vector.broadcast %89 : vector<2x16x1xf32> to vector<2x16x16xf32>
    %91 = arith.mulf %86, %90 : vector<2x16x16xf32>
    %92 = vector.extract_strided_slice %46 {offsets = [0, 0, 16], sizes = [2, 16, 8], strides = [1, 1, 1]} : vector<2x16x32xf32> to vector<2x16x8xf32>
    "tpu.trace_start"() <{level = 10 : i32, message = "bqk,bkd->bqd"}> : () -> ()
    %cst_38 = arith.constant dense<0.000000e+00> : vector<2x16x8xf32>
    %93 = tpu.matmul %91, %92, %cst_38 {dimension_numbers = #tpu.dot_dimension_numbers<[2], [1], [1], [2], [0, 0, 0, 1, 1, 2], [0], [0]>} : vector<2x16x16xf32>, vector<2x16x8xf32>, vector<2x16x8xf32> -> vector<2x16x8xf32>
    "tpu.trace_stop"() : () -> ()
    %c0_39 = arith.constant 0 : index
    %c0_40 = arith.constant 0 : index
    %c16 = arith.constant 16 : index
    %94 = vector.load %arg20[%c0_39, %c0_40, %c16] : memref<2x16x32xf32, #tpu.memory_space<vmem>>, vector<2x16x8xf32>
    tpu.vector_store %arg20[%c0_39, %c0_40, %c16], %93 {strides = array<i32>} : memref<2x16x32xf32, #tpu.memory_space<vmem>>, vector<2x16x8xf32>,
    %95 = vector.extract_strided_slice %42 {offsets = [0, 0, 24], sizes = [2, 16, 8], strides = [1, 1, 1]} : vector<2x16x32xf32> to vector<2x16x8xf32>
    %96 = vector.extract_strided_slice %44 {offsets = [0, 0, 24], sizes = [2, 16, 8], strides = [1, 1, 1]} : vector<2x16x32xf32> to vector<2x16x8xf32>
    "tpu.trace_start"() <{level = 10 : i32, message = "bqd,bkd->bqk"}> : () -> ()
    %cst_41 = arith.constant dense<0.000000e+00> : vector<2x16x16xf32>
    %97 = tpu.matmul %95, %96, %cst_41 {dimension_numbers = #tpu.dot_dimension_numbers<[2], [2], [1], [1], [0, 0, 0, 1, 1, 1], [0], [0]>} : vector<2x16x8xf32>, vector<2x16x8xf32>, vector<2x16x16xf32> -> vector<2x16x16xf32>
    "tpu.trace_stop"() : () -> ()
    %cst_42 = arith.constant dense<0xFF800000> : vector<2x16xf32>
    %98 = vector.multi_reduction <maximumf>, %97, %cst_42 [2] : vector<2x16x16xf32> to vector<2x16xf32>
    %99 = vector.shape_cast %98 : vector<2x16xf32> to vector<2x16x1xf32>
    %100 = vector.broadcast %99 : vector<2x16x1xf32> to vector<2x16x16xf32>
    %101 = arith.subf %97, %100 : vector<2x16x16xf32>
    %102 = math.exp %101 : vector<2x16x16xf32>
    %cst_43 = arith.constant dense<0.000000e+00> : vector<2x16xf32>
    %103 = vector.multi_reduction <add>, %102, %cst_43 [2] : vector<2x16x16xf32> to vector<2x16xf32>
    %104 = vector.shape_cast %103 : vector<2x16xf32> to vector<2x16x1xf32>
    %105 = tpu.reciprocal %104 {approx = true} : vector<2x16x1xf32> -> vector<2x16x1xf32>
    %106 = vector.broadcast %105 : vector<2x16x1xf32> to vector<2x16x16xf32>
    %107 = arith.mulf %102, %106 : vector<2x16x16xf32>
    %108 = vector.extract_strided_slice %46 {offsets = [0, 0, 24], sizes = [2, 16, 8], strides = [1, 1, 1]} : vector<2x16x32xf32> to vector<2x16x8xf32>
    "tpu.trace_start"() <{level = 10 : i32, message = "bqk,bkd->bqd"}> : () -> ()
    %cst_44 = arith.constant dense<0.000000e+00> : vector<2x16x8xf32>
    %109 = tpu.matmul %107, %108, %cst_44 {dimension_numbers = #tpu.dot_dimension_numbers<[2], [1], [1], [2], [0, 0, 0, 1, 1, 2], [0], [0]>} : vector<2x16x16xf32>, vector<2x16x8xf32>, vector<2x16x8xf32> -> vector<2x16x8xf32>
    "tpu.trace_stop"() : () -> ()
    %c0_45 = arith.constant 0 : index
    %c0_46 = arith.constant 0 : index
    %c24 = arith.constant 24 : index
    %110 = vector.load %arg20[%c0_45, %c0_46, %c24] : memref<2x16x32xf32, #tpu.memory_space<vmem>>, vector<2x16x8xf32>
    tpu.vector_store %arg20[%c0_45, %c0_46, %c24], %109 {strides = array<i32>} : memref<2x16x32xf32, #tpu.memory_space<vmem>>, vector<2x16x8xf32>,
    %c0_47 = arith.constant 0 : index
    %c0_48 = arith.constant 0 : index
    %c0_49 = arith.constant 0 : index
    %111 = vector.load %arg20[%c0_47, %c0_48, %c0_49] : memref<2x16x32xf32, #tpu.memory_space<vmem>>, vector<2x16x32xf32>
    %112 = vector.shape_cast %111 : vector<2x16x32xf32> to vector<32x32xf32>
    %c0_50 = arith.constant 0 : index
    %c0_51 = arith.constant 0 : index
    %c0_52 = arith.constant 0 : index
    %113 = vector.load %arg7[%c0_50, %c0_51, %c0_52] : memref<2x32x32xf32, #tpu.memory_space<vmem>>, vector<1x32x32xf32>
    %114 = vector.shape_cast %113 : vector<1x32x32xf32> to vector<32x32xf32>
    %cst_53 = arith.constant dense<0.000000e+00> : vector<32x32xf32>
    %115 = tpu.matmul %112, %114, %cst_53 {dimension_numbers = #tpu.dot_dimension_numbers<[1], [0], [0], [1], [0, 0, 1, 1], [], []>} : vector<32x32xf32>, vector<32x32xf32>, vector<32x32xf32> -> vector<32x32xf32>
    %c0_54 = arith.constant 0 : index
    %c0_55 = arith.constant 0 : index
    %c0_56 = arith.constant 0 : index
    %116 = vector.load %arg8[%c0_54, %c0_55, %c0_56] : memref<2x1x32xf32, #tpu.memory_space<vmem>>, vector<1x1x32xf32>
    %117 = vector.shape_cast %116 : vector<1x1x32xf32> to vector<1x32xf32>
    %118 = vector.broadcast %117 : vector<1x32xf32> to vector<32x32xf32>
    %119 = arith.addf %115, %118 : vector<32x32xf32>
    %120 = arith.addf %5, %119 : vector<32x32xf32>
    %c0_57 = arith.constant 0 : index
    %c0_58 = arith.constant 0 : index
    %c0_59 = arith.constant 0 : index
    %121 = vector.load %arg9[%c0_57, %c0_58, %c0_59] : memref<2x1x32xf32, #tpu.memory_space<vmem>>, vector<1x1x32xf32>
    %122 = vector.shape_cast %121 : vector<1x1x32xf32> to vector<1x32xf32>
    %c0_60 = arith.constant 0 : index
    %c0_61 = arith.constant 0 : index
    %c0_62 = arith.constant 0 : index
    %123 = vector.load %arg10[%c0_60, %c0_61, %c0_62] : memref<2x1x32xf32, #tpu.memory_space<vmem>>, vector<1x1x32xf32>
    %124 = vector.shape_cast %123 : vector<1x1x32xf32> to vector<1x32xf32>
    %cst_63 = arith.constant dense<0.000000e+00> : vector<32xf32>
    %125 = vector.multi_reduction <add>, %120, %cst_63 [1] : vector<32x32xf32> to vector<32xf32>
    %126 = vector.shape_cast %125 : vector<32xf32> to vector<32x1xf32>
    %cst_64 = arith.constant 3.200000e+01 : f32
    %127 = vector.broadcast %cst_64 : f32 to vector<32x1xf32>
    %128 = arith.divf %126, %127 : vector<32x1xf32>
    %129 = vector.broadcast %128 : vector<32x1xf32> to vector<32x32xf32>
    %130 = arith.subf %120, %129 : vector<32x32xf32>
    %131 = arith.mulf %130, %130 : vector<32x32xf32>
    %cst_65 = arith.constant dense<0.000000e+00> : vector<32xf32>
    %132 = vector.multi_reduction <add>, %131, %cst_65 [1] : vector<32x32xf32> to vector<32xf32>
    %133 = vector.shape_cast %132 : vector<32xf32> to vector<32x1xf32>
    %cst_66 = arith.constant 3.200000e+01 : f32
    %134 = vector.broadcast %cst_66 : f32 to vector<32x1xf32>
    %135 = arith.divf %133, %134 : vector<32x1xf32>
    %136 = vector.broadcast %128 : vector<32x1xf32> to vector<32x32xf32>
    %137 = arith.subf %120, %136 : vector<32x32xf32>
    %cst_67 = arith.constant 9.99999974E-6 : f32
    %138 = vector.broadcast %cst_67 : f32 to vector<32x1xf32>
    %139 = arith.addf %135, %138 : vector<32x1xf32>
    %140 = math.rsqrt %139 : vector<32x1xf32>
    %141 = vector.broadcast %140 : vector<32x1xf32> to vector<32x32xf32>
    %142 = arith.mulf %137, %141 : vector<32x32xf32>
    %143 = vector.broadcast %122 : vector<1x32xf32> to vector<32x32xf32>
    %144 = arith.mulf %142, %143 : vector<32x32xf32>
    %145 = vector.broadcast %124 : vector<1x32xf32> to vector<32x32xf32>
    %146 = arith.addf %144, %145 : vector<32x32xf32>
    %c0_68 = arith.constant 0 : index
    %c0_69 = arith.constant 0 : index
    %c0_70 = arith.constant 0 : index
    %147 = vector.load %arg11[%c0_68, %c0_69, %c0_70] : memref<2x32x128xf32, #tpu.memory_space<vmem>>, vector<1x32x128xf32>
    %148 = vector.shape_cast %147 : vector<1x32x128xf32> to vector<32x128xf32>
    %cst_71 = arith.constant dense<0.000000e+00> : vector<32x128xf32>
    %149 = tpu.matmul %146, %148, %cst_71 {dimension_numbers = #tpu.dot_dimension_numbers<[1], [0], [0], [1], [0, 0, 1, 1], [], []>} : vector<32x32xf32>, vector<32x128xf32>, vector<32x128xf32> -> vector<32x128xf32>
    %c0_72 = arith.constant 0 : index
    %c0_73 = arith.constant 0 : index
    %c0_74 = arith.constant 0 : index
    %150 = vector.load %arg12[%c0_72, %c0_73, %c0_74] : memref<2x1x128xf32, #tpu.memory_space<vmem>>, vector<1x1x128xf32>
    %151 = vector.shape_cast %150 : vector<1x1x128xf32> to vector<1x128xf32>
    %152 = vector.broadcast %151 : vector<1x128xf32> to vector<32x128xf32>
    %153 = arith.addf %149, %152 : vector<32x128xf32>
    %cst_75 = arith.constant 5.000000e-01 : f32
    %154 = vector.broadcast %cst_75 : f32 to vector<32x128xf32>
    %155 = arith.mulf %154, %153 : vector<32x128xf32>
    %cst_76 = arith.constant 0.707106769 : f32
    %156 = vector.broadcast %cst_76 : f32 to vector<32x128xf32>
    %157 = arith.mulf %153, %156 : vector<32x128xf32>
    %158 = math.erf %157 : vector<32x128xf32>
    %cst_77 = arith.constant 1.000000e+00 : f32
    %159 = vector.broadcast %cst_77 : f32 to vector<32x128xf32>
    %160 = arith.addf %159, %158 : vector<32x128xf32>
    %161 = arith.mulf %155, %160 : vector<32x128xf32>
    %c0_78 = arith.constant 0 : index
    %c0_79 = arith.constant 0 : index
    %c0_80 = arith.constant 0 : index
    %162 = vector.load %arg13[%c0_78, %c0_79, %c0_80] : memref<2x128x32xf32, #tpu.memory_space<vmem>>, vector<1x128x32xf32>
    %163 = vector.shape_cast %162 : vector<1x128x32xf32> to vector<128x32xf32>
    %cst_81 = arith.constant dense<0.000000e+00> : vector<32x32xf32>
    %164 = tpu.matmul %161, %163, %cst_81 {dimension_numbers = #tpu.dot_dimension_numbers<[1], [0], [0], [1], [0, 0, 1, 1], [], []>} : vector<32x128xf32>, vector<128x32xf32>, vector<32x32xf32> -> vector<32x32xf32>
    %c0_82 = arith.constant 0 : index
    %c0_83 = arith.constant 0 : index
    %c0_84 = arith.constant 0 : index
    %165 = vector.load %arg14[%c0_82, %c0_83, %c0_84] : memref<2x1x32xf32, #tpu.memory_space<vmem>>, vector<1x1x32xf32>
    %166 = vector.shape_cast %165 : vector<1x1x32xf32> to vector<1x32xf32>
    %167 = vector.broadcast %166 : vector<1x32xf32> to vector<32x32xf32>
    %168 = arith.addf %164, %167 : vector<32x32xf32>
    %169 = arith.addf %120, %168 : vector<32x32xf32>
    %c1 = arith.constant 1 : index
    %c0_85 = arith.constant 0 : index
    %c0_86 = arith.constant 0 : index
    %170 = vector.load %arg3[%c1, %c0_85, %c0_86] : memref<2x1x32xf32, #tpu.memory_space<vmem>>, vector<1x1x32xf32>
    %171 = vector.shape_cast %170 : vector<1x1x32xf32> to vector<1x32xf32>
    %c1_87 = arith.constant 1 : index
    %c0_88 = arith.constant 0 : index
    %c0_89 = arith.constant 0 : index
    %172 = vector.load %arg4[%c1_87, %c0_88, %c0_89] : memref<2x1x32xf32, #tpu.memory_space<vmem>>, vector<1x1x32xf32>
    %173 = vector.shape_cast %172 : vector<1x1x32xf32> to vector<1x32xf32>
    %cst_90 = arith.constant dense<0.000000e+00> : vector<32xf32>
    %174 = vector.multi_reduction <add>, %169, %cst_90 [1] : vector<32x32xf32> to vector<32xf32>
    %175 = vector.shape_cast %174 : vector<32xf32> to vector<32x1xf32>
    %cst_91 = arith.constant 3.200000e+01 : f32
    %176 = vector.broadcast %cst_91 : f32 to vector<32x1xf32>
    %177 = arith.divf %175, %176 : vector<32x1xf32>
    %178 = vector.broadcast %177 : vector<32x1xf32> to vector<32x32xf32>
    %179 = arith.subf %169, %178 : vector<32x32xf32>
    %180 = arith.mulf %179, %179 : vector<32x32xf32>
    %cst_92 = arith.constant dense<0.000000e+00> : vector<32xf32>
    %181 = vector.multi_reduction <add>, %180, %cst_92 [1] : vector<32x32xf32> to vector<32xf32>
    %182 = vector.shape_cast %181 : vector<32xf32> to vector<32x1xf32>
    %cst_93 = arith.constant 3.200000e+01 : f32
    %183 = vector.broadcast %cst_93 : f32 to vector<32x1xf32>
    %184 = arith.divf %182, %183 : vector<32x1xf32>
    %185 = vector.broadcast %177 : vector<32x1xf32> to vector<32x32xf32>
    %186 = arith.subf %169, %185 : vector<32x32xf32>
    %cst_94 = arith.constant 9.99999974E-6 : f32
    %187 = vector.broadcast %cst_94 : f32 to vector<32x1xf32>
    %188 = arith.addf %184, %187 : vector<32x1xf32>
    %189 = math.rsqrt %188 : vector<32x1xf32>
    %190 = vector.broadcast %189 : vector<32x1xf32> to vector<32x32xf32>
    %191 = arith.mulf %186, %190 : vector<32x32xf32>
    %192 = vector.broadcast %171 : vector<1x32xf32> to vector<32x32xf32>
    %193 = arith.mulf %191, %192 : vector<32x32xf32>
    %194 = vector.broadcast %173 : vector<1x32xf32> to vector<32x32xf32>
    %195 = arith.addf %193, %194 : vector<32x32xf32>
    %c1_95 = arith.constant 1 : index
    %c0_96 = arith.constant 0 : index
    %c0_97 = arith.constant 0 : index
    %196 = vector.load %arg5[%c1_95, %c0_96, %c0_97] : memref<2x32x96xf32, #tpu.memory_space<vmem>>, vector<1x32x96xf32>
    %197 = vector.shape_cast %196 : vector<1x32x96xf32> to vector<32x96xf32>
    %cst_98 = arith.constant dense<0.000000e+00> : vector<32x96xf32>
    %198 = tpu.matmul %195, %197, %cst_98 {dimension_numbers = #tpu.dot_dimension_numbers<[1], [0], [0], [1], [0, 0, 1, 1], [], []>} : vector<32x32xf32>, vector<32x96xf32>, vector<32x96xf32> -> vector<32x96xf32>
    %c1_99 = arith.constant 1 : index
    %c0_100 = arith.constant 0 : index
    %c0_101 = arith.constant 0 : index
    %199 = vector.load %arg6[%c1_99, %c0_100, %c0_101] : memref<2x1x96xf32, #tpu.memory_space<vmem>>, vector<1x1x96xf32>
    %200 = vector.shape_cast %199 : vector<1x1x96xf32> to vector<1x96xf32>
    %201 = vector.broadcast %200 : vector<1x96xf32> to vector<32x96xf32>
    %202 = arith.addf %198, %201 : vector<32x96xf32>
    %203 = vector.extract_strided_slice %202 {offsets = [0, 0], sizes = [32, 32], strides = [1, 1]} : vector<32x96xf32> to vector<32x32xf32>
    %cst_102 = arith.constant 0.353553385 : f32
    %204 = vector.broadcast %cst_102 : f32 to vector<32x32xf32>
    %205 = arith.mulf %203, %204 : vector<32x32xf32>
    %206 = vector.shape_cast %205 : vector<32x32xf32> to vector<2x16x32xf32>
    %207 = vector.extract_strided_slice %202 {offsets = [0, 32], sizes = [32, 32], strides = [1, 1]} : vector<32x96xf32> to vector<32x32xf32>
    %208 = vector.shape_cast %207 : vector<32x32xf32> to vector<2x16x32xf32>
    %209 = vector.extract_strided_slice %202 {offsets = [0, 64], sizes = [32, 32], strides = [1, 1]} : vector<32x96xf32> to vector<32x32xf32>
    %210 = vector.shape_cast %209 : vector<32x32xf32> to vector<2x16x32xf32>
    %211 = vector.extract_strided_slice %206 {offsets = [0, 0, 0], sizes = [2, 16, 8], strides = [1, 1, 1]} : vector<2x16x32xf32> to vector<2x16x8xf32>
    %212 = vector.extract_strided_slice %208 {offsets = [0, 0, 0], sizes = [2, 16, 8], strides = [1, 1, 1]} : vector<2x16x32xf32> to vector<2x16x8xf32>
    "tpu.trace_start"() <{level = 10 : i32, message = "bqd,bkd->bqk"}> : () -> ()
    %cst_103 = arith.constant dense<0.000000e+00> : vector<2x16x16xf32>
    %213 = tpu.matmul %211, %212, %cst_103 {dimension_numbers = #tpu.dot_dimension_numbers<[2], [2], [1], [1], [0, 0, 0, 1, 1, 1], [0], [0]>} : vector<2x16x8xf32>, vector<2x16x8xf32>, vector<2x16x16xf32> -> vector<2x16x16xf32>
    "tpu.trace_stop"() : () -> ()
    %cst_104 = arith.constant dense<0xFF800000> : vector<2x16xf32>
    %214 = vector.multi_reduction <maximumf>, %213, %cst_104 [2] : vector<2x16x16xf32> to vector<2x16xf32>
    %215 = vector.shape_cast %214 : vector<2x16xf32> to vector<2x16x1xf32>
    %216 = vector.broadcast %215 : vector<2x16x1xf32> to vector<2x16x16xf32>
    %217 = arith.subf %213, %216 : vector<2x16x16xf32>
    %218 = math.exp %217 : vector<2x16x16xf32>
    %cst_105 = arith.constant dense<0.000000e+00> : vector<2x16xf32>
    %219 = vector.multi_reduction <add>, %218, %cst_105 [2] : vector<2x16x16xf32> to vector<2x16xf32>
    %220 = vector.shape_cast %219 : vector<2x16xf32> to vector<2x16x1xf32>
    %221 = tpu.reciprocal %220 {approx = true} : vector<2x16x1xf32> -> vector<2x16x1xf32>
    %222 = vector.broadcast %221 : vector<2x16x1xf32> to vector<2x16x16xf32>
    %223 = arith.mulf %218, %222 : vector<2x16x16xf32>
    %224 = vector.extract_strided_slice %210 {offsets = [0, 0, 0], sizes = [2, 16, 8], strides = [1, 1, 1]} : vector<2x16x32xf32> to vector<2x16x8xf32>
    "tpu.trace_start"() <{level = 10 : i32, message = "bqk,bkd->bqd"}> : () -> ()
    %cst_106 = arith.constant dense<0.000000e+00> : vector<2x16x8xf32>
    %225 = tpu.matmul %223, %224, %cst_106 {dimension_numbers = #tpu.dot_dimension_numbers<[2], [1], [1], [2], [0, 0, 0, 1, 1, 2], [0], [0]>} : vector<2x16x16xf32>, vector<2x16x8xf32>, vector<2x16x8xf32> -> vector<2x16x8xf32>
    "tpu.trace_stop"() : () -> ()
    %c0_107 = arith.constant 0 : index
    %c0_108 = arith.constant 0 : index
    %c0_109 = arith.constant 0 : index
    %226 = vector.load %arg20[%c0_107, %c0_108, %c0_109] : memref<2x16x32xf32, #tpu.memory_space<vmem>>, vector<2x16x8xf32>
    tpu.vector_store %arg20[%c0_107, %c0_108, %c0_109], %225 {strides = array<i32>} : memref<2x16x32xf32, #tpu.memory_space<vmem>>, vector<2x16x8xf32>,
    %227 = vector.extract_strided_slice %206 {offsets = [0, 0, 8], sizes = [2, 16, 8], strides = [1, 1, 1]} : vector<2x16x32xf32> to vector<2x16x8xf32>
    %228 = vector.extract_strided_slice %208 {offsets = [0, 0, 8], sizes = [2, 16, 8], strides = [1, 1, 1]} : vector<2x16x32xf32> to vector<2x16x8xf32>
    "tpu.trace_start"() <{level = 10 : i32, message = "bqd,bkd->bqk"}> : () -> ()
    %cst_110 = arith.constant dense<0.000000e+00> : vector<2x16x16xf32>
    %229 = tpu.matmul %227, %228, %cst_110 {dimension_numbers = #tpu.dot_dimension_numbers<[2], [2], [1], [1], [0, 0, 0, 1, 1, 1], [0], [0]>} : vector<2x16x8xf32>, vector<2x16x8xf32>, vector<2x16x16xf32> -> vector<2x16x16xf32>
    "tpu.trace_stop"() : () -> ()
    %cst_111 = arith.constant dense<0xFF800000> : vector<2x16xf32>
    %230 = vector.multi_reduction <maximumf>, %229, %cst_111 [2] : vector<2x16x16xf32> to vector<2x16xf32>
    %231 = vector.shape_cast %230 : vector<2x16xf32> to vector<2x16x1xf32>
    %232 = vector.broadcast %231 : vector<2x16x1xf32> to vector<2x16x16xf32>
    %233 = arith.subf %229, %232 : vector<2x16x16xf32>
    %234 = math.exp %233 : vector<2x16x16xf32>
    %cst_112 = arith.constant dense<0.000000e+00> : vector<2x16xf32>
    %235 = vector.multi_reduction <add>, %234, %cst_112 [2] : vector<2x16x16xf32> to vector<2x16xf32>
    %236 = vector.shape_cast %235 : vector<2x16xf32> to vector<2x16x1xf32>
    %237 = tpu.reciprocal %236 {approx = true} : vector<2x16x1xf32> -> vector<2x16x1xf32>
    %238 = vector.broadcast %237 : vector<2x16x1xf32> to vector<2x16x16xf32>
    %239 = arith.mulf %234, %238 : vector<2x16x16xf32>
    %240 = vector.extract_strided_slice %210 {offsets = [0, 0, 8], sizes = [2, 16, 8], strides = [1, 1, 1]} : vector<2x16x32xf32> to vector<2x16x8xf32>
    "tpu.trace_start"() <{level = 10 : i32, message = "bqk,bkd->bqd"}> : () -> ()
    %cst_113 = arith.constant dense<0.000000e+00> : vector<2x16x8xf32>
    %241 = tpu.matmul %239, %240, %cst_113 {dimension_numbers = #tpu.dot_dimension_numbers<[2], [1], [1], [2], [0, 0, 0, 1, 1, 2], [0], [0]>} : vector<2x16x16xf32>, vector<2x16x8xf32>, vector<2x16x8xf32> -> vector<2x16x8xf32>
    "tpu.trace_stop"() : () -> ()
    %c0_114 = arith.constant 0 : index
    %c0_115 = arith.constant 0 : index
    %c8_116 = arith.constant 8 : index
    %242 = vector.load %arg20[%c0_114, %c0_115, %c8_116] : memref<2x16x32xf32, #tpu.memory_space<vmem>>, vector<2x16x8xf32>
    tpu.vector_store %arg20[%c0_114, %c0_115, %c8_116], %241 {strides = array<i32>} : memref<2x16x32xf32, #tpu.memory_space<vmem>>, vector<2x16x8xf32>,
    %243 = vector.extract_strided_slice %206 {offsets = [0, 0, 16], sizes = [2, 16, 8], strides = [1, 1, 1]} : vector<2x16x32xf32> to vector<2x16x8xf32>
    %244 = vector.extract_strided_slice %208 {offsets = [0, 0, 16], sizes = [2, 16, 8], strides = [1, 1, 1]} : vector<2x16x32xf32> to vector<2x16x8xf32>
    "tpu.trace_start"() <{level = 10 : i32, message = "bqd,bkd->bqk"}> : () -> ()
    %cst_117 = arith.constant dense<0.000000e+00> : vector<2x16x16xf32>
    %245 = tpu.matmul %243, %244, %cst_117 {dimension_numbers = #tpu.dot_dimension_numbers<[2], [2], [1], [1], [0, 0, 0, 1, 1, 1], [0], [0]>} : vector<2x16x8xf32>, vector<2x16x8xf32>, vector<2x16x16xf32> -> vector<2x16x16xf32>
    "tpu.trace_stop"() : () -> ()
    %cst_118 = arith.constant dense<0xFF800000> : vector<2x16xf32>
    %246 = vector.multi_reduction <maximumf>, %245, %cst_118 [2] : vector<2x16x16xf32> to vector<2x16xf32>
    %247 = vector.shape_cast %246 : vector<2x16xf32> to vector<2x16x1xf32>
    %248 = vector.broadcast %247 : vector<2x16x1xf32> to vector<2x16x16xf32>
    %249 = arith.subf %245, %248 : vector<2x16x16xf32>
    %250 = math.exp %249 : vector<2x16x16xf32>
    %cst_119 = arith.constant dense<0.000000e+00> : vector<2x16xf32>
    %251 = vector.multi_reduction <add>, %250, %cst_119 [2] : vector<2x16x16xf32> to vector<2x16xf32>
    %252 = vector.shape_cast %251 : vector<2x16xf32> to vector<2x16x1xf32>
    %253 = tpu.reciprocal %252 {approx = true} : vector<2x16x1xf32> -> vector<2x16x1xf32>
    %254 = vector.broadcast %253 : vector<2x16x1xf32> to vector<2x16x16xf32>
    %255 = arith.mulf %250, %254 : vector<2x16x16xf32>
    %256 = vector.extract_strided_slice %210 {offsets = [0, 0, 16], sizes = [2, 16, 8], strides = [1, 1, 1]} : vector<2x16x32xf32> to vector<2x16x8xf32>
    "tpu.trace_start"() <{level = 10 : i32, message = "bqk,bkd->bqd"}> : () -> ()
    %cst_120 = arith.constant dense<0.000000e+00> : vector<2x16x8xf32>
    %257 = tpu.matmul %255, %256, %cst_120 {dimension_numbers = #tpu.dot_dimension_numbers<[2], [1], [1], [2], [0, 0, 0, 1, 1, 2], [0], [0]>} : vector<2x16x16xf32>, vector<2x16x8xf32>, vector<2x16x8xf32> -> vector<2x16x8xf32>
    "tpu.trace_stop"() : () -> ()
    %c0_121 = arith.constant 0 : index
    %c0_122 = arith.constant 0 : index
    %c16_123 = arith.constant 16 : index
    %258 = vector.load %arg20[%c0_121, %c0_122, %c16_123] : memref<2x16x32xf32, #tpu.memory_space<vmem>>, vector<2x16x8xf32>
    tpu.vector_store %arg20[%c0_121, %c0_122, %c16_123], %257 {strides = array<i32>} : memref<2x16x32xf32, #tpu.memory_space<vmem>>, vector<2x16x8xf32>,
    %259 = vector.extract_strided_slice %206 {offsets = [0, 0, 24], sizes = [2, 16, 8], strides = [1, 1, 1]} : vector<2x16x32xf32> to vector<2x16x8xf32>
    %260 = vector.extract_strided_slice %208 {offsets = [0, 0, 24], sizes = [2, 16, 8], strides = [1, 1, 1]} : vector<2x16x32xf32> to vector<2x16x8xf32>
    "tpu.trace_start"() <{level = 10 : i32, message = "bqd,bkd->bqk"}> : () -> ()
    %cst_124 = arith.constant dense<0.000000e+00> : vector<2x16x16xf32>
    %261 = tpu.matmul %259, %260, %cst_124 {dimension_numbers = #tpu.dot_dimension_numbers<[2], [2], [1], [1], [0, 0, 0, 1, 1, 1], [0], [0]>} : vector<2x16x8xf32>, vector<2x16x8xf32>, vector<2x16x16xf32> -> vector<2x16x16xf32>
    "tpu.trace_stop"() : () -> ()
    %cst_125 = arith.constant dense<0xFF800000> : vector<2x16xf32>
    %262 = vector.multi_reduction <maximumf>, %261, %cst_125 [2] : vector<2x16x16xf32> to vector<2x16xf32>
    %263 = vector.shape_cast %262 : vector<2x16xf32> to vector<2x16x1xf32>
    %264 = vector.broadcast %263 : vector<2x16x1xf32> to vector<2x16x16xf32>
    %265 = arith.subf %261, %264 : vector<2x16x16xf32>
    %266 = math.exp %265 : vector<2x16x16xf32>
    %cst_126 = arith.constant dense<0.000000e+00> : vector<2x16xf32>
    %267 = vector.multi_reduction <add>, %266, %cst_126 [2] : vector<2x16x16xf32> to vector<2x16xf32>
    %268 = vector.shape_cast %267 : vector<2x16xf32> to vector<2x16x1xf32>
    %269 = tpu.reciprocal %268 {approx = true} : vector<2x16x1xf32> -> vector<2x16x1xf32>
    %270 = vector.broadcast %269 : vector<2x16x1xf32> to vector<2x16x16xf32>
    %271 = arith.mulf %266, %270 : vector<2x16x16xf32>
    %272 = vector.extract_strided_slice %210 {offsets = [0, 0, 24], sizes = [2, 16, 8], strides = [1, 1, 1]} : vector<2x16x32xf32> to vector<2x16x8xf32>
    "tpu.trace_start"() <{level = 10 : i32, message = "bqk,bkd->bqd"}> : () -> ()
    %cst_127 = arith.constant dense<0.000000e+00> : vector<2x16x8xf32>
    %273 = tpu.matmul %271, %272, %cst_127 {dimension_numbers = #tpu.dot_dimension_numbers<[2], [1], [1], [2], [0, 0, 0, 1, 1, 2], [0], [0]>} : vector<2x16x16xf32>, vector<2x16x8xf32>, vector<2x16x8xf32> -> vector<2x16x8xf32>
    "tpu.trace_stop"() : () -> ()
    %c0_128 = arith.constant 0 : index
    %c0_129 = arith.constant 0 : index
    %c24_130 = arith.constant 24 : index
    %274 = vector.load %arg20[%c0_128, %c0_129, %c24_130] : memref<2x16x32xf32, #tpu.memory_space<vmem>>, vector<2x16x8xf32>
    tpu.vector_store %arg20[%c0_128, %c0_129, %c24_130], %273 {strides = array<i32>} : memref<2x16x32xf32, #tpu.memory_space<vmem>>, vector<2x16x8xf32>,
    %c0_131 = arith.constant 0 : index
    %c0_132 = arith.constant 0 : index
    %c0_133 = arith.constant 0 : index
    %275 = vector.load %arg20[%c0_131, %c0_132, %c0_133] : memref<2x16x32xf32, #tpu.memory_space<vmem>>, vector<2x16x32xf32>
    %276 = vector.shape_cast %275 : vector<2x16x32xf32> to vector<32x32xf32>
    %c1_134 = arith.constant 1 : index
    %c0_135 = arith.constant 0 : index
    %c0_136 = arith.constant 0 : index
    %277 = vector.load %arg7[%c1_134, %c0_135, %c0_136] : memref<2x32x32xf32, #tpu.memory_space<vmem>>, vector<1x32x32xf32>
    %278 = vector.shape_cast %277 : vector<1x32x32xf32> to vector<32x32xf32>
    %cst_137 = arith.constant dense<0.000000e+00> : vector<32x32xf32>
    %279 = tpu.matmul %276, %278, %cst_137 {dimension_numbers = #tpu.dot_dimension_numbers<[1], [0], [0], [1], [0, 0, 1, 1], [], []>} : vector<32x32xf32>, vector<32x32xf32>, vector<32x32xf32> -> vector<32x32xf32>
    %c1_138 = arith.constant 1 : index
    %c0_139 = arith.constant 0 : index
    %c0_140 = arith.constant 0 : index
    %280 = vector.load %arg8[%c1_138, %c0_139, %c0_140] : memref<2x1x32xf32, #tpu.memory_space<vmem>>, vector<1x1x32xf32>
    %281 = vector.shape_cast %280 : vector<1x1x32xf32> to vector<1x32xf32>
    %282 = vector.broadcast %281 : vector<1x32xf32> to vector<32x32xf32>
    %283 = arith.addf %279, %282 : vector<32x32xf32>
    %284 = arith.addf %169, %283 : vector<32x32xf32>
    %c1_141 = arith.constant 1 : index
    %c0_142 = arith.constant 0 : index
    %c0_143 = arith.constant 0 : index
    %285 = vector.load %arg9[%c1_141, %c0_142, %c0_143] : memref<2x1x32xf32, #tpu.memory_space<vmem>>, vector<1x1x32xf32>
    %286 = vector.shape_cast %285 : vector<1x1x32xf32> to vector<1x32xf32>
    %c1_144 = arith.constant 1 : index
    %c0_145 = arith.constant 0 : index
    %c0_146 = arith.constant 0 : index
    %287 = vector.load %arg10[%c1_144, %c0_145, %c0_146] : memref<2x1x32xf32, #tpu.memory_space<vmem>>, vector<1x1x32xf32>
    %288 = vector.shape_cast %287 : vector<1x1x32xf32> to vector<1x32xf32>
    %cst_147 = arith.constant dense<0.000000e+00> : vector<32xf32>
    %289 = vector.multi_reduction <add>, %284, %cst_147 [1] : vector<32x32xf32> to vector<32xf32>
    %290 = vector.shape_cast %289 : vector<32xf32> to vector<32x1xf32>
    %cst_148 = arith.constant 3.200000e+01 : f32
    %291 = vector.broadcast %cst_148 : f32 to vector<32x1xf32>
    %292 = arith.divf %290, %291 : vector<32x1xf32>
    %293 = vector.broadcast %292 : vector<32x1xf32> to vector<32x32xf32>
    %294 = arith.subf %284, %293 : vector<32x32xf32>
    %295 = arith.mulf %294, %294 : vector<32x32xf32>
    %cst_149 = arith.constant dense<0.000000e+00> : vector<32xf32>
    %296 = vector.multi_reduction <add>, %295, %cst_149 [1] : vector<32x32xf32> to vector<32xf32>
    %297 = vector.shape_cast %296 : vector<32xf32> to vector<32x1xf32>
    %cst_150 = arith.constant 3.200000e+01 : f32
    %298 = vector.broadcast %cst_150 : f32 to vector<32x1xf32>
    %299 = arith.divf %297, %298 : vector<32x1xf32>
    %300 = vector.broadcast %292 : vector<32x1xf32> to vector<32x32xf32>
    %301 = arith.subf %284, %300 : vector<32x32xf32>
    %cst_151 = arith.constant 9.99999974E-6 : f32
    %302 = vector.broadcast %cst_151 : f32 to vector<32x1xf32>
    %303 = arith.addf %299, %302 : vector<32x1xf32>
    %304 = math.rsqrt %303 : vector<32x1xf32>
    %305 = vector.broadcast %304 : vector<32x1xf32> to vector<32x32xf32>
    %306 = arith.mulf %301, %305 : vector<32x32xf32>
    %307 = vector.broadcast %286 : vector<1x32xf32> to vector<32x32xf32>
    %308 = arith.mulf %306, %307 : vector<32x32xf32>
    %309 = vector.broadcast %288 : vector<1x32xf32> to vector<32x32xf32>
    %310 = arith.addf %308, %309 : vector<32x32xf32>
    %c1_152 = arith.constant 1 : index
    %c0_153 = arith.constant 0 : index
    %c0_154 = arith.constant 0 : index
    %311 = vector.load %arg11[%c1_152, %c0_153, %c0_154] : memref<2x32x128xf32, #tpu.memory_space<vmem>>, vector<1x32x128xf32>
    %312 = vector.shape_cast %311 : vector<1x32x128xf32> to vector<32x128xf32>
    %cst_155 = arith.constant dense<0.000000e+00> : vector<32x128xf32>
    %313 = tpu.matmul %310, %312, %cst_155 {dimension_numbers = #tpu.dot_dimension_numbers<[1], [0], [0], [1], [0, 0, 1, 1], [], []>} : vector<32x32xf32>, vector<32x128xf32>, vector<32x128xf32> -> vector<32x128xf32>
    %c1_156 = arith.constant 1 : index
    %c0_157 = arith.constant 0 : index
    %c0_158 = arith.constant 0 : index
    %314 = vector.load %arg12[%c1_156, %c0_157, %c0_158] : memref<2x1x128xf32, #tpu.memory_space<vmem>>, vector<1x1x128xf32>
    %315 = vector.shape_cast %314 : vector<1x1x128xf32> to vector<1x128xf32>
    %316 = vector.broadcast %315 : vector<1x128xf32> to vector<32x128xf32>
    %317 = arith.addf %313, %316 : vector<32x128xf32>
    %cst_159 = arith.constant 5.000000e-01 : f32
    %318 = vector.broadcast %cst_159 : f32 to vector<32x128xf32>
    %319 = arith.mulf %318, %317 : vector<32x128xf32>
    %cst_160 = arith.constant 0.707106769 : f32
    %320 = vector.broadcast %cst_160 : f32 to vector<32x128xf32>
    %321 = arith.mulf %317, %320 : vector<32x128xf32>
    %322 = math.erf %321 : vector<32x128xf32>
    %cst_161 = arith.constant 1.000000e+00 : f32
    %323 = vector.broadcast %cst_161 : f32 to vector<32x128xf32>
    %324 = arith.addf %323, %322 : vector<32x128xf32>
    %325 = arith.mulf %319, %324 : vector<32x128xf32>
    %c1_162 = arith.constant 1 : index
    %c0_163 = arith.constant 0 : index
    %c0_164 = arith.constant 0 : index
    %326 = vector.load %arg13[%c1_162, %c0_163, %c0_164] : memref<2x128x32xf32, #tpu.memory_space<vmem>>, vector<1x128x32xf32>
    %327 = vector.shape_cast %326 : vector<1x128x32xf32> to vector<128x32xf32>
    %cst_165 = arith.constant dense<0.000000e+00> : vector<32x32xf32>
    %328 = tpu.matmul %325, %327, %cst_165 {dimension_numbers = #tpu.dot_dimension_numbers<[1], [0], [0], [1], [0, 0, 1, 1], [], []>} : vector<32x128xf32>, vector<128x32xf32>, vector<32x32xf32> -> vector<32x32xf32>
    %c1_166 = arith.constant 1 : index
    %c0_167 = arith.constant 0 : index
    %c0_168 = arith.constant 0 : index
    %329 = vector.load %arg14[%c1_166, %c0_167, %c0_168] : memref<2x1x32xf32, #tpu.memory_space<vmem>>, vector<1x1x32xf32>
    %330 = vector.shape_cast %329 : vector<1x1x32xf32> to vector<1x32xf32>
    %331 = vector.broadcast %330 : vector<1x32xf32> to vector<32x32xf32>
    %332 = arith.addf %328, %331 : vector<32x32xf32>
    %333 = arith.addf %284, %332 : vector<32x32xf32>
    %c0_169 = arith.constant 0 : index
    %c0_170 = arith.constant 0 : index
    %334 = vector.load %arg15[%c0_169, %c0_170] : memref<32x64xf32, #tpu.memory_space<vmem>>, vector<32x64xf32>
    %cst_171 = arith.constant dense<0.000000e+00> : vector<32x64xf32>
    %335 = tpu.matmul %333, %334, %cst_171 {dimension_numbers = #tpu.dot_dimension_numbers<[1], [0], [0], [1], [0, 0, 1, 1], [], []>} : vector<32x32xf32>, vector<32x64xf32>, vector<32x64xf32> -> vector<32x64xf32>
    %c0_172 = arith.constant 0 : index
    %c0_173 = arith.constant 0 : index
    %336 = vector.load %arg16[%c0_172, %c0_173] : memref<1x64xf32, #tpu.memory_space<vmem>>, vector<1x64xf32>
    %337 = vector.broadcast %336 : vector<1x64xf32> to vector<32x64xf32>
    %338 = arith.addf %335, %337 : vector<32x64xf32>
    %339 = math.tanh %338 : vector<32x64xf32>
    %c0_174 = arith.constant 0 : index
    %c0_175 = arith.constant 0 : index
    %340 = vector.load %arg17[%c0_174, %c0_175] : memref<64x64xf32, #tpu.memory_space<vmem>>, vector<64x64xf32>
    %cst_176 = arith.constant dense<0.000000e+00> : vector<32x64xf32>
    %341 = tpu.matmul %339, %340, %cst_176 {dimension_numbers = #tpu.dot_dimension_numbers<[1], [0], [0], [1], [0, 0, 1, 1], [], []>} : vector<32x64xf32>, vector<64x64xf32>, vector<32x64xf32> -> vector<32x64xf32>
    %c0_177 = arith.constant 0 : index
    %c0_178 = arith.constant 0 : index
    %342 = vector.load %arg18[%c0_177, %c0_178] : memref<1x64xf32, #tpu.memory_space<vmem>>, vector<1x64xf32>
    %343 = vector.broadcast %342 : vector<1x64xf32> to vector<32x64xf32>
    %344 = arith.addf %341, %343 : vector<32x64xf32>
    %c0_179 = arith.constant 0 : index
    %c0_180 = arith.constant 0 : index
    %345 = vector.load %arg19[%c0_179, %c0_180] : memref<32x64xf32, #tpu.memory_space<vmem>>, vector<32x64xf32>
    tpu.vector_store %arg19[%c0_179, %c0_180], %344 {strides = array<i32>} : memref<32x64xf32, #tpu.memory_space<vmem>>, vector<32x64xf32>,
    return
  }
  func.func @transform_0(%arg0: i32) -> (i32, i32, i32) {
    %c0_i32 = arith.constant 0 : i32
    %c0_i32_0 = arith.constant 0 : i32
    %c0_i32_1 = arith.constant 0 : i32
    %c0_i32_2 = arith.constant 0 : i32
    return %c0_i32, %c0_i32_0, %c0_i32_1 : i32, i32, i32
  }
  func.func @transform_1(%arg0: i32) -> (i32, i32) {
    %c0_i32 = arith.constant 0 : i32
    %c0_i32_0 = arith.constant 0 : i32
    %c0_i32_1 = arith.constant 0 : i32
    return %c0_i32, %c0_i32_0 : i32, i32
  }
  func.func @transform_2(%arg0: i32) -> (i32, i32, i32) {
    %c0_i32 = arith.constant 0 : i32
    %c0_i32_0 = arith.constant 0 : i32
    %c0_i32_1 = arith.constant 0 : i32
    %c0_i32_2 = arith.constant 0 : i32
    return %c0_i32, %c0_i32_0, %c0_i32_1 : i32, i32, i32
  }
  func.func @transform_3(%arg0: i32) -> (i32, i32, i32) {
    %c0_i32 = arith.constant 0 : i32
    %c0_i32_0 = arith.constant 0 : i32
    %c0_i32_1 = arith.constant 0 : i32
    %c0_i32_2 = arith.constant 0 : i32
    return %c0_i32, %c0_i32_0, %c0_i32_1 : i32, i32, i32
  }
  func.func @transform_4(%arg0: i32) -> (i32, i32, i32) {
    %c0_i32 = arith.constant 0 : i32
    %c0_i32_0 = arith.constant 0 : i32
    %c0_i32_1 = arith.constant 0 : i32
    %c0_i32_2 = arith.constant 0 : i32
    return %c0_i32, %c0_i32_0, %c0_i32_1 : i32, i32, i32
  }
  func.func @transform_5(%arg0: i32) -> (i32, i32, i32) {
    %c0_i32 = arith.constant 0 : i32
    %c0_i32_0 = arith.constant 0 : i32
    %c0_i32_1 = arith.constant 0 : i32
    %c0_i32_2 = arith.constant 0 : i32
    return %c0_i32, %c0_i32_0, %c0_i32_1 : i32, i32, i32
  }
  func.func @transform_6(%arg0: i32) -> (i32, i32, i32) {
    %c0_i32 = arith.constant 0 : i32
    %c0_i32_0 = arith.constant 0 : i32
    %c0_i32_1 = arith.constant 0 : i32
    %c0_i32_2 = arith.constant 0 : i32
    return %c0_i32, %c0_i32_0, %c0_i32_1 : i32, i32, i32
  }
  func.func @transform_7(%arg0: i32) -> (i32, i32, i32) {
    %c0_i32 = arith.constant 0 : i32
    %c0_i32_0 = arith.constant 0 : i32
    %c0_i32_1 = arith.constant 0 : i32
    %c0_i32_2 = arith.constant 0 : i32
    return %c0_i32, %c0_i32_0, %c0_i32_1 : i32, i32, i32
  }
  func.func @transform_8(%arg0: i32) -> (i32, i32, i32) {
    %c0_i32 = arith.constant 0 : i32
    %c0_i32_0 = arith.constant 0 : i32
    %c0_i32_1 = arith.constant 0 : i32
    %c0_i32_2 = arith.constant 0 : i32
    return %c0_i32, %c0_i32_0, %c0_i32_1 : i32, i32, i32
  }
  func.func @transform_9(%arg0: i32) -> (i32, i32, i32) {
    %c0_i32 = arith.constant 0 : i32
    %c0_i32_0 = arith.constant 0 : i32
    %c0_i32_1 = arith.constant 0 : i32
    %c0_i32_2 = arith.constant 0 : i32
    return %c0_i32, %c0_i32_0, %c0_i32_1 : i32, i32, i32
  }
  func.func @transform_10(%arg0: i32) -> (i32, i32, i32) {
    %c0_i32 = arith.constant 0 : i32
    %c0_i32_0 = arith.constant 0 : i32
    %c0_i32_1 = arith.constant 0 : i32
    %c0_i32_2 = arith.constant 0 : i32
    return %c0_i32, %c0_i32_0, %c0_i32_1 : i32, i32, i32
  }
  func.func @transform_11(%arg0: i32) -> (i32, i32, i32) {
    %c0_i32 = arith.constant 0 : i32
    %c0_i32_0 = arith.constant 0 : i32
    %c0_i32_1 = arith.constant 0 : i32
    %c0_i32_2 = arith.constant 0 : i32
    return %c0_i32, %c0_i32_0, %c0_i32_1 : i32, i32, i32
  }
  func.func @transform_12(%arg0: i32) -> (i32, i32, i32) {
    %c0_i32 = arith.constant 0 : i32
    %c0_i32_0 = arith.constant 0 : i32
    %c0_i32_1 = arith.constant 0 : i32
    %c0_i32_2 = arith.constant 0 : i32
    return %c0_i32, %c0_i32_0, %c0_i32_1 : i32, i32, i32
  }
  func.func @transform_13(%arg0: i32) -> (i32, i32, i32) {
    %c0_i32 = arith.constant 0 : i32
    %c0_i32_0 = arith.constant 0 : i32
    %c0_i32_1 = arith.constant 0 : i32
    %c0_i32_2 = arith.constant 0 : i32
    return %c0_i32, %c0_i32_0, %c0_i32_1 : i32, i32, i32
  }
  func.func @transform_14(%arg0: i32) -> (i32, i32) {
    %c0_i32 = arith.constant 0 : i32
    %c0_i32_0 = arith.constant 0 : i32
    %c0_i32_1 = arith.constant 0 : i32
    return %c0_i32, %c0_i32_0 : i32, i32
  }
  func.func @transform_15(%arg0: i32) -> (i32, i32) {
    %c0_i32 = arith.constant 0 : i32
    %c0_i32_0 = arith.constant 0 : i32
    %c0_i32_1 = arith.constant 0 : i32
    return %c0_i32, %c0_i32_0 : i32, i32
  }
  func.func @transform_16(%arg0: i32) -> (i32, i32) {
    %c0_i32 = arith.constant 0 : i32
    %c0_i32_0 = arith.constant 0 : i32
    %c0_i32_1 = arith.constant 0 : i32
    return %c0_i32, %c0_i32_0 : i32, i32
  }
  func.func @transform_17(%arg0: i32) -> (i32, i32) {
    %c0_i32 = arith.constant 0 : i32
    %c0_i32_0 = arith.constant 0 : i32
    %c0_i32_1 = arith.constant 0 : i32
    return %c0_i32, %c0_i32_0 : i32, i32
  }
  func.func @transform_18(%arg0: i32) -> (i32, i32) {
    %c0_i32 = arith.constant 0 : i32
    %c0_i32_0 = arith.constant 0 : i32
    %c0_i32_1 = arith.constant 0 : i32
    return %c0_i32, %c0_i32_0 : i32, i32
  }
}

</mosaic_0001>

<bundles_post_ra>
// kernel: vit_decoder_forward.1
= control target key start
LH: loop header
LB: loop body
LE: loop exit
PB: predicated region body
PF: predicated region fallthrough
CT: control target
= control target key end

     0   :  { %s7624_s0 = inlined_call_operand.vmem [shape: f32[2,16,32], index: 0, kind: input, shape index: {}]   ;;  %s7625_s1 = inlined_call_operand.vmem [shape: f32[16,32], index: 1, kind: input, shape index: {}]   ;;  %s7626_s2 = inlined_call_operand.vmem [shape: f32[2,1,32], index: 2, kind: input, shape index: {}]   ;;  %s7627_s3 = inlined_call_operand.vmem [shape: f32[2,1,32], index: 3, kind: input, shape index: {}]   ;;  %s7628_s4 = inlined_call_operand.vmem [shape: f32[2,32,96], index: 4, kind: input, shape index: {}]   ;;  %s7629_s5 = inlined_call_operand.vmem [shape: f32[2,1,96], index: 5, kind: input, shape index: {}]   ;;  %s7630_s6 = inlined_call_operand.vmem [shape: f32[2,32,32], index: 6, kind: input, shape index: {}]   ;;  %s7631_s7 = inlined_call_operand.hbm [shape: f32[2,1,32], index: 7, kind: input, shape index: {}]   ;;  %s7632_s8 = inlined_call_operand.vmem [shape: f32[2,1,32], index: 8, kind: input, shape index: {}]   ;;  %s7633_s9 = inlined_call_operand.vmem [shape: f32[2,1,32], index: 9, kind: input, shape index: {}]   ;;  %s7634_s10 = inlined_call_operand.vmem [shape: f32[2,32,128], index: 10, kind: input, shape index: {}]   ;;  %s7635_s11 = inlined_call_operand.hbm [shape: f32[2,1,128], index: 11, kind: input, shape index: {}]   ;;  %s7636_s12 = inlined_call_operand.vmem [shape: f32[2,128,32], index: 12, kind: input, shape index: {}]   ;;  %s7637_s13 = inlined_call_operand.hbm [shape: f32[2,1,32], index: 13, kind: input, shape index: {}]   ;;  %s7638_s14 = inlined_call_operand.vmem [shape: f32[32,64], index: 14, kind: input, shape index: {}]   ;;  %s7639_s15 = inlined_call_operand.hbm [shape: f32[1,64], index: 15, kind: input, shape index: {}]   ;;  %s7640_s16 = inlined_call_operand.vmem [shape: f32[64,64], index: 16, kind: input, shape index: {}]   ;;  %s7641_s17 = inlined_call_operand.hbm [shape: f32[1,64], index: 17, kind: input, shape index: {}]   ;;  %s7642_s18 = inlined_call_operand.vmem [shape: f32[32,64], index: 18, kind: output, shape index: {}]  }
   0x1   :  { %7656 = sst [smem:[#allocation14_spill]] %s7624_s0 }
   0x2   :  { %7657 = sst [smem:[#allocation15_spill]] %s7625_s1 }
   0x3   :  { %7658 = sst [smem:[#allocation16_spill]] %s7626_s2 }
   0x4   :  { %23 = vsyncpa [#allocation4], 0 }
   0x5   :  { %24 = vsyncpa [#allocation6], 0 }
   0x6   :  { %25 = vsyncpa [#allocation9], 0  ;;  %s6559_s27 = smov [#allocation5]   ;;  %s6560_s29 = smov [#allocation8]  }
   0x7   :  { %s63_s28 = sshll.u32 %s6559_s27, 4  ;;  %s92_s30 = sshll.u32 %s6560_s29, 4  ;;  %s64_s28 = int_to_ptr.vmem [resolvable:$true] %s63_s28  ;;  %s6674_s30 = int_to_ptr.vmem [resolvable:$true] %s92_s30 }
   0x8   :  { %s6443_s1 = scalar_lea.hbm %s7635_s11, 32 }
   0x9   :  { %p6444_p0 = scmp.ne.s32.totalorder %s7635_s11, %s6443_s1  ;;  %p6447_p1 = scmp.lt.u32.totalorder %s6443_s1, %s7635_s11 }
   0xb   :  { %p6449_p2 = pnand %p6447_p1, %p6444_p0 }
   0xd   :  { %6452 = shalt.err (!%p6449_p2)
}
   0xe   :  { %s6453_s23 = scalar_lea.vmem %s64_s28, 32  ;;  %p6458_p4 = scmp.lt.s32.totalorder %s64_s28, %s64_s28 }
   0xf   :  { %p6454_p3 = scmp.ne.s32.totalorder %s64_s28, %s6453_s23  ;;  %p6459_p5 = scmp.lt.s32.totalorder %s6453_s23, %s6453_s23 }
  0x11   :  { %p6460_p6 = por %p6459_p5, %p6458_p4 }
  0x13   :  { %p6461_p7 = pnand %p6460_p6, %p6454_p3 }
  0x15   :  { %6464 = shalt.err (!%p6461_p7)
}
  0x16   :  { %s7652_s24 = smov 16   ;;  %s6562_s25 = smov 1  }
  0x17   :  { %69 = dma.hbm_to_vmem [thread:$0]  %s7635_s11, 32, %s64_s28, [#allocation6], %s7652_s24, %s7652_s24, %s6562_s25  }
  0x18   :  { %s6465_s19 = scalar_lea.hbm %s7639_s15, 16 }
  0x19   :  { %p6466_p8 = scmp.ne.s32.totalorder %s7639_s15, %s6465_s19  ;;  %p6469_p9 = scmp.lt.u32.totalorder %s6465_s19, %s7639_s15 }
  0x1b   :  { %p6471_p10 = pnand %p6469_p9, %p6466_p8 }
  0x1d   :  { %6474 = shalt.err (!%p6471_p10)
}
  0x1e   :  { %s6475_s2 = scalar_lea.vmem %s6674_s30, 16  ;;  %s6479_s11 = scalar_lea.vmem %s6674_s30, 32 }
  0x1f   :  { %p6476_p11 = scmp.ne.s32.totalorder %s6674_s30, %s6475_s2  ;;  %p6480_p12 = scmp.lt.s32.totalorder %s6674_s30, %s6674_s30 }
  0x20   :  { %p6481_p13 = scmp.lt.s32.totalorder %s6479_s11, %s6475_s2 }
  0x22   :  { %p6482_p0 = por %p6481_p13, %p6480_p12 }
  0x24   :  { %p6483_p1 = pnand %p6482_p0, %p6476_p11 }
  0x26   :  { %6486 = shalt.err (!%p6483_p1)
}
  0x27   :  { %95 = dma.hbm_to_vmem [thread:$0]  %s7639_s15, 16, %s6674_s30, [#allocation9]  }
  0x28   :  { %s6563_s26 = smov [#allocation3]   ;;  %s6564_s29 = smov [#allocation7]  }
  0x29   :  { %s45_s27 = sshll.u32 %s6563_s26, 4  ;;  %s77_s0 = sshll.u32 %s6564_s29, 4  ;;  %s46_s27 = int_to_ptr.vmem [resolvable:$true] %s45_s27  ;;  %s6709_s0 = int_to_ptr.vmem [resolvable:$true] %s77_s0 }
  0x2a   :  { %s6487_s20 = scalar_lea.hbm %s7631_s7, 32 }
  0x2b   :  { %p6488_p2 = scmp.ne.s32.totalorder %s7631_s7, %s6487_s20  ;;  %p6491_p3 = scmp.lt.u32.totalorder %s6487_s20, %s7631_s7 }
  0x2d   :  { %p6493_p4 = pnand %p6491_p3, %p6488_p2 }
  0x2f   :  { %6496 = shalt.err (!%p6493_p4)
}
  0x30   :  { %s6497_s15 = scalar_lea.vmem %s46_s27, 32  ;;  %p6502_p6 = scmp.lt.s32.totalorder %s46_s27, %s46_s27 }
  0x31   :  { %p6498_p5 = scmp.ne.s32.totalorder %s46_s27, %s6497_s15  ;;  %p6503_p7 = scmp.lt.s32.totalorder %s6497_s15, %s6497_s15 }
  0x33   :  { %p6504_p8 = por %p6503_p7, %p6502_p6 }
  0x35   :  { %p6505_p9 = pnand %p6504_p8, %p6498_p5 }
  0x37   :  { %6508 = shalt.err (!%p6505_p9)
}
  0x38   :  { %51 = dma.hbm_to_vmem [thread:$0]  %s7631_s7, 32, %s46_s27, [#allocation4], %s7652_s24, %s7652_s24, %s6562_s25  }
  0x39   :  { %s6509_s29 = scalar_lea.hbm %s7637_s13, 32 }
  0x3a   :  { %p6510_p10 = scmp.ne.s32.totalorder %s7637_s13, %s6509_s29  ;;  %p6513_p11 = scmp.lt.u32.totalorder %s6509_s29, %s7637_s13 }
  0x3c   :  { %p6515_p12 = pnand %p6513_p11, %p6510_p10 }
  0x3e   :  { %6518 = shalt.err (!%p6515_p12)
}
  0x3f   :  { %s6519_s22 = scalar_lea.vmem %s6709_s0, 32  ;;  %p6524_p0 = scmp.lt.s32.totalorder %s6709_s0, %s6709_s0 }
  0x40   :  { %p6520_p13 = scmp.ne.s32.totalorder %s6709_s0, %s6519_s22  ;;  %p6525_p1 = scmp.lt.s32.totalorder %s6519_s22, %s6519_s22 }
  0x42   :  { %p6526_p2 = por %p6525_p1, %p6524_p0 }
  0x44   :  { %p6527_p3 = pnand %p6526_p2, %p6520_p13 }
  0x46   :  { %6530 = shalt.err (!%p6527_p3)
}
  0x47   :  { %83 = dma.hbm_to_vmem [thread:$0]  %s7637_s13, 32, %s6709_s0, [#allocation6], %s7652_s24, %s7652_s24, %s6562_s25  }
  0x48   :  { %s6565_s2 = smov [#allocation10]   ;;  %s6531_s28 = scalar_lea.hbm %s7641_s17, 16 }
  0x49   :  { %s104_s11 = sshll.u32 %s6565_s2, 4  ;;  %p6532_p4 = scmp.ne.s32.totalorder %s7641_s17, %s6531_s28  ;;  %s105_s11 = int_to_ptr.vmem [resolvable:$true] %s104_s11 }
  0x4a   :  { %p6535_p5 = scmp.lt.u32.totalorder %s6531_s28, %s7641_s17 }
  0x4c   :  { %p6537_p6 = pnand %p6535_p5, %p6532_p4 }
  0x4e   :  { %6540 = shalt.err (!%p6537_p6)
}
  0x4f   :  { %s6541_s1 = scalar_lea.vmem %s105_s11, 16  ;;  %s6545_s13 = scalar_lea.vmem %s105_s11, 32 }
  0x50   :  { %p6542_p7 = scmp.ne.s32.totalorder %s105_s11, %s6541_s1  ;;  %p6546_p8 = scmp.lt.s32.totalorder %s105_s11, %s105_s11 }
  0x51   :  { %p6547_p9 = scmp.lt.s32.totalorder %s6545_s13, %s6541_s1 }
  0x53   :  { %p6548_p10 = por %p6547_p9, %p6546_p8 }
  0x55   :  { %p6549_p11 = pnand %p6548_p10, %p6542_p7 }
  0x57   :  { %6552 = shalt.err (!%p6549_p11)
}
  0x58   :  { %107 = dma.hbm_to_vmem [thread:$0]  %s7641_s17, 16, %s105_s11, [#allocation9]  }
  0x59   :  { %6553 = dma.done.wait [#allocation4], 32  }
  0x5a   :  { %6554 = vsyncadd [#allocation4], 4294967264 }
  0x5b   :  { %6555 = dma.done.wait [#allocation6], 64  }
  0x5c   :  { %6556 = vsyncadd [#allocation6], 4294967232 }
  0x5d   :  { %6557 = dma.done.wait [#allocation9], 32  }
  0x5e   :  { %6558 = vsyncadd [#allocation9], 4294967264  ;;  %s7659_s22 = sld [smem:[#allocation14_spill]]  ;;  %s7660_s2 = sld [smem:[#allocation15_spill]]  ;;  %vm135_vm0 = vcmask 261120   ;;  %v209_v34 = vld [vmem:[%s7628_s4] sm:$0xff] }
  0x5f   :  { %v210_v35 = vld [vmem:[%s7628_s4 + $0x8] sm:$0xff]  ;;  %v211_v36 = vld [vmem:[%s7628_s4 + $0x10] sm:$0xff]  ;;  %v212_v38 = vld [vmem:[%s7628_s4 + $0x18] sm:$0xff]  ;;  %vm327_vm1 = vcmask 64512   ;;  %s6566_s28 = smov 96   ;;  %vm504_vm3 = vcmask 130048  }
  0x60   :  { %v5783_v37 = vpack.c.bf16 %v210_v35, %v209_v34  ;;  %v5787_v39 = vpack.c.bf16 %v212_v38, %v211_v36  ;;  %v4949_v55 = vld [vmem:[%s7627_s3] ss:$0 sm:$0xff]  ;;  %vm6843_vm2 = vmpackc.low %vm327_vm1, %vm327_vm1  ;;  %s6567_s23 = smov 64   ;;  %s6568_s26 = smov 88   ;;  %vm1143_vm4 = vcmask 130112   ;;  %vm1564_vm5 = vcmask 195712  }
  0x61   :  { %s6569_s29 = smov 120   ;;  %s6570_s19 = smov 56   ;;  %vm1985_vm6 = vcmask 261312   ;;  %vm4839_vm7 = vcmask 523264  }
  0x62   :  { %5784 = vmatprep.subr.bf16.mxu0 %v5783_v37  ;;  %s6571_s1 = smov 80   ;;  %s6572_s13 = smov 112  }
  0x63   :  { %5786 = vmatpush3.bf16.msra.mxu0 %v5783_v37  ;;  %s6573_s25 = smov 48   ;;  %s6574_s0 = smov 72  }
  0x64   :  { %v123_v0 = vld [vmem:[%s7659_s22] sm:$0xff]  ;;  %v125_v2 = vld [vmem:[%s7659_s22 + $0x10] sm:$0xff]  ;;  %v124_v5 = vld [vmem:[%s7659_s22 + $0x8] sm:$0xff]  ;;  %5788 = vmatprep.subr.bf16.mxu0 %v5787_v39  ;;  %s7648_s20 = smov 104   ;;  %s7646_s21 = smov 40  }
  0x65   :  { %v127_v1 = vld [vmem:[%s7660_s2] sm:$0xff]  ;;  %v128_v6 = vld [vmem:[%s7660_s2 + $0x8] sm:$0xff]  ;;  %v126_v7 = vld [vmem:[%s7659_s22 + $0x18] sm:$0xff]  ;;  %s7661_s2 = sld [smem:[#allocation16_spill]]  ;;  %s7654_s22 = smov 8  }
  0x66   :  { %v6767_v3 = vadd.f32 %v127_v1, %v123_v0  ;;  %v6769_v4 = vadd.f32 %v127_v1, %v125_v2  ;;  %v6780_v8 = vadd.f32 %v128_v6, %v124_v5  ;;  %v6782_v9 = vadd.f32 %v128_v6, %v126_v7  ;;  %s7650_s7 = smov 24   ;;  %s7668_s11 = smov 24  }
  0x67   :  { %5790 = vmatpush3.bf16.msra.mxu0 %v5787_v39 }
  0x68   :  { %v136_v10 = vsel %vm135_vm0, %v6767_v3, 0.0  ;;  %v142_v11 = vsel %vm135_vm0, %v6769_v4, 0.0  ;;  %v139_v12 = vsel %vm135_vm0, %v6780_v8, 0.0  ;;  %v145_v13 = vsel %vm135_vm0, %v6782_v9, 0.0 }
  0x69   :  { %137 = vadd.xlane.f32.xlu0 %v136_v10  ;;  %143 = vadd.xlane.f32.xlu1 %v142_v11  ;;  %v4950_v10 = vld [vmem:[%s7629_s5] ss:$0 sm:$0xff] }
  0x6b   :  { %v4948_v53 = vld [vmem:[%s7661_s2] ss:$0 sm:$0xff] }
  0x6d   :  { %140 = vadd.xlane.f32.xlu0 %v139_v12  ;;  %146 = vadd.xlane.f32.xlu1 %v145_v13 }
  0xf6   :  { %v138_v14 = vpop.xlane.xlu0 %137  ;;  %v144_v15 = vpop.xlane.xlu1 %143 }
  0xf7   :  { %v149_v16 = vmul.f32 0.03125, %v138_v14  ;;  %v151_v17 = vmul.f32 0.03125, %v144_v15 }
  0xf9   :  { %v153_v18 = vsub.f32 %v6767_v3, %v149_v16  ;;  %v155_v19 = vsub.f32 %v6769_v4, %v151_v17 }
  0xfa   :  { %v141_v20 = vpop.xlane.xlu0 %140  ;;  %v147_v21 = vpop.xlane.xlu1 %146 }
  0xfb   :  { %v150_v22 = vmul.f32 0.03125, %v141_v20  ;;  %v152_v23 = vmul.f32 0.03125, %v147_v21  ;;  %v157_v24 = vmul.f32 %v153_v18, %v153_v18  ;;  %v159_v25 = vmul.f32 %v155_v19, %v155_v19 }
  0xfd   :  { %v154_v26 = vsub.f32 %v6780_v8, %v150_v22  ;;  %v156_v27 = vsub.f32 %v6782_v9, %v152_v23  ;;  %v161_v28 = vsel %vm135_vm0, %v157_v24, 0.0  ;;  %v167_v29 = vsel %vm135_vm0, %v159_v25, 0.0 }
  0xfe   :  { %162 = vadd.xlane.f32.xlu0 %v161_v28 }
  0xff   :  { %v158_v30 = vmul.f32 %v154_v26, %v154_v26  ;;  %v160_v31 = vmul.f32 %v156_v27, %v156_v27 }
 0x101   :  { %v164_v32 = vsel %vm135_vm0, %v158_v30, 0.0  ;;  %v170_v33 = vsel %vm135_vm0, %v160_v31, 0.0 }
 0x102   :  { %168 = vadd.xlane.f32.xlu0 %v167_v29  ;;  %165 = vadd.xlane.f32.xlu1 %v164_v32 }
 0x106   :  { %171 = vadd.xlane.f32.xlu1 %v170_v33 }
 0x18b   :  { %v163_v40 = vpop.xlane.xlu0 %162 }
 0x18c   :  { %v173_v41 = vmul.f32 0.03125, %v163_v40 }
 0x18e   :  { %v177_v42 = vadd.f32 1e-05, %v173_v41 }
 0x18f   :  { %v166_v43 = vpop.xlane.xlu1 %165  ;;  %v169_v44 = vpop.xlane.xlu0 %168 }
 0x190   :  { %6259 = vrsqrt.f32 %v177_v42  ;;  %v174_v45 = vmul.f32 0.03125, %v166_v43  ;;  %v175_v46 = vmul.f32 0.03125, %v169_v44 }
 0x192   :  { %v178_v47 = vadd.f32 1e-05, %v174_v45  ;;  %v179_v48 = vadd.f32 1e-05, %v175_v46 }
 0x193   :  { %v172_v49 = vpop.xlane.xlu1 %171 }
 0x194   :  { %6261 = vrsqrt.f32 %v178_v47  ;;  %v176_v50 = vmul.f32 0.03125, %v172_v49 }
 0x195   :  { %6263 = vrsqrt.f32 %v179_v48 }
 0x196   :  { %v180_v51 = vadd.f32 1e-05, %v176_v50 }
 0x198   :  { %6265 = vrsqrt.f32 %v180_v51 }
 0x19a   :  { %v6260_v52 = vpop.eup %6259 }
 0x19b   :  { %v185_v54 = vmul.f32 %v6260_v52, %v153_v18 }
 0x19d   :  { %v195_v56 = vmul.f32 %v4948_v53, %v185_v54 }
 0x19e   :  { %v6262_v57 = vpop.eup %6261 }
 0x19f   :  { %v6264_v58 = vpop.eup %6263  ;;  %v205_v59 = vadd.f32 %v4949_v55, %v195_v56  ;;  %v186_v60 = vmul.f32 %v6262_v57, %v154_v26 }
 0x1a0   :  { %v187_v61 = vmul.f32 %v6264_v58, %v155_v19 }
 0x1a1   :  { %5371 = vmatprep.mubr.msk.f32.mxu0 %vm135_vm0, %v205_v59  ;;  %v196_v62 = vmul.f32 %v4948_v53, %v186_v60 }
 0x1a2   :  { %v6266_v63 = vpop.eup %6265  ;;  %v197_v0 = vmul.f32 %v4948_v53, %v187_v61 }
 0x1a3   :  { %v206_v1 = vadd.f32 %v4949_v55, %v196_v62  ;;  %v188_v2 = vmul.f32 %v6266_v63, %v156_v27 }
 0x1a4   :  { %v207_v5 = vadd.f32 %v4949_v55, %v197_v0 }
 0x1a5   :  { %5372 = vmatmul.mubr.msk.f32.vlgmr.msra.gmra.mrb[0].mxu0 %vm135_vm0, %v206_v1  ;;  %v198_v6 = vmul.f32 %v4948_v53, %v188_v2 }
 0x1a6   :  { %5374 = vmatprep.mubr.msk.f32.mxu0 %vm135_vm0, %v207_v5 }
 0x1a7   :  { %v208_v7 = vadd.f32 %v4949_v55, %v198_v6 }
 0x1a9   :  { %5375 = vmatmul.mubr.msk.f32.gmra.mrb[2].mxu0 %vm135_vm0, %v208_v7 }
 0x278   :  { %v5373_v11 = vpop.f32.mrb[0].mxu0 }
 0x279   :  { %v304_v12 = vadd.f32 %v5373_v11, %v4950_v10  ;;  %v298_v13 = vpop.f32.mrb[1].mxu0 }
 0x27a   :  { %v299_v14 = vadd.f32 %v4950_v10, %v298_v13 }
 0x27b   :  { %v6855_v32 = vmul.f32 0.35355338, %v304_v12 }
 0x27c   :  { %v5376_v15 = vpop.f32.mrb[2].mxu0  ;;  %v6825_v16 = vpack.i.bf16 %v304_v12, %v299_v14  ;;  %v6827_v17 = vmul.f32 0.35355338, %v299_v14 }
 0x27d   :  { %v314_v18 = vadd.f32 %v5376_v15, %v4950_v10  ;;  %v308_v19 = vpop.f32.mrb[3].mxu0 }
 0x27e   :  { %v309_v20 = vadd.f32 %v4950_v10, %v308_v19  ;;  %6100 = vrot.lane.b32.xlu0 %v6825_v16, %s6566_s28  ;;  %5381 = vmatprep.mubr.msk.f32.mxu1 %vm327_vm1, %v6827_v17 }
 0x27f   :  { %v6859_v33 = vmul.f32 0.35355338, %v314_v18 }
 0x280   :  { %v6833_v21 = vpack.i.bf16 %v314_v18, %v309_v20  ;;  %v6835_v22 = vmul.f32 0.35355338, %v309_v20 }
 0x282   :  { %6105 = vrot.lane.b32.xlu1 %v6833_v21, %s6566_s28  ;;  %5388 = vmatprep.mubr.msk.f32.mxu0 %vm327_vm1, %v6835_v22 }
 0x2f0   :  { %v6101_v23 = vpop.permute.xlu0 %6100 }
 0x2f1   :  { %v6103_v24 = vunpack.i.h.bf16 %v6101_v23  ;;  %v6102_v25 = vunpack.i.l.bf16 %v6101_v23 }
 0x2f3   :  { %v5791_v27 = vpack.c.bf16 %v6103_v24, %v6102_v25 }
 0x2f4   :  { %v6106_v28 = vpop.permute.xlu1 %6105 }
 0x2f5   :  { %v6108_v29 = vunpack.i.h.bf16 %v6106_v28  ;;  %v6107_v30 = vunpack.i.l.bf16 %v6106_v28  ;;  %5793 = vmatprep.subr.msk.bf16.mxu1 %vm6843_vm2, %v5791_v27 }
 0x2f6   :  { %5796 = vmatpush3.bf16.xpose.msk.msra.mxu1 %vm6843_vm2, %v5791_v27 }
 0x2f7   :  { %v5797_v31 = vpack.c.bf16 %v6108_v29, %v6107_v30 }
 0x2f9   :  { %5799 = vmatprep.subr.msk.bf16.mxu0 %vm6843_vm2, %v5797_v31 }
 0x2fa   :  { %5802 = vmatpush3.bf16.xpose.msk.msra.mxu0 %vm6843_vm2, %v5797_v31 }
 0x2fd   :  { %5382 = vmatmul.mubr.msk.f32.vlgmr.msra.gmra.mrb[0].mxu1 %vm327_vm1, %v6855_v32 }
 0x301   :  { %5389 = vmatmul.mubr.msk.f32.vlgmr.msra.gmra.mrb[4].mxu0 %vm327_vm1, %v6859_v33 }
 0x3d0   :  { %v5383_v34 = vpop.f32.mrb[0].mxu1 }
 0x3d1   :  { %v404_v35 = vpop.f32.mrb[1].mxu1  ;;  %v508_v36 = vsel %vm504_vm3, %v5383_v34, -inf }
 0x3d2   :  { %509 = vmax.xlane.f32.xlu0 %v508_v36  ;;  %v505_v37 = vsel %vm504_vm3, %v404_v35, -inf }
 0x3d3   :  { %506 = vmax.xlane.f32.xlu1 %v505_v37 }
 0x3d4   :  { %v5390_v38 = vpop.f32.mrb[4].mxu0 }
 0x3d5   :  { %v495_v39 = vpop.f32.mrb[5].mxu0  ;;  %v514_v40 = vsel %vm504_vm3, %v5390_v38, -inf }
 0x3d6   :  { %v511_v41 = vsel %vm504_vm3, %v495_v39, -inf }
 0x3d7   :  { %512 = vmax.xlane.f32.xlu0 %v511_v41  ;;  %515 = vmax.xlane.f32.xlu1 %v514_v40 }
 0x3e8   :  { %6115 = vrot.lane.b32.xlu1 %v6833_v21, %s6567_s23 }
 0x3ec   :  { %6120 = vrot.lane.b32.xlu1 %v6825_v16, %s6568_s26 }
 0x3ed   :  { %6110 = vrot.lane.b32.xlu0 %v6825_v16, %s6567_s23 }
 0x3f0   :  { %727 = vrot.lane.b32.xlu1 %v6827_v17, %s6569_s29 }
 0x45f   :  { %v510_v42 = vpop.xlane.xlu0 %509 }
 0x460   :  { %v518_v43 = vsub.f32 %v5383_v34, %v510_v42  ;;  %v507_v44 = vpop.xlane.xlu1 %506 }
 0x461   :  { %v517_v45 = vsub.f32 %v404_v35, %v507_v44 }
 0x462   :  { %v523_v46 = vmul.f32 1.442695, %v518_v43 }
 0x463   :  { %v521_v47 = vmul.f32 1.442695, %v517_v45 }
 0x464   :  { %6267 = vpow2.f32 %v523_v46  ;;  %v513_v48 = vpop.xlane.xlu0 %512  ;;  %v516_v49 = vpop.xlane.xlu1 %515 }
 0x465   :  { %6269 = vpow2.f32 %v521_v47  ;;  %v519_v50 = vsub.f32 %v495_v39, %v513_v48  ;;  %v520_v51 = vsub.f32 %v5390_v38, %v516_v49 }
 0x467   :  { %v525_v52 = vmul.f32 1.442695, %v519_v50  ;;  %v527_v53 = vmul.f32 1.442695, %v520_v51 }
 0x468   :  { %v6111_v54 = vpop.permute.xlu0 %6110  ;;  %v6116_v55 = vpop.permute.xlu1 %6115 }
 0x469   :  { %6271 = vpow2.f32 %v525_v52  ;;  %v6113_v56 = vunpack.i.h.bf16 %v6111_v54  ;;  %v6112_v57 = vunpack.i.l.bf16 %v6111_v54  ;;  %v6118_v58 = vunpack.i.h.bf16 %v6116_v55 }
 0x46a   :  { %6273 = vpow2.f32 %v527_v53  ;;  %v6117_v59 = vunpack.i.l.bf16 %v6116_v55 }
 0x46b   :  { %v5803_v60 = vpack.c.bf16 %v6113_v56, %v6112_v57 }
 0x46c   :  { %v6121_v61 = vpop.permute.xlu1 %6120  ;;  %v5807_v0 = vpack.c.bf16 %v6118_v58, %v6117_v59 }
 0x46d   :  { %v6123_v62 = vunpack.i.h.bf16 %v6121_v61  ;;  %v6122_v63 = vunpack.i.l.bf16 %v6121_v61  ;;  %5804 = vmatprep.subr.bf16.mxu1 %v5803_v60 }
 0x46e   :  { %v6268_v1 = vpop.eup %6267  ;;  %5806 = vmatpush3.bf16.msra.mxu1 %v5803_v60 }
 0x46f   :  { %v6270_v2 = vpop.eup %6269  ;;  %v5811_v5 = vpack.c.bf16 %v6123_v62, %v6122_v63  ;;  %5808 = vmatprep.subr.bf16.mxu1 %v5807_v0  ;;  %v532_v6 = vsel %vm504_vm3, %v6268_v1, 0.0 }
 0x470   :  { %533 = vadd.xlane.f32.xlu1 %v532_v6  ;;  %v728_v7 = vpop.permute.xlu1 %727  ;;  %v529_v10 = vsel %vm504_vm3, %v6270_v2, 0.0 }
 0x471   :  { %530 = vadd.xlane.f32.xlu0 %v529_v10  ;;  %5813 = vmatprep.subr.msk.bf16.mxu0 %vm6843_vm2, %v5811_v5 }
 0x472   :  { %5409 = vmatprep.mubr.msk.f32.mxu0 %vm327_vm1, %v728_v7  ;;  %5816 = vmatpush3.bf16.xpose.msk.msra.mxu0 %vm6843_vm2, %v5811_v5 }
 0x473   :  { %v6272_v11 = vpop.eup %6271 }
 0x474   :  { %v6274_v12 = vpop.eup %6273  ;;  %v535_v13 = vsel %vm504_vm3, %v6272_v11, 0.0 }
 0x475   :  { %536 = vadd.xlane.f32.xlu0 %v535_v13  ;;  %v538_v14 = vsel %vm504_vm3, %v6274_v12, 0.0 }
 0x476   :  { %539 = vadd.xlane.f32.xlu1 %v538_v14 }
 0x487   :  { %729 = vrot.lane.b32.xlu1 %v6855_v32, %s6569_s29 }
 0x48b   :  { %820 = vrot.lane.b32.xlu1 %v6859_v33, %s6569_s29  ;;  %6125 = vrot.lane.b32.xlu0 %v6833_v21, %s6568_s26 }
 0x48f   :  { %818 = vrot.lane.b32.xlu0 %v6835_v22, %s6569_s29 }
 0x4fd   :  { %v534_v15 = vpop.xlane.xlu1 %533 }
 0x4fe   :  { %6275 = vrcp.f32 %v534_v15  ;;  %v531_v18 = vpop.xlane.xlu0 %530 }
 0x4ff   :  { %6277 = vrcp.f32 %v531_v18 }
 0x502   :  { %v537_v19 = vpop.xlane.xlu0 %536 }
 0x503   :  { %6279 = vrcp.f32 %v537_v19  ;;  %v540_v20 = vpop.xlane.xlu1 %539 }
 0x504   :  { %6281 = vrcp.f32 %v540_v20 }
 0x506   :  { %v6126_v23 = vpop.permute.xlu0 %6125 }
 0x507   :  { %v730_v24 = vpop.permute.xlu1 %729  ;;  %v6128_v28 = vunpack.i.h.bf16 %v6126_v23  ;;  %v6127_v29 = vunpack.i.l.bf16 %v6126_v23 }
 0x508   :  { %v6276_v25 = vpop.eup %6275  ;;  %5410 = vmatmul.mubr.msk.f32.vlgmr.msra.gmra.mrb[6].mxu0 %vm327_vm1, %v730_v24 }
 0x509   :  { %v6278_v27 = vpop.eup %6277  ;;  %v546_v31 = vmul.f32 %v6276_v25, %v6268_v1  ;;  %v5817_v35 = vpack.c.bf16 %v6128_v28, %v6127_v29 }
 0x50a   :  { %v545_v30 = vmul.f32 %v6278_v27, %v6270_v2  ;;  %v819_v39 = vpop.permute.xlu0 %818 }
 0x50b   :  { %v821_v40 = vpop.permute.xlu1 %820 }
 0x50c   :  { %5395 = vmatprep.mubr.msk.f32.mxu1 %vm504_vm3, %v545_v30 }
 0x50d   :  { %v6280_v34 = vpop.eup %6279  ;;  %5396 = vmatmul.mubr.msk.f32.vlgmr.msra.gmra.mrb[2].mxu1 %vm504_vm3, %v546_v31 }
 0x50e   :  { %v6282_v36 = vpop.eup %6281  ;;  %5810 = vmatpush3.bf16.msra.mxu1 %v5807_v0  ;;  %v547_v37 = vmul.f32 %v6280_v34, %v6272_v11 }
 0x50f   :  { %5819 = vmatprep.subr.msk.bf16.mxu1 %vm6843_vm2, %v5817_v35  ;;  %v548_v38 = vmul.f32 %v6282_v36, %v6274_v12 }
 0x510   :  { %5402 = vmatprep.mubr.msk.f32.mxu1 %vm504_vm3, %v547_v37 }
 0x511   :  { %5403 = vmatmul.mubr.msk.f32.vlgmr.msra.gmra.mrb[4].mxu1 %vm504_vm3, %v548_v38 }
 0x512   :  { %5416 = vmatprep.mubr.msk.f32.mxu1 %vm327_vm1, %v819_v39 }
 0x517   :  { %5822 = vmatpush3.bf16.xpose.msk.msra.mxu1 %vm6843_vm2, %v5817_v35 }
 0x51e   :  { %5417 = vmatmul.mubr.msk.f32.vlgmr.msra.gmra.mrb[6].mxu1 %vm327_vm1, %v821_v40 }
 0x5db   :  { %v5411_v41 = vpop.f32.mrb[6].mxu0 }
 0x5dc   :  { %v809_v42 = vpop.f32.mrb[7].mxu0  ;;  %v912_v43 = vsel %vm504_vm3, %v5411_v41, -inf }
 0x5dd   :  { %913 = vmax.xlane.f32.xlu1 %v912_v43  ;;  %v909_v44 = vsel %vm504_vm3, %v809_v42, -inf }
 0x5de   :  { %910 = vmax.xlane.f32.xlu0 %v909_v44 }
 0x5e0   :  { %v5397_v45 = vpop.f32.mrb[2].mxu1 }
 0x5e1   :  { %724 = vst.msk [vmem:[#allocation2 + $0x8] sm:$0xff] %vm327_vm1, %v5397_v45  ;;  %v627_v46 = vpop.f32.mrb[3].mxu1 }
 0x5e2   :  { %723 = vst.msk [vmem:[#allocation2] sm:$0xff] %vm327_vm1, %v627_v46 }
 0x5e4   :  { %v5404_v47 = vpop.f32.mrb[4].mxu1 }
 0x5e5   :  { %726 = vst.msk [vmem:[#allocation2 + $0x18] sm:$0xff] %vm327_vm1, %v5404_v47  ;;  %v714_v48 = vpop.f32.mrb[5].mxu1 }
 0x5e6   :  { %725 = vst.msk [vmem:[#allocation2 + $0x10] sm:$0xff] %vm327_vm1, %v714_v48 }
 0x5f1   :  { %v5418_v49 = vpop.f32.mrb[6].mxu1 }
 0x5f2   :  { %v900_v50 = vpop.f32.mrb[7].mxu1  ;;  %v918_v52 = vsel %vm504_vm3, %v5418_v49, -inf }
 0x5f3   :  { %v915_v51 = vsel %vm504_vm3, %v900_v50, -inf }
 0x5f4   :  { %916 = vmax.xlane.f32.xlu0 %v915_v51 }
 0x5f8   :  { %919 = vmax.xlane.f32.xlu0 %v918_v52 }
 0x66a   :  { %v914_v53 = vpop.xlane.xlu1 %913 }
 0x66b   :  { %v922_v54 = vsub.f32 %v5411_v41, %v914_v53  ;;  %v911_v55 = vpop.xlane.xlu0 %910 }
 0x66c   :  { %v921_v56 = vsub.f32 %v809_v42, %v911_v55 }
 0x66d   :  { %v927_v57 = vmul.f32 1.442695, %v922_v54 }
 0x66e   :  { %v925_v58 = vmul.f32 1.442695, %v921_v56 }
 0x66f   :  { %6283 = vpow2.f32 %v927_v57 }
 0x670   :  { %6285 = vpow2.f32 %v925_v58 }
 0x679   :  { %v6284_v59 = vpop.eup %6283 }
 0x67a   :  { %v6286_v60 = vpop.eup %6285  ;;  %v936_v61 = vsel %vm504_vm3, %v6284_v59, 0.0 }
 0x67b   :  { %937 = vadd.xlane.f32.xlu1 %v936_v61  ;;  %v933_v62 = vsel %vm504_vm3, %v6286_v60, 0.0 }
 0x67c   :  { %934 = vadd.xlane.f32.xlu0 %v933_v62 }
 0x681   :  { %v917_v63 = vpop.xlane.xlu0 %916 }
 0x682   :  { %v923_v0 = vsub.f32 %v900_v50, %v917_v63 }
 0x684   :  { %v929_v1 = vmul.f32 1.442695, %v923_v0 }
 0x685   :  { %v920_v2 = vpop.xlane.xlu0 %919 }
 0x686   :  { %v924_v5 = vsub.f32 %v5418_v49, %v920_v2  ;;  %6287 = vpow2.f32 %v929_v1 }
 0x688   :  { %v931_v6 = vmul.f32 1.442695, %v924_v5 }
 0x68a   :  { %6289 = vpow2.f32 %v931_v6 }
 0x68c   :  { %6135 = vrot.lane.b32.xlu1 %v6833_v21, %s6570_s19 }
 0x690   :  { %6140 = vrot.lane.b32.xlu1 %v6825_v16, %s6571_s1  ;;  %v6288_v7 = vpop.eup %6287 }
 0x691   :  { %v939_v10 = vsel %vm504_vm3, %v6288_v7, 0.0 }
 0x692   :  { %6130 = vrot.lane.b32.xlu0 %v6825_v16, %s6570_s19 }
 0x694   :  { %1148 = vrot.lane.b32.xlu1 %v6827_v17, %s6572_s13  ;;  %v6290_v11 = vpop.eup %6289 }
 0x695   :  { %v942_v12 = vsel %vm504_vm3, %v6290_v11, 0.0 }
 0x6b1   :  { %940 = vadd.xlane.f32.xlu0 %v939_v10 }
 0x6b8   :  { %943 = vadd.xlane.f32.xlu1 %v942_v12 }
 0x6c7   :  { %6145 = vrot.lane.b32.xlu0 %v6833_v21, %s6571_s1 }
 0x6c9   :  { %1150 = vrot.lane.b32.xlu1 %v6855_v32, %s6572_s13 }
 0x6cb   :  { %1239 = vrot.lane.b32.xlu0 %v6835_v22, %s6572_s13 }
 0x6cd   :  { %1241 = vrot.lane.b32.xlu1 %v6859_v33, %s6572_s13 }
 0x708   :  { %v938_v13 = vpop.xlane.xlu1 %937 }
 0x709   :  { %6291 = vrcp.f32 %v938_v13  ;;  %v935_v14 = vpop.xlane.xlu0 %934 }
 0x70a   :  { %6293 = vrcp.f32 %v935_v14 }
 0x70c   :  { %v6136_v15 = vpop.permute.xlu1 %6135 }
 0x70d   :  { %v6131_v18 = vpop.permute.xlu0 %6130  ;;  %v6138_v19 = vunpack.i.h.bf16 %v6136_v15  ;;  %v6137_v20 = vunpack.i.l.bf16 %v6136_v15 }
 0x70e   :  { %v6133_v23 = vunpack.i.h.bf16 %v6131_v18  ;;  %v6132_v24 = vunpack.i.l.bf16 %v6131_v18 }
 0x70f   :  { %v5827_v30 = vpack.c.bf16 %v6138_v19, %v6137_v20 }
 0x710   :  { %v6141_v25 = vpop.permute.xlu1 %6140  ;;  %v5823_v27 = vpack.c.bf16 %v6133_v23, %v6132_v24 }
 0x711   :  { %v6143_v28 = vunpack.i.h.bf16 %v6141_v25  ;;  %v6142_v29 = vunpack.i.l.bf16 %v6141_v25 }
 0x712   :  { %5824 = vmatprep.subr.bf16.mxu1 %v5823_v27 }
 0x713   :  { %v6292_v31 = vpop.eup %6291  ;;  %v5831_v34 = vpack.c.bf16 %v6143_v28, %v6142_v29  ;;  %5826 = vmatpush3.bf16.msra.mxu1 %v5823_v27 }
 0x714   :  { %v6294_v35 = vpop.eup %6293  ;;  %v1149_v36 = vpop.permute.xlu1 %1148  ;;  %5828 = vmatprep.subr.bf16.mxu1 %v5827_v30  ;;  %v950_v38 = vmul.f32 %v6292_v31, %v6284_v59 }
 0x715   :  { %5833 = vmatprep.subr.msk.bf16.mxu0 %vm6843_vm2, %v5831_v34  ;;  %5437 = vmatprep.mubr.msk.f32.mxu0 %vm327_vm1, %v1149_v36  ;;  %v949_v37 = vmul.f32 %v6294_v35, %v6286_v60 }
 0x716   :  { %5836 = vmatpush3.bf16.xpose.msk.msra.mxu0 %vm6843_vm2, %v5831_v34 }
 0x717   :  { %5423 = vmatprep.mubr.msk.f32.mxu1 %vm504_vm3, %v949_v37 }
 0x718   :  { %5424 = vmatmul.mubr.msk.f32.vlgmr.msra.gmra.mrb[8].mxu1 %vm504_vm3, %v950_v38 }
 0x719   :  { %5830 = vmatpush3.bf16.msra.mxu1 %v5827_v30 }
 0x73e   :  { %v941_v39 = vpop.xlane.xlu0 %940 }
 0x73f   :  { %6295 = vrcp.f32 %v941_v39 }
 0x742   :  { %v6146_v40 = vpop.permute.xlu0 %6145 }
 0x743   :  { %v6148_v41 = vunpack.i.h.bf16 %v6146_v40  ;;  %v6147_v42 = vunpack.i.l.bf16 %v6146_v40 }
 0x745   :  { %v5837_v43 = vpack.c.bf16 %v6148_v41, %v6147_v42  ;;  %v944_v44 = vpop.xlane.xlu1 %943 }
 0x746   :  { %6297 = vrcp.f32 %v944_v44  ;;  %v1240_v50 = vpop.permute.xlu0 %1239 }
 0x747   :  { %5839 = vmatprep.subr.msk.bf16.mxu1 %vm6843_vm2, %v5837_v43 }
 0x749   :  { %v6296_v45 = vpop.eup %6295  ;;  %v1151_v46 = vpop.permute.xlu1 %1150 }
 0x74a   :  { %5438 = vmatmul.mubr.msk.f32.vlgmr.msra.gmra.mrb[8].mxu0 %vm327_vm1, %v1151_v46  ;;  %v951_v47 = vmul.f32 %v6296_v45, %v6288_v7 }
 0x74c   :  { %5430 = vmatprep.mubr.msk.f32.mxu1 %vm504_vm3, %v951_v47 }
 0x74d   :  { %v1242_v51 = vpop.permute.xlu1 %1241 }
 0x750   :  { %v6298_v48 = vpop.eup %6297 }
 0x751   :  { %v952_v49 = vmul.f32 %v6298_v48, %v6290_v11 }
 0x753   :  { %5431 = vmatmul.mubr.msk.f32.vlgmr.msra.gmra.mrb[10].mxu1 %vm504_vm3, %v952_v49 }
 0x754   :  { %5842 = vmatpush3.bf16.xpose.msk.msra.mxu1 %vm6843_vm2, %v5837_v43  ;;  %5444 = vmatprep.mubr.msk.f32.mxu1 %vm327_vm1, %v1240_v50 }
 0x75b   :  { %5445 = vmatmul.mubr.msk.f32.vlgmr.msra.gmra.mrb[12].mxu1 %vm327_vm1, %v1242_v51 }
 0x7eb   :  { %v6947_v52 = vpop.f32.mrb[8].mxu1 }
 0x7ec   :  { %v6949_v53 = vpop.f32.mrb[9].mxu1 }
 0x81d   :  { %v5439_v54 = vpop.f32.mrb[8].mxu0 }
 0x81e   :  { %v1230_v55 = vpop.f32.mrb[9].mxu0  ;;  %v1333_v56 = vsel %vm504_vm3, %v5439_v54, -inf }
 0x81f   :  { %1334 = vmax.xlane.f32.xlu1 %v1333_v56  ;;  %v1330_v57 = vsel %vm504_vm3, %v1230_v55, -inf }
 0x820   :  { %1331 = vmax.xlane.f32.xlu0 %v1330_v57 }
 0x826   :  { %v6953_v58 = vpop.f32.mrb[10].mxu1 }
 0x827   :  { %v6955_v59 = vpop.f32.mrb[11].mxu1 }
 0x82e   :  { %v5446_v60 = vpop.f32.mrb[12].mxu1 }
 0x82f   :  { %v1321_v61 = vpop.f32.mrb[13].mxu1  ;;  %v1339_v63 = vsel %vm504_vm3, %v5446_v60, -inf }
 0x830   :  { %v1336_v62 = vsel %vm504_vm3, %v1321_v61, -inf }
 0x831   :  { %1337 = vmax.xlane.f32.xlu0 %v1336_v62 }
 0x835   :  { %1340 = vmax.xlane.f32.xlu0 %v1339_v63 }
 0x8ac   :  { %v1335_v0 = vpop.xlane.xlu1 %1334 }
 0x8ad   :  { %v1343_v1 = vsub.f32 %v5439_v54, %v1335_v0  ;;  %v1332_v2 = vpop.xlane.xlu0 %1331 }
 0x8ae   :  { %v1342_v5 = vsub.f32 %v1230_v55, %v1332_v2 }
 0x8af   :  { %v1348_v6 = vmul.f32 1.442695, %v1343_v1 }
 0x8b0   :  { %v1346_v7 = vmul.f32 1.442695, %v1342_v5 }
 0x8b1   :  { %6299 = vpow2.f32 %v1348_v6 }
 0x8b2   :  { %6301 = vpow2.f32 %v1346_v7 }
 0x8bb   :  { %v6300_v10 = vpop.eup %6299 }
 0x8bc   :  { %v6302_v11 = vpop.eup %6301  ;;  %v1357_v12 = vsel %vm504_vm3, %v6300_v10, 0.0 }
 0x8bd   :  { %1358 = vadd.xlane.f32.xlu1 %v1357_v12  ;;  %v1354_v13 = vsel %vm504_vm3, %v6302_v11, 0.0 }
 0x8be   :  { %1355 = vadd.xlane.f32.xlu0 %v1354_v13  ;;  %v1338_v14 = vpop.xlane.xlu0 %1337 }
 0x8bf   :  { %v1344_v15 = vsub.f32 %v1321_v61, %v1338_v14 }
 0x8c1   :  { %v1350_v18 = vmul.f32 1.442695, %v1344_v15 }
 0x8c2   :  { %v1341_v19 = vpop.xlane.xlu0 %1340 }
 0x8c3   :  { %v1345_v20 = vsub.f32 %v5446_v60, %v1341_v19  ;;  %6303 = vpow2.f32 %v1350_v18 }
 0x8c5   :  { %v1352_v23 = vmul.f32 1.442695, %v1345_v20 }
 0x8c7   :  { %6305 = vpow2.f32 %v1352_v23 }
 0x8cd   :  { %v6304_v24 = vpop.eup %6303 }
 0x8ce   :  { %6155 = vrot.lane.b32.xlu1 %v6833_v21, %s6573_s25  ;;  %v1360_v25 = vsel %vm504_vm3, %v6304_v24, 0.0 }
 0x8d1   :  { %v6306_v27 = vpop.eup %6305 }
 0x8d2   :  { %6160 = vrot.lane.b32.xlu1 %v6825_v16, %s6574_s0  ;;  %v1363_v28 = vsel %vm504_vm3, %v6306_v27, 0.0 }
 0x8d4   :  { %6150 = vrot.lane.b32.xlu0 %v6825_v16, %s6573_s25 }
 0x8d6   :  { %1569 = vrot.lane.b32.xlu1 %v6827_v17, %s7648_s20 }
 0x8f3   :  { %1361 = vadd.xlane.f32.xlu0 %v1360_v25 }
 0x8fa   :  { %1364 = vadd.xlane.f32.xlu1 %v1363_v28 }
 0x909   :  { %6165 = vrot.lane.b32.xlu0 %v6833_v21, %s6574_s0 }
 0x90b   :  { %1571 = vrot.lane.b32.xlu1 %v6855_v32, %s7648_s20 }
 0x90d   :  { %1660 = vrot.lane.b32.xlu0 %v6835_v22, %s7648_s20 }
 0x90f   :  { %1662 = vrot.lane.b32.xlu1 %v6859_v33, %s7648_s20 }
 0x94a   :  { %v1359_v17 = vpop.xlane.xlu1 %1358 }
 0x94b   :  { %6307 = vrcp.f32 %v1359_v17  ;;  %v1356_v29 = vpop.xlane.xlu0 %1355 }
 0x94c   :  { %6309 = vrcp.f32 %v1356_v29 }
 0x94e   :  { %v6156_v30 = vpop.permute.xlu1 %6155 }
 0x94f   :  { %v6158_v31 = vunpack.i.h.bf16 %v6156_v30  ;;  %v6157_v34 = vunpack.i.l.bf16 %v6156_v30  ;;  %v6151_v35 = vpop.permute.xlu0 %6150 }
 0x950   :  { %v6153_v36 = vunpack.i.h.bf16 %v6151_v35  ;;  %v6152_v37 = vunpack.i.l.bf16 %v6151_v35 }
 0x951   :  { %v5847_v38 = vpack.c.bf16 %v6158_v31, %v6157_v34 }
 0x952   :  { %v6161_v39 = vpop.permute.xlu1 %6160  ;;  %v5843_v40 = vpack.c.bf16 %v6153_v36, %v6152_v37 }
 0x953   :  { %v6163_v32 = vunpack.i.h.bf16 %v6161_v39  ;;  %v6162_v41 = vunpack.i.l.bf16 %v6161_v39  ;;  %5848 = vmatprep.subr.bf16.mxu1 %v5847_v38 }
 0x954   :  { %5844 = vmatprep.subr.bf16.mxu0 %v5843_v40  ;;  %5850 = vmatpush3.bf16.msra.mxu1 %v5847_v38 }
 0x955   :  { %v6308_v22 = vpop.eup %6307  ;;  %v5851_v33 = vpack.c.bf16 %v6163_v32, %v6162_v41  ;;  %5846 = vmatpush3.bf16.msra.mxu0 %v5843_v40 }
 0x956   :  { %v6310_v42 = vpop.eup %6309  ;;  %v1371_v44 = vmul.f32 %v6308_v22, %v6300_v10  ;;  %v1570_v45 = vpop.permute.xlu1 %1569 }
 0x957   :  { %5853 = vmatprep.subr.msk.bf16.mxu0 %vm6843_vm2, %v5851_v33  ;;  %v1370_v43 = vmul.f32 %v6310_v42, %v6302_v11 }
 0x959   :  { %5451 = vmatprep.mubr.msk.f32.mxu0 %vm504_vm3, %v1370_v43 }
 0x95a   :  { %5452 = vmatmul.mubr.msk.f32.vlgmr.msra.gmra.mrb[10].mxu0 %vm504_vm3, %v1371_v44 }
 0x95b   :  { %5465 = vmatprep.mubr.msk.f32.mxu0 %vm327_vm1, %v1570_v45 }
 0x95e   :  { %5856 = vmatpush3.bf16.xpose.msk.msra.mxu0 %vm6843_vm2, %v5851_v33 }
 0x980   :  { %v1362_v46 = vpop.xlane.xlu0 %1361 }
 0x981   :  { %6311 = vrcp.f32 %v1362_v46 }
 0x984   :  { %v6166_v47 = vpop.permute.xlu0 %6165 }
 0x985   :  { %v6168_v48 = vunpack.i.h.bf16 %v6166_v47  ;;  %v6167_v49 = vunpack.i.l.bf16 %v6166_v47 }
 0x987   :  { %v5857_v50 = vpack.c.bf16 %v6168_v48, %v6167_v49  ;;  %v1365_v51 = vpop.xlane.xlu1 %1364 }
 0x988   :  { %6313 = vrcp.f32 %v1365_v51  ;;  %v1661_v61 = vpop.permute.xlu0 %1660 }
 0x989   :  { %5859 = vmatprep.subr.msk.bf16.mxu1 %vm6843_vm2, %v5857_v50 }
 0x98b   :  { %v6312_v54 = vpop.eup %6311  ;;  %v1572_v55 = vpop.permute.xlu1 %1571 }
 0x98c   :  { %5466 = vmatmul.mubr.msk.f32.vlgmr.msra.gmra.mrb[12].mxu0 %vm327_vm1, %v1572_v55  ;;  %v1372_v56 = vmul.f32 %v6312_v54, %v6304_v24 }
 0x98e   :  { %5458 = vmatprep.mubr.msk.f32.mxu1 %vm504_vm3, %v1372_v56 }
 0x98f   :  { %v1663_v62 = vpop.permute.xlu1 %1662 }
 0x992   :  { %v6314_v57 = vpop.eup %6313 }
 0x993   :  { %v1373_v60 = vmul.f32 %v6314_v57, %v6306_v27 }
 0x995   :  { %5459 = vmatmul.mubr.msk.f32.vlgmr.msra.gmra.mrb[14].mxu1 %vm504_vm3, %v1373_v60 }
 0x996   :  { %5862 = vmatpush3.bf16.xpose.msk.msra.mxu1 %vm6843_vm2, %v5857_v50  ;;  %5472 = vmatprep.mubr.msk.f32.mxu1 %vm327_vm1, %v1661_v61 }
 0x99d   :  { %5473 = vmatmul.mubr.msk.f32.vlgmr.msra.gmra.mrb[16].mxu1 %vm327_vm1, %v1663_v62  ;;  %v1994_v62 = vld [vmem:[%s7630_s6] sm:$0xff] }
 0xa2d   :  { %v5453_v63 = vpop.f32.mrb[10].mxu0 }
 0xa2e   :  { %v1452_v0 = vpop.f32.mrb[11].mxu0 }
 0xa5f   :  { %v5467_v1 = vpop.f32.mrb[12].mxu0 }
 0xa60   :  { %v1651_v2 = vpop.f32.mrb[13].mxu0  ;;  %v1754_v5 = vsel %vm504_vm3, %v5467_v1, -inf }
 0xa61   :  { %1755 = vmax.xlane.f32.xlu1 %v1754_v5  ;;  %v1751_v6 = vsel %vm504_vm3, %v1651_v2, -inf }
 0xa62   :  { %1752 = vmax.xlane.f32.xlu0 %v1751_v6 }
 0xa68   :  { %v6997_v7 = vpop.f32.mrb[14].mxu1 }
 0xa69   :  { %v6999_v10 = vpop.f32.mrb[15].mxu1 }
 0xa70   :  { %v5474_v11 = vpop.f32.mrb[16].mxu1 }
 0xa71   :  { %v1742_v12 = vpop.f32.mrb[17].mxu1  ;;  %v1760_v14 = vsel %vm504_vm3, %v5474_v11, -inf }
 0xa72   :  { %v1757_v13 = vsel %vm504_vm3, %v1742_v12, -inf }
 0xa73   :  { %1758 = vmax.xlane.f32.xlu0 %v1757_v13 }
 0xa77   :  { %1761 = vmax.xlane.f32.xlu0 %v1760_v14 }
 0xaee   :  { %v1756_v15 = vpop.xlane.xlu1 %1755 }
 0xaef   :  { %v1764_v18 = vsub.f32 %v5467_v1, %v1756_v15  ;;  %v1753_v19 = vpop.xlane.xlu0 %1752  ;;  %v1996_v1 = vld [vmem:[%s7630_s6 + $0x10] sm:$0xff] }
 0xaf0   :  { %v1763_v20 = vsub.f32 %v1651_v2, %v1753_v19  ;;  %v1997_v2 = vld [vmem:[%s7630_s6 + $0x18] sm:$0xff] }
 0xaf1   :  { %v1769_v23 = vmul.f32 1.442695, %v1764_v18  ;;  %v5875_v5 = vpack.c.bf16 %v1997_v2, %v1996_v1  ;;  %v2309_v1 = vld [vmem:[%s7636_s12 + $0x8] sm:$0xff]  ;;  %v2310_v2 = vld [vmem:[%s7636_s12 + $0x10] sm:$0xff] }
 0xaf2   :  { %v1767_v24 = vmul.f32 1.442695, %v1763_v20 }
 0xaf3   :  { %6315 = vpow2.f32 %v1769_v23 }
 0xaf4   :  { %6317 = vpow2.f32 %v1767_v24 }
 0xafd   :  { %v6316_v25 = vpop.eup %6315 }
 0xafe   :  { %v6318_v27 = vpop.eup %6317  ;;  %v1778_v28 = vsel %vm504_vm3, %v6316_v25, 0.0 }
 0xaff   :  { %1779 = vadd.xlane.f32.xlu1 %v1778_v28  ;;  %v1775_v17 = vsel %vm504_vm3, %v6318_v27, 0.0 }
 0xb00   :  { %v1759_v29 = vpop.xlane.xlu0 %1758  ;;  %1776 = vadd.xlane.f32.xlu0 %v1775_v17 }
 0xb01   :  { %v1765_v30 = vsub.f32 %v1742_v12, %v1759_v29 }
 0xb03   :  { %v1771_v31 = vmul.f32 1.442695, %v1765_v30 }
 0xb04   :  { %v1762_v34 = vpop.xlane.xlu0 %1761 }
 0xb05   :  { %6319 = vpow2.f32 %v1771_v31  ;;  %v1766_v35 = vsub.f32 %v5474_v11, %v1762_v34 }
 0xb07   :  { %v1773_v36 = vmul.f32 1.442695, %v1766_v35 }
 0xb09   :  { %6321 = vpow2.f32 %v1773_v36 }
 0xb0f   :  { %v6320_v37 = vpop.eup %6319 }
 0xb10   :  { %v1781_v38 = vsel %vm504_vm3, %v6320_v37, 0.0 }
 0xb11   :  { %1782 = vadd.xlane.f32.xlu0 %v1781_v38 }
 0xb13   :  { %v6322_v39 = vpop.eup %6321 }
 0xb14   :  { %v1784_v40 = vsel %vm504_vm3, %v6322_v39, 0.0 }
 0xb15   :  { %1785 = vadd.xlane.f32.xlu1 %v1784_v40 }
 0xb26   :  { %6175 = vrot.lane.b32.xlu1 %v6833_v21, %s7646_s21 }
 0xb27   :  { %6170 = vrot.lane.b32.xlu0 %v6825_v16, %s7646_s21 }
 0xb2a   :  { %1131 = vrot.lane.b32.xlu1 %v6949_v53, %s7654_s22 }
 0xb2b   :  { %1552 = vrot.lane.b32.xlu0 %v1452_v0, %s7652_s24 }
 0xb2e   :  { %1133 = vrot.lane.b32.xlu1 %v6947_v52, %s7654_s22 }
 0xb32   :  { %1554 = vrot.lane.b32.xlu1 %v5453_v63, %s7652_s24  ;;  %v1995_v63 = vld [vmem:[%s7630_s6 + $0x8] sm:$0xff] }
 0xb33   :  { %v5871_v0 = vpack.c.bf16 %v1995_v63, %v1994_v62  ;;  %v2183_v62 = vld [vmem:[%s7634_s10 + $0x18] sm:$0xff] }
 0xb8c   :  { %v1780_v22 = vpop.xlane.xlu1 %1779 }
 0xb8d   :  { %v1777_v32 = vpop.xlane.xlu0 %1776 }
 0xb8e   :  { %6323 = vrcp.f32 %v1777_v32 }
 0xb8f   :  { %6325 = vrcp.f32 %v1780_v22 }
 0xb98   :  { %v6324_v41 = vpop.eup %6323 }
 0xb99   :  { %v1791_v33 = vmul.f32 %v6324_v41, %v6318_v27  ;;  %v6326_v45 = vpop.eup %6325  ;;  %v5003_v27 = vld [vmem:[#allocation3] ss:$0 sm:$0xff] }
 0xb9a   :  { %v1792_v49 = vmul.f32 %v6326_v45, %v6316_v25 }
 0xb9b   :  { %5479 = vmatprep.mubr.msk.f32.mxu0 %vm504_vm3, %v1791_v33 }
 0xb9e   :  { %v1783_v16 = vpop.xlane.xlu0 %1782 }
 0xb9f   :  { %6327 = vrcp.f32 %v1783_v16 }
 0xba2   :  { %v1786_v21 = vpop.xlane.xlu1 %1785  ;;  %v6171_v42 = vpop.permute.xlu0 %6170 }
 0xba3   :  { %6329 = vrcp.f32 %v1786_v21  ;;  %v6173_v53 = vunpack.i.h.bf16 %v6171_v42  ;;  %v6172_v43 = vunpack.i.l.bf16 %v6171_v42 }
 0xba5   :  { %v5863_v44 = vpack.c.bf16 %v6173_v53, %v6172_v43 }
 0xba6   :  { %v6176_v52 = vpop.permute.xlu1 %6175  ;;  %v1553_v55 = vpop.permute.xlu0 %1552 }
 0xba7   :  { %v6178_v46 = vunpack.i.h.bf16 %v6176_v52  ;;  %v6177_v47 = vunpack.i.l.bf16 %v6176_v52  ;;  %5864 = vmatprep.subr.bf16.mxu0 %v5863_v44 }
 0xba8   :  { %5866 = vmatpush3.bf16.msra.mxu0 %v5863_v44 }
 0xba9   :  { %v6328_v48 = vpop.eup %6327  ;;  %v5867_v50 = vpack.c.bf16 %v6178_v46, %v6177_v47  ;;  %5872 = vmatprep.subr.bf16.mxu0 %v5871_v0 }
 0xbaa   :  { %v1132_v51 = vpop.permute.xlu1 %1131  ;;  %v1793_v54 = vmul.f32 %v6328_v48, %v6320_v37 }
 0xbab   :  { %1144 = vst.msk [vmem:[#allocation2] sm:$0xff] %vm1143_vm4, %v1132_v51  ;;  %5480 = vmatmul.mubr.msk.f32.vlgmr.msra.gmra.mrb[14].mxu0 %vm504_vm3, %v1792_v49  ;;  %5868 = vmatprep.subr.bf16.mxu1 %v5867_v50 }
 0xbac   :  { %5870 = vmatpush3.bf16.msra.mxu1 %v5867_v50  ;;  %5486 = vmatprep.mubr.msk.f32.mxu1 %vm504_vm3, %v1793_v54  ;;  %1565 = vst.msk [vmem:[#allocation2] sm:$0xff] %vm1564_vm5, %v1553_v55 }
 0xbad   :  { %v6330_v56 = vpop.eup %6329  ;;  %5874 = vmatpush3.bf16.msra.mxu0 %v5871_v0  ;;  %v2308_v0 = vld [vmem:[%s7636_s12] sm:$0xff] }
 0xbae   :  { %v1134_v57 = vpop.permute.xlu1 %1133  ;;  %v1794_v60 = vmul.f32 %v6330_v56, %v6322_v39  ;;  %5876 = vmatprep.subr.bf16.mxu0 %v5875_v5  ;;  %v2180_v56 = vld [vmem:[%s7634_s10] sm:$0xff] }
 0xbaf   :  { %1145 = vst.msk [vmem:[#allocation2 + $0x8] sm:$0xff] %vm1143_vm4, %v1134_v57  ;;  %v2181_v57 = vld [vmem:[%s7634_s10 + $0x8] sm:$0xff] }
 0xbb0   :  { %5487 = vmatmul.mubr.msk.f32.vlgmr.msra.gmra.mrb[18].mxu1 %vm504_vm3, %v1794_v60  ;;  %v5879_v60 = vpack.c.bf16 %v2181_v57, %v2180_v56  ;;  %v5010_v57 = vld [vmem:[#allocation5] ss:$0 sm:$0xff] }
 0xbb1   :  { %5878 = vmatpush3.bf16.msra.mxu0 %v5875_v5  ;;  %v5887_v5 = vpack.c.bf16 %v2309_v1, %v2308_v0 }
 0xbb2   :  { %v1555_v61 = vpop.permute.xlu1 %1554  ;;  %5880 = vmatprep.subr.bf16.mxu1 %v5879_v60 }
 0xbb3   :  { %1566 = vst.msk [vmem:[#allocation2 + $0x8] sm:$0xff] %vm1564_vm5, %v1555_v61  ;;  %5882 = vmatpush3.bf16.msra.mxu1 %v5879_v60  ;;  %v2182_v61 = vld [vmem:[%s7634_s10 + $0x10] sm:$0xff]  ;;  %5888 = vmatprep.subr.bf16.mxu0 %v5887_v5 }
 0xbb4   :  { %v5883_v63 = vpack.c.bf16 %v2183_v62, %v2182_v61 }
 0xbb6   :  { %5884 = vmatprep.subr.bf16.mxu1 %v5883_v63 }
 0xbb7   :  { %5886 = vmatpush3.bf16.msra.mxu1 %v5883_v63 }
 0xc7e   :  { %v5481_v6 = vpop.f32.mrb[14].mxu0 }
 0xc7f   :  { %1975 = vrot.lane.b32.xlu1 %v5481_v6, %s7650_s7  ;;  %v1873_v11 = vpop.f32.mrb[15].mxu0  ;;  %v2311_v6 = vld [vmem:[%s7636_s12 + $0x18] sm:$0xff] }
 0xc80   :  { %1973 = vrot.lane.b32.xlu0 %v1873_v11, %s7650_s7  ;;  %v5891_v11 = vpack.c.bf16 %v2311_v6, %v2310_v2 }
 0xc83   :  { %v5488_v12 = vpop.f32.mrb[18].mxu1  ;;  %1137 = vrot.lane.b32.xlu1 %v6953_v58, %s7654_s22 }
 0xc84   :  { %v1960_v13 = vpop.f32.mrb[19].mxu1  ;;  %1135 = vrot.lane.b32.xlu0 %v6955_v59, %s7654_s22 }
 0xc87   :  { %1558 = vrot.lane.b32.xlu1 %v6997_v7, %s7652_s24 }
 0xc88   :  { %1556 = vrot.lane.b32.xlu0 %v6999_v10, %s7652_s24 }
 0xc8b   :  { %1979 = vrot.lane.b32.xlu1 %v5488_v12, %s7650_s7  ;;  %v2312_v12 = vld [vmem:[%s7636_s12 + $0x20] sm:$0xff] }
 0xc8c   :  { %1977 = vrot.lane.b32.xlu0 %v1960_v13, %s7650_s7  ;;  %v2313_v13 = vld [vmem:[%s7636_s12 + $0x28] sm:$0xff] }
 0xcf1   :  { %v1976_v14 = vpop.permute.xlu1 %1975 }
 0xcf2   :  { %1987 = vst.msk [vmem:[#allocation2 + $0x8] sm:$0xff] %vm1985_vm6, %v1976_v14  ;;  %v1974_v15 = vpop.permute.xlu0 %1973  ;;  %v5895_v14 = vpack.c.bf16 %v2313_v13, %v2312_v12 }
 0xcf3   :  { %1986 = vst.msk [vmem:[#allocation2] sm:$0xff] %vm1985_vm6, %v1974_v15 }
 0xcf5   :  { %v1138_v58 = vpop.permute.xlu1 %1137 }
 0xcf6   :  { %1147 = vst.msk [vmem:[#allocation2 + $0x18] sm:$0xff] %vm1143_vm4, %v1138_v58  ;;  %v1136_v59 = vpop.permute.xlu0 %1135 }
 0xcf7   :  { %1146 = vst.msk [vmem:[#allocation2 + $0x10] sm:$0xff] %vm1143_vm4, %v1136_v59 }
 0xcf9   :  { %v1559_v7 = vpop.permute.xlu1 %1558  ;;  %v1991_v19 = vld [vmem:[#allocation2 + $0x8] sm:$0xff] }
 0xcfa   :  { %1568 = vst.msk [vmem:[#allocation2 + $0x18] sm:$0xff] %vm1564_vm5, %v1559_v7  ;;  %v1557_v10 = vpop.permute.xlu0 %1556  ;;  %v1990_v18 = vld [vmem:[#allocation2] sm:$0xff] }
 0xcfb   :  { %1567 = vst.msk [vmem:[#allocation2 + $0x10] sm:$0xff] %vm1564_vm5, %v1557_v10  ;;  %5497 = vmatprep.mubr.msk.f32.mxu0 %vm135_vm0, %v1990_v18 }
 0xcfc   :  { %5498 = vmatmul.mubr.msk.f32.vlgmr.msra.gmra.mrb[16].mxu0 %vm135_vm0, %v1991_v19 }
 0xcfd   :  { %v1980_v20 = vpop.permute.xlu1 %1979  ;;  %5890 = vmatpush3.bf16.msra.mxu0 %v5887_v5 }
 0xcfe   :  { %1989 = vst.msk [vmem:[#allocation2 + $0x18] sm:$0xff] %vm1985_vm6, %v1980_v20  ;;  %v1978_v23 = vpop.permute.xlu0 %1977  ;;  %5892 = vmatprep.subr.bf16.mxu0 %v5891_v11 }
 0xcff   :  { %1988 = vst.msk [vmem:[#allocation2 + $0x10] sm:$0xff] %vm1985_vm6, %v1978_v23 }
 0xd01   :  { %5894 = vmatpush3.bf16.msra.mxu0 %v5891_v11 }
 0xd02   :  { %5896 = vmatprep.subr.bf16.mxu0 %v5895_v14 }
 0xd05   :  { %v1993_v25 = vld [vmem:[#allocation2 + $0x18] sm:$0xff]  ;;  %5898 = vmatpush3.bf16.msra.mxu0 %v5895_v14 }
 0xd06   :  { %v1992_v24 = vld [vmem:[#allocation2 + $0x10] sm:$0xff] }
 0xd07   :  { %5500 = vmatprep.mubr.msk.f32.mxu0 %vm135_vm0, %v1992_v24  ;;  %v5008_v24 = vld [vmem:[%s7632_s8] ss:$0 sm:$0xff] }
 0xd08   :  { %5501 = vmatmul.mubr.msk.f32.gmra.mrb[18].mxu0 %vm135_vm0, %v1993_v25 }
 0xdcf   :  { %v5499_v28 = vpop.f32.mrb[16].mxu0 }
 0xdd0   :  { %v2089_v17 = vadd.f32 %v5499_v28, %v5003_v27  ;;  %v2083_v29 = vpop.f32.mrb[17].mxu0 }
 0xdd1   :  { %v2084_v30 = vadd.f32 %v5003_v27, %v2083_v29 }
 0xdd2   :  { %v7062_v31 = vadd.f32 %v2089_v17, %v6780_v8 }
 0xdd3   :  { %v7065_v34 = vadd.f32 %v2084_v30, %v6767_v3 }
 0xdd4   :  { %v2111_v35 = vsel %vm135_vm0, %v7062_v31, 0.0 }
 0xdd5   :  { %2112 = vadd.xlane.f32.xlu1 %v2111_v35  ;;  %v2108_v36 = vsel %vm135_vm0, %v7065_v34, 0.0  ;;  %v5009_v35 = vld [vmem:[%s7633_s9] ss:$0 sm:$0xff] }
 0xdd6   :  { %2109 = vadd.xlane.f32.xlu0 %v2108_v36 }
 0xddb   :  { %v5502_v37 = vpop.f32.mrb[18].mxu0 }
 0xddc   :  { %v2093_v38 = vpop.f32.mrb[19].mxu0  ;;  %v2099_v39 = vadd.f32 %v5502_v37, %v5003_v27 }
 0xddd   :  { %v2094_v40 = vadd.f32 %v5003_v27, %v2093_v38 }
 0xdde   :  { %v7075_v8 = vadd.f32 %v2099_v39, %v6782_v9 }
 0xddf   :  { %v7072_v32 = vadd.f32 %v2094_v40, %v6769_v4 }
 0xde0   :  { %v2117_v41 = vsel %vm135_vm0, %v7075_v8, 0.0 }
 0xde1   :  { %v2114_v3 = vsel %vm135_vm0, %v7072_v32, 0.0 }
 0xde2   :  { %2115 = vadd.xlane.f32.xlu0 %v2114_v3 }
 0xde6   :  { %2118 = vadd.xlane.f32.xlu0 %v2117_v41 }
 0xe62   :  { %v2113_v22 = vpop.xlane.xlu1 %2112 }
 0xe63   :  { %v2121_v33 = vmul.f32 0.03125, %v2113_v22  ;;  %v2110_v16 = vpop.xlane.xlu0 %2109 }
 0xe64   :  { %v2120_v21 = vmul.f32 0.03125, %v2110_v16 }
 0xe65   :  { %v2125_v42 = vsub.f32 %v7062_v31, %v2121_v33 }
 0xe66   :  { %v2124_v4 = vsub.f32 %v7065_v34, %v2120_v21 }
 0xe67   :  { %v2129_v53 = vmul.f32 %v2125_v42, %v2125_v42 }
 0xe68   :  { %v2128_v43 = vmul.f32 %v2124_v4, %v2124_v4 }
 0xe69   :  { %v2135_v9 = vsel %vm135_vm0, %v2129_v53, 0.0  ;;  %v2314_v53 = vld [vmem:[%s7636_s12 + $0x30] sm:$0xff] }
 0xe6a   :  { %2136 = vadd.xlane.f32.xlu1 %v2135_v9  ;;  %v2132_v44 = vsel %vm135_vm0, %v2128_v43, 0.0  ;;  %v2315_v43 = vld [vmem:[%s7636_s12 + $0x38] sm:$0xff] }
 0xe6b   :  { %2133 = vadd.xlane.f32.xlu0 %v2132_v44  ;;  %v5899_v9 = vpack.c.bf16 %v2315_v43, %v2314_v53  ;;  %v2316_v44 = vld [vmem:[%s7636_s12 + $0x40] sm:$0xff] }
 0xe6d   :  { %5900 = vmatprep.subr.bf16.mxu0 %v5899_v9 }
 0xe6e   :  { %5902 = vmatpush3.bf16.msra.mxu0 %v5899_v9 }
 0xe6f   :  { %v2116_v45 = vpop.xlane.xlu0 %2115 }
 0xe70   :  { %v2122_v52 = vmul.f32 0.03125, %v2116_v45  ;;  %v2317_v45 = vld [vmem:[%s7636_s12 + $0x48] sm:$0xff] }
 0xe72   :  { %v7086_v46 = vsub.f32 %v7072_v32, %v2122_v52  ;;  %v5903_v52 = vpack.c.bf16 %v2317_v45, %v2316_v44 }
 0xe73   :  { %v2119_v47 = vpop.xlane.xlu0 %2118 }
 0xe74   :  { %v2123_v48 = vmul.f32 0.03125, %v2119_v47  ;;  %v2130_v49 = vmul.f32 %v7086_v46, %v7086_v46  ;;  %5904 = vmatprep.subr.bf16.mxu0 %v5903_v52  ;;  %v2319_v47 = vld [vmem:[%s7636_s12 + $0x58] sm:$0xff] }
 0xe75   :  { %5906 = vmatpush3.bf16.msra.mxu0 %v5903_v52 }
 0xe76   :  { %v7091_v50 = vsub.f32 %v7075_v8, %v2123_v48  ;;  %v2138_v51 = vsel %vm135_vm0, %v2130_v49, 0.0  ;;  %v2320_v49 = vld [vmem:[%s7636_s12 + $0x60] sm:$0xff] }
 0xe77   :  { %2139 = vadd.xlane.f32.xlu0 %v2138_v51 }
 0xe78   :  { %v2131_v54 = vmul.f32 %v7091_v50, %v7091_v50 }
 0xe7a   :  { %v2141_v55 = vsel %vm135_vm0, %v2131_v54, 0.0  ;;  %v2322_v54 = vld [vmem:[%s7636_s12 + $0x70] sm:$0xff] }
 0xe7b   :  { %2142 = vadd.xlane.f32.xlu1 %v2141_v55  ;;  %v2323_v55 = vld [vmem:[%s7636_s12 + $0x78] sm:$0xff] }
 0xe7c   :  { %v5915_v56 = vpack.c.bf16 %v2323_v55, %v2322_v54 }
 0xef7   :  { %v2137_v15 = vpop.xlane.xlu1 %2136 }
 0xef8   :  { %v2145_v58 = vmul.f32 0.03125, %v2137_v15  ;;  %v2134_v59 = vpop.xlane.xlu0 %2133 }
 0xef9   :  { %v2144_v7 = vmul.f32 0.03125, %v2134_v59 }
 0xefa   :  { %v2149_v10 = vadd.f32 1e-05, %v2145_v58 }
 0xefb   :  { %v2148_v18 = vadd.f32 1e-05, %v2144_v7 }
 0xefc   :  { %6331 = vrsqrt.f32 %v2149_v10 }
 0xefd   :  { %6333 = vrsqrt.f32 %v2148_v18 }
 0xf04   :  { %v2140_v19 = vpop.xlane.xlu0 %2139 }
 0xf05   :  { %v2146_v20 = vmul.f32 0.03125, %v2140_v19 }
 0xf06   :  { %v6332_v23 = vpop.eup %6331 }
 0xf07   :  { %v6334_v25 = vpop.eup %6333  ;;  %v2157_v27 = vmul.f32 %v6332_v23, %v2125_v42  ;;  %v2150_v28 = vadd.f32 1e-05, %v2146_v20 }
 0xf08   :  { %v2143_v17 = vpop.xlane.xlu1 %2142  ;;  %v2156_v29 = vmul.f32 %v6334_v25, %v2124_v4 }
 0xf09   :  { %6335 = vrsqrt.f32 %v2150_v28  ;;  %v2147_v30 = vmul.f32 0.03125, %v2143_v17  ;;  %v2167_v36 = vmul.f32 %v5008_v24, %v2157_v27 }
 0xf0a   :  { %v2166_v37 = vmul.f32 %v5008_v24, %v2156_v29 }
 0xf0b   :  { %v2151_v38 = vadd.f32 1e-05, %v2147_v30  ;;  %v2177_v40 = vadd.f32 %v5009_v35, %v2167_v36  ;;  %v5015_v30 = vld [vmem:[#allocation7] ss:$0 sm:$0xff] }
 0xf0c   :  { %v2176_v39 = vadd.f32 %v5009_v35, %v2166_v37 }
 0xf0d   :  { %6337 = vrsqrt.f32 %v2151_v38 }
 0xf0e   :  { %5511 = vmatprep.mubr.msk.f32.mxu1 %vm135_vm0, %v2176_v39 }
 0xf0f   :  { %5512 = vmatmul.mubr.msk.f32.vlgmr.msra.gmra.mrb[20].mxu1 %vm135_vm0, %v2177_v40 }
 0xf13   :  { %v6336_v3 = vpop.eup %6335 }
 0xf14   :  { %v2158_v41 = vmul.f32 %v6336_v3, %v7086_v46  ;;  %v2318_v46 = vld [vmem:[%s7636_s12 + $0x50] sm:$0xff] }
 0xf15   :  { %v5907_v48 = vpack.c.bf16 %v2319_v47, %v2318_v46 }
 0xf16   :  { %v2168_v22 = vmul.f32 %v5008_v24, %v2158_v41 }
 0xf17   :  { %v6338_v33 = vpop.eup %6337  ;;  %5908 = vmatprep.subr.bf16.mxu0 %v5907_v48 }
 0xf18   :  { %v2178_v16 = vadd.f32 %v5009_v35, %v2168_v22  ;;  %v2159_v21 = vmul.f32 %v6338_v33, %v7091_v50  ;;  %5910 = vmatpush3.bf16.msra.mxu0 %v5907_v48  ;;  %v2321_v50 = vld [vmem:[%s7636_s12 + $0x68] sm:$0xff] }
 0xf19   :  { %v5911_v51 = vpack.c.bf16 %v2321_v50, %v2320_v49 }
 0xf1a   :  { %5514 = vmatprep.mubr.msk.f32.mxu1 %vm135_vm0, %v2178_v16  ;;  %v2169_v42 = vmul.f32 %v5008_v24, %v2159_v21 }
 0xf1b   :  { %5912 = vmatprep.subr.bf16.mxu0 %v5911_v51 }
 0xf1c   :  { %v2179_v4 = vadd.f32 %v5009_v35, %v2169_v42  ;;  %5914 = vmatpush3.bf16.msra.mxu0 %v5911_v51 }
 0xf1d   :  { %5916 = vmatprep.subr.bf16.mxu0 %v5915_v56 }
 0xf1e   :  { %5515 = vmatmul.mubr.msk.f32.gmra.mrb[22].mxu1 %vm135_vm0, %v2179_v4 }
 0xf20   :  { %5918 = vmatpush3.bf16.msra.mxu0 %v5915_v56 }
 0xfe2   :  { %v5513_v60 = vpop.f32.mrb[20].mxu1 }
 0xfe3   :  { %v2275_v61 = vadd.f32 %v5513_v60, %v5010_v57  ;;  %v2269_v62 = vpop.f32.mrb[21].mxu1 }
 0xfe4   :  { %v2270_v63 = vadd.f32 %v5010_v57, %v2269_v62  ;;  %v5020_v62 = vld [vmem:[%s7628_s4 + $0x20] sm:$0xff] }
 0xfe5   :  { %v2293_v0 = vmul.f32 0.70710677, %v2275_v61  ;;  %v2289_v59 = vmul.f32 0.5, %v2275_v61 }
 0xfe6   :  { %v2292_v1 = vmul.f32 0.70710677, %v2270_v63  ;;  %v2288_v14 = vmul.f32 0.5, %v2270_v63  ;;  %v5021_v63 = vld [vmem:[%s7628_s4 + $0x28] sm:$0xff] }
 0xfe7   :  { %6339 = verf.f32 %v2293_v0  ;;  %v5919_v0 = vpack.c.bf16 %v5021_v63, %v5020_v62 }
 0xfe8   :  { %6341 = verf.f32 %v2292_v1  ;;  %v5022_v1 = vld [vmem:[%s7628_s4 + $0x30] sm:$0xff] }
 0xfe9   :  { %5920 = vmatprep.subr.bf16.mxu1 %v5919_v0 }
 0xfea   :  { %5922 = vmatpush3.bf16.msra.mxu1 %v5919_v0 }
 0xff1   :  { %v6340_v2 = vpop.eup %6339  ;;  %v5516_v5 = vpop.f32.mrb[22].mxu1 }
 0xff2   :  { %v6342_v6 = vpop.eup %6341  ;;  %v2301_v11 = vadd.f32 1.0, %v6340_v2  ;;  %v2285_v12 = vadd.f32 %v5516_v5, %v5010_v57  ;;  %v2279_v13 = vpop.f32.mrb[23].mxu1  ;;  %v5023_v2 = vld [vmem:[%s7628_s4 + $0x38] sm:$0xff] }
 0xff3   :  { %v2300_v15 = vadd.f32 1.0, %v6342_v6  ;;  %v2280_v58 = vadd.f32 %v5010_v57, %v2279_v13  ;;  %v5923_v5 = vpack.c.bf16 %v5023_v2, %v5022_v1 }
 0xff4   :  { %v2295_v7 = vmul.f32 0.70710677, %v2285_v12  ;;  %v2305_v19 = vmul.f32 %v2301_v11, %v2289_v59  ;;  %v2291_v28 = vmul.f32 0.5, %v2285_v12 }
 0xff5   :  { %v2294_v10 = vmul.f32 0.70710677, %v2280_v58  ;;  %v2304_v18 = vmul.f32 %v2300_v15, %v2288_v14  ;;  %v2290_v25 = vmul.f32 0.5, %v2280_v58  ;;  %5924 = vmatprep.subr.bf16.mxu1 %v5923_v5 }
 0xff6   :  { %6343 = verf.f32 %v2295_v7  ;;  %5926 = vmatpush3.bf16.msra.mxu1 %v5923_v5  ;;  %v5018_v7 = vld [vmem:[%s7661_s2 + $0x1] ss:$0 sm:$0xff] }
 0xff7   :  { %6345 = verf.f32 %v2294_v10  ;;  %5549 = vmatprep.mubr.f32.mxu0 %v2304_v18 }
 0xff8   :  { %5550 = vmatmul.mubr.f32.vlgmr.msra.gmra.mrb[20].mxu0 %v2305_v19 }
0x1000   :  { %v6344_v20 = vpop.eup %6343 }
0x1001   :  { %v6346_v23 = vpop.eup %6345  ;;  %v2303_v24 = vadd.f32 1.0, %v6344_v20 }
0x1002   :  { %v2302_v27 = vadd.f32 1.0, %v6346_v23 }
0x1003   :  { %v2307_v29 = vmul.f32 %v2303_v24, %v2291_v28 }
0x1004   :  { %v2306_v17 = vmul.f32 %v2302_v27, %v2290_v25  ;;  %v5019_v27 = vld [vmem:[%s7627_s3 + $0x1] ss:$0 sm:$0xff] }
0x1006   :  { %5552 = vmatprep.mubr.f32.mxu0 %v2306_v17 }
0x1007   :  { %5553 = vmatmul.mubr.f32.gmra.mrb[22].mxu0 %v2307_v29 }
0x10cb   :  { %v5551_v35 = vpop.f32.mrb[20].mxu0 }
0x10cc   :  { %v2403_v36 = vadd.f32 %v5551_v35, %v5015_v30  ;;  %v2397_v37 = vpop.f32.mrb[21].mxu0 }
0x10cd   :  { %v2398_v38 = vadd.f32 %v5015_v30, %v2397_v37 }
0x10ce   :  { %v7170_v39 = vadd.f32 %v2403_v36, %v7062_v31 }
0x10cf   :  { %v7173_v40 = vadd.f32 %v2398_v38, %v7065_v34 }
0x10d0   :  { %v2427_v3 = vsel %vm135_vm0, %v7170_v39, 0.0 }
0x10d1   :  { %2428 = vadd.xlane.f32.xlu1 %v2427_v3  ;;  %v2424_v41 = vsel %vm135_vm0, %v7173_v40, 0.0 }
0x10d2   :  { %2425 = vadd.xlane.f32.xlu0 %v2424_v41 }
0x10da   :  { %v5554_v22 = vpop.f32.mrb[22].mxu0 }
0x10db   :  { %v2413_v33 = vadd.f32 %v5554_v22, %v5015_v30  ;;  %v2407_v16 = vpop.f32.mrb[23].mxu0 }
0x10dc   :  { %v2408_v21 = vadd.f32 %v5015_v30, %v2407_v16 }
0x10dd   :  { %v7180_v42 = vadd.f32 %v2413_v33, %v7075_v8 }
0x10de   :  { %v7183_v31 = vadd.f32 %v2408_v21, %v7072_v32  ;;  %v5025_v21 = vld [vmem:[%s7629_s5 + $0x1] ss:$0 sm:$0xff]  ;;  %s7664_s5 = smov 104  }
0x10df   :  { %v2433_v34 = vsel %vm135_vm0, %v7180_v42, 0.0 }
0x10e0   :  { %2434 = vadd.xlane.f32.xlu1 %v2433_v34  ;;  %v2430_v4 = vsel %vm135_vm0, %v7183_v31, 0.0 }
0x10e1   :  { %2431 = vadd.xlane.f32.xlu0 %v2430_v4 }
0x115e   :  { %v2429_v53 = vpop.xlane.xlu1 %2428 }
0x115f   :  { %v2437_v43 = vmul.f32 0.03125, %v2429_v53  ;;  %v2426_v9 = vpop.xlane.xlu0 %2425 }
0x1160   :  { %v2436_v44 = vmul.f32 0.03125, %v2426_v9 }
0x1161   :  { %v2441_v45 = vsub.f32 %v7170_v39, %v2437_v43 }
0x1162   :  { %v2440_v8 = vsub.f32 %v7173_v40, %v2436_v44 }
0x1163   :  { %v2445_v52 = vmul.f32 %v2441_v45, %v2441_v45 }
0x1164   :  { %v2444_v46 = vmul.f32 %v2440_v8, %v2440_v8 }
0x1165   :  { %v2451_v32 = vsel %vm135_vm0, %v2445_v52, 0.0 }
0x1166   :  { %2452 = vadd.xlane.f32.xlu1 %v2451_v32  ;;  %v2448_v47 = vsel %vm135_vm0, %v2444_v46, 0.0 }
0x1167   :  { %2449 = vadd.xlane.f32.xlu0 %v2448_v47 }
0x116d   :  { %v2435_v48 = vpop.xlane.xlu1 %2434 }
0x116e   :  { %v2439_v49 = vmul.f32 0.03125, %v2435_v48  ;;  %v2432_v50 = vpop.xlane.xlu0 %2431 }
0x116f   :  { %v2438_v51 = vmul.f32 0.03125, %v2432_v50 }
0x1170   :  { %v2443_v54 = vsub.f32 %v7180_v42, %v2439_v49 }
0x1171   :  { %v2442_v55 = vsub.f32 %v7183_v31, %v2438_v51 }
0x1172   :  { %v2447_v56 = vmul.f32 %v2443_v54, %v2443_v54 }
0x1173   :  { %v2446_v57 = vmul.f32 %v2442_v55, %v2442_v55 }
0x1174   :  { %v2457_v60 = vsel %vm135_vm0, %v2447_v56, 0.0 }
0x1175   :  { %2458 = vadd.xlane.f32.xlu1 %v2457_v60  ;;  %v2454_v61 = vsel %vm135_vm0, %v2446_v57, 0.0 }
0x1176   :  { %2455 = vadd.xlane.f32.xlu0 %v2454_v61 }
0x11f3   :  { %v2453_v6 = vpop.xlane.xlu1 %2452 }
0x11f4   :  { %v2461_v11 = vmul.f32 0.03125, %v2453_v6  ;;  %v2450_v12 = vpop.xlane.xlu0 %2449 }
0x11f5   :  { %v2460_v13 = vmul.f32 0.03125, %v2450_v12 }
0x11f6   :  { %v2465_v14 = vadd.f32 1e-05, %v2461_v11 }
0x11f7   :  { %v2464_v15 = vadd.f32 1e-05, %v2460_v13 }
0x11f8   :  { %6347 = vrsqrt.f32 %v2465_v14 }
0x11f9   :  { %6349 = vrsqrt.f32 %v2464_v15 }
0x1202   :  { %v6348_v58 = vpop.eup %6347  ;;  %v2459_v59 = vpop.xlane.xlu1 %2458 }
0x1203   :  { %v6350_v10 = vpop.eup %6349  ;;  %v2473_v18 = vmul.f32 %v6348_v58, %v2441_v45  ;;  %v2463_v19 = vmul.f32 0.03125, %v2459_v59  ;;  %v2456_v20 = vpop.xlane.xlu0 %2455 }
0x1204   :  { %v2462_v23 = vmul.f32 0.03125, %v2456_v20  ;;  %v2472_v24 = vmul.f32 %v6350_v10, %v2440_v8 }
0x1205   :  { %v2467_v25 = vadd.f32 1e-05, %v2463_v19  ;;  %v2483_v28 = vmul.f32 %v5018_v7, %v2473_v18 }
0x1206   :  { %v2466_v17 = vadd.f32 1e-05, %v2462_v23  ;;  %v2482_v29 = vmul.f32 %v5018_v7, %v2472_v24 }
0x1207   :  { %6351 = vrsqrt.f32 %v2467_v25  ;;  %v2493_v35 = vadd.f32 %v5019_v27, %v2483_v28 }
0x1208   :  { %6353 = vrsqrt.f32 %v2466_v17  ;;  %v2492_v30 = vadd.f32 %v5019_v27, %v2482_v29 }
0x120a   :  { %5563 = vmatprep.mubr.msk.f32.mxu1 %vm135_vm0, %v2492_v30 }
0x120b   :  { %5564 = vmatmul.mubr.msk.f32.vlgmr.msra.gmra.mrb[24].mxu1 %vm135_vm0, %v2493_v35 }
0x1211   :  { %v6352_v36 = vpop.eup %6351 }
0x1212   :  { %v6354_v37 = vpop.eup %6353  ;;  %v2475_v38 = vmul.f32 %v6352_v36, %v2443_v54 }
0x1213   :  { %v2474_v3 = vmul.f32 %v6354_v37, %v2442_v55 }
0x1214   :  { %v2485_v41 = vmul.f32 %v5018_v7, %v2475_v38 }
0x1215   :  { %v2484_v22 = vmul.f32 %v5018_v7, %v2474_v3 }
0x1216   :  { %v2495_v16 = vadd.f32 %v5019_v27, %v2485_v41 }
0x1217   :  { %v2494_v33 = vadd.f32 %v5019_v27, %v2484_v22 }
0x1219   :  { %5566 = vmatprep.mubr.msk.f32.mxu1 %vm135_vm0, %v2494_v33 }
0x121a   :  { %5567 = vmatmul.mubr.msk.f32.gmra.mrb[26].mxu1 %vm135_vm0, %v2495_v16 }
0x12de   :  { %v5565_v34 = vpop.f32.mrb[24].mxu1 }
0x12df   :  { %v2593_v4 = vadd.f32 %v5565_v34, %v5025_v21  ;;  %v2587_v53 = vpop.f32.mrb[25].mxu1 }
0x12e0   :  { %v2588_v43 = vadd.f32 %v5025_v21, %v2587_v53 }
0x12e1   :  { %v7238_v51 = vmul.f32 0.35355338, %v2593_v4 }
0x12e2   :  { %v7222_v9 = vpack.i.bf16 %v2593_v4, %v2588_v43  ;;  %v7224_v44 = vmul.f32 0.35355338, %v2588_v43 }
0x12e4   :  { %6180 = vrot.lane.b32.xlu0 %v7222_v9, %s6566_s28  ;;  %5573 = vmatprep.mubr.msk.f32.mxu1 %vm327_vm1, %v7224_v44 }
0x12ed   :  { %v5568_v45 = vpop.f32.mrb[26].mxu1 }
0x12ee   :  { %v2603_v8 = vadd.f32 %v5568_v45, %v5025_v21  ;;  %v2597_v52 = vpop.f32.mrb[27].mxu1 }
0x12ef   :  { %v2598_v46 = vadd.f32 %v5025_v21, %v2597_v52 }
0x12f0   :  { %v7250_v61 = vmul.f32 0.35355338, %v2603_v8 }
0x12f1   :  { %v7230_v32 = vpack.i.bf16 %v2603_v8, %v2598_v46  ;;  %v7240_v54 = vmul.f32 0.35355338, %v2598_v46 }
0x12f3   :  { %6185 = vrot.lane.b32.xlu1 %v7230_v32, %s6566_s28  ;;  %s7665_s28 = smov 40  }
0x1356   :  { %v6181_v47 = vpop.permute.xlu0 %6180 }
0x1357   :  { %v6183_v48 = vunpack.i.h.bf16 %v6181_v47  ;;  %v6182_v49 = vunpack.i.l.bf16 %v6181_v47 }
0x1359   :  { %v5927_v50 = vpack.c.bf16 %v6183_v48, %v6182_v49 }
0x135b   :  { %5929 = vmatprep.subr.msk.bf16.mxu1 %vm6843_vm2, %v5927_v50 }
0x135c   :  { %5932 = vmatpush3.bf16.xpose.msk.msra.mxu1 %vm6843_vm2, %v5927_v50 }
0x1363   :  { %5574 = vmatmul.mubr.msk.f32.vlgmr.msra.gmra.mrb[28].mxu1 %vm327_vm1, %v7238_v51 }
0x1364   :  { %5580 = vmatprep.mubr.msk.f32.mxu1 %vm327_vm1, %v7240_v54 }
0x1365   :  { %v6186_v55 = vpop.permute.xlu1 %6185 }
0x1366   :  { %v6188_v56 = vunpack.i.h.bf16 %v6186_v55  ;;  %v6187_v57 = vunpack.i.l.bf16 %v6186_v55 }
0x1368   :  { %v5933_v60 = vpack.c.bf16 %v6188_v56, %v6187_v57 }
0x136a   :  { %5935 = vmatprep.subr.msk.bf16.mxu1 %vm6843_vm2, %v5933_v60 }
0x136b   :  { %5938 = vmatpush3.bf16.xpose.msk.msra.mxu1 %vm6843_vm2, %v5933_v60 }
0x1372   :  { %5581 = vmatmul.mubr.msk.f32.vlgmr.msra.gmra.mrb[30].mxu1 %vm327_vm1, %v7250_v61 }
0x1436   :  { %v5575_v62 = vpop.f32.mrb[28].mxu1 }
0x1437   :  { %v2692_v63 = vpop.f32.mrb[29].mxu1  ;;  %v2795_v0 = vsel %vm504_vm3, %v5575_v62, -inf }
0x1438   :  { %2796 = vmax.xlane.f32.xlu0 %v2795_v0  ;;  %v2792_v1 = vsel %vm504_vm3, %v2692_v63, -inf }
0x1439   :  { %2793 = vmax.xlane.f32.xlu1 %v2792_v1 }
0x1445   :  { %v5582_v2 = vpop.f32.mrb[30].mxu1 }
0x1446   :  { %v2783_v5 = vpop.f32.mrb[31].mxu1  ;;  %v2801_v6 = vsel %vm504_vm3, %v5582_v2, -inf }
0x1447   :  { %2802 = vmax.xlane.f32.xlu1 %v2801_v6  ;;  %v2798_v11 = vsel %vm504_vm3, %v2783_v5, -inf }
0x1448   :  { %2799 = vmax.xlane.f32.xlu0 %v2798_v11 }
0x14c5   :  { %v2797_v12 = vpop.xlane.xlu0 %2796 }
0x14c6   :  { %v2805_v13 = vsub.f32 %v5575_v62, %v2797_v12  ;;  %v2794_v14 = vpop.xlane.xlu1 %2793 }
0x14c7   :  { %v2804_v15 = vsub.f32 %v2692_v63, %v2794_v14 }
0x14c8   :  { %v2810_v58 = vmul.f32 1.442695, %v2805_v13 }
0x14c9   :  { %v2808_v59 = vmul.f32 1.442695, %v2804_v15 }
0x14ca   :  { %6355 = vpow2.f32 %v2810_v58 }
0x14cb   :  { %6357 = vpow2.f32 %v2808_v59 }
0x14d4   :  { %v6356_v7 = vpop.eup %6355  ;;  %v2803_v24 = vpop.xlane.xlu1 %2802 }
0x14d5   :  { %v6358_v10 = vpop.eup %6357  ;;  %v2819_v18 = vsel %vm504_vm3, %v6356_v7, 0.0  ;;  %v2800_v20 = vpop.xlane.xlu0 %2799  ;;  %v2807_v27 = vsub.f32 %v5582_v2, %v2803_v24 }
0x14d6   :  { %2820 = vadd.xlane.f32.xlu1 %v2819_v18  ;;  %v2816_v19 = vsel %vm504_vm3, %v6358_v10, 0.0  ;;  %v2806_v23 = vsub.f32 %v2783_v5, %v2800_v20 }
0x14d7   :  { %2817 = vadd.xlane.f32.xlu0 %v2816_v19  ;;  %v2814_v28 = vmul.f32 1.442695, %v2807_v27 }
0x14d8   :  { %v2812_v25 = vmul.f32 1.442695, %v2806_v23 }
0x14da   :  { %6359 = vpow2.f32 %v2812_v25 }
0x14db   :  { %6361 = vpow2.f32 %v2814_v28 }
0x14e4   :  { %v6360_v17 = vpop.eup %6359 }
0x14e5   :  { %v2822_v29 = vsel %vm504_vm3, %v6360_v17, 0.0  ;;  %v6362_v30 = vpop.eup %6361 }
0x14e6   :  { %v2825_v35 = vsel %vm504_vm3, %v6362_v30, 0.0 }
0x14e7   :  { %6195 = vrot.lane.b32.xlu1 %v7230_v32, %s6567_s23 }
0x14eb   :  { %6200 = vrot.lane.b32.xlu1 %v7222_v9, %s6568_s26 }
0x14ed   :  { %6190 = vrot.lane.b32.xlu0 %v7222_v9, %s6567_s23  ;;  %s7666_s23 = smov 8  }
0x14ef   :  { %6205 = vrot.lane.b32.xlu1 %v7230_v32, %s6568_s26  ;;  %s7667_s26 = smov 16  }
0x150c   :  { %2823 = vadd.xlane.f32.xlu0 %v2822_v29 }
0x1513   :  { %2826 = vadd.xlane.f32.xlu1 %v2825_v35 }
0x1522   :  { %3014 = vrot.lane.b32.xlu0 %v7224_v44, %s6569_s29 }
0x1524   :  { %3016 = vrot.lane.b32.xlu1 %v7238_v51, %s6569_s29 }
0x1526   :  { %3105 = vrot.lane.b32.xlu0 %v7240_v54, %s6569_s29 }
0x1528   :  { %3107 = vrot.lane.b32.xlu1 %v7250_v61, %s6569_s29 }
0x1563   :  { %v2821_v36 = vpop.xlane.xlu1 %2820 }
0x1564   :  { %6363 = vrcp.f32 %v2821_v36  ;;  %v2818_v37 = vpop.xlane.xlu0 %2817 }
0x1565   :  { %6365 = vrcp.f32 %v2818_v37 }
0x1567   :  { %v6196_v38 = vpop.permute.xlu1 %6195 }
0x1568   :  { %v6191_v3 = vpop.permute.xlu0 %6190  ;;  %v6198_v41 = vunpack.i.h.bf16 %v6196_v38  ;;  %v6197_v22 = vunpack.i.l.bf16 %v6196_v38 }
0x1569   :  { %v6193_v33 = vunpack.i.h.bf16 %v6191_v3  ;;  %v6192_v16 = vunpack.i.l.bf16 %v6191_v3 }
0x156a   :  { %v5943_v43 = vpack.c.bf16 %v6198_v41, %v6197_v22 }
0x156b   :  { %v5939_v21 = vpack.c.bf16 %v6193_v33, %v6192_v16  ;;  %v6201_v34 = vpop.permute.xlu1 %6200 }
0x156c   :  { %v6203_v4 = vunpack.i.h.bf16 %v6201_v34  ;;  %v6202_v53 = vunpack.i.l.bf16 %v6201_v34 }
0x156d   :  { %5940 = vmatprep.subr.bf16.mxu1 %v5939_v21 }
0x156e   :  { %v6364_v45 = vpop.eup %6363  ;;  %v5947_v8 = vpack.c.bf16 %v6203_v4, %v6202_v53  ;;  %5942 = vmatpush3.bf16.msra.mxu1 %v5939_v21 }
0x156f   :  { %v6366_v52 = vpop.eup %6365  ;;  %v6206_v46 = vpop.permute.xlu1 %6205  ;;  %5944 = vmatprep.subr.bf16.mxu1 %v5943_v43  ;;  %v2833_v50 = vmul.f32 %v6364_v45, %v6356_v7 }
0x1570   :  { %v6208_v47 = vunpack.i.h.bf16 %v6206_v46  ;;  %v6207_v48 = vunpack.i.l.bf16 %v6206_v46  ;;  %5949 = vmatprep.subr.msk.bf16.mxu0 %vm6843_vm2, %v5947_v8  ;;  %v2832_v49 = vmul.f32 %v6366_v52, %v6358_v10 }
0x1571   :  { %5952 = vmatpush3.bf16.xpose.msk.msra.mxu0 %vm6843_vm2, %v5947_v8 }
0x1572   :  { %v5953_v55 = vpack.c.bf16 %v6208_v47, %v6207_v48  ;;  %5587 = vmatprep.mubr.msk.f32.mxu1 %vm504_vm3, %v2832_v49 }
0x1573   :  { %5588 = vmatmul.mubr.msk.f32.vlgmr.msra.gmra.mrb[32].mxu1 %vm504_vm3, %v2833_v50 }
0x1574   :  { %5946 = vmatpush3.bf16.msra.mxu1 %v5943_v43 }
0x1575   :  { %5955 = vmatprep.subr.msk.bf16.mxu1 %vm6843_vm2, %v5953_v55 }
0x1599   :  { %v2824_v56 = vpop.xlane.xlu0 %2823 }
0x159a   :  { %6367 = vrcp.f32 %v2824_v56 }
0x159d   :  { %v3015_v57 = vpop.permute.xlu0 %3014 }
0x159e   :  { %5601 = vmatprep.mubr.msk.f32.mxu0 %vm327_vm1, %v3015_v57 }
0x15a0   :  { %v2827_v60 = vpop.xlane.xlu1 %2826 }
0x15a1   :  { %6369 = vrcp.f32 %v2827_v60  ;;  %v3106_v5 = vpop.permute.xlu0 %3105 }
0x15a4   :  { %v6368_v62 = vpop.eup %6367  ;;  %v3017_v63 = vpop.permute.xlu1 %3016 }
0x15a5   :  { %5602 = vmatmul.mubr.msk.f32.vlgmr.msra.gmra.mrb[24].mxu0 %vm327_vm1, %v3017_v63  ;;  %v2834_v0 = vmul.f32 %v6368_v62, %v6360_v17 }
0x15a7   :  { %5594 = vmatprep.mubr.msk.f32.mxu1 %vm504_vm3, %v2834_v0 }
0x15a8   :  { %v3108_v6 = vpop.permute.xlu1 %3107 }
0x15ab   :  { %v6370_v1 = vpop.eup %6369 }
0x15ac   :  { %v2835_v2 = vmul.f32 %v6370_v1, %v6362_v30 }
0x15ae   :  { %5595 = vmatmul.mubr.msk.f32.vlgmr.msra.gmra.mrb[34].mxu1 %vm504_vm3, %v2835_v2 }
0x15af   :  { %5958 = vmatpush3.bf16.xpose.msk.msra.mxu1 %vm6843_vm2, %v5953_v55  ;;  %5608 = vmatprep.mubr.msk.f32.mxu1 %vm327_vm1, %v3106_v5 }
0x15b6   :  { %5609 = vmatmul.mubr.msk.f32.vlgmr.msra.gmra.mrb[36].mxu1 %vm327_vm1, %v3108_v6 }
0x1646   :  { %v5589_v11 = vpop.f32.mrb[32].mxu1 }
0x1647   :  { %3011 = vst.msk [vmem:[#allocation2 + $0x8] sm:$0xff] %vm327_vm1, %v5589_v11  ;;  %v2914_v12 = vpop.f32.mrb[33].mxu1 }
0x1648   :  { %3010 = vst.msk [vmem:[#allocation2] sm:$0xff] %vm327_vm1, %v2914_v12 }
0x1678   :  { %v5603_v13 = vpop.f32.mrb[24].mxu0 }
0x1679   :  { %v3096_v14 = vpop.f32.mrb[25].mxu0  ;;  %v3199_v15 = vsel %vm504_vm3, %v5603_v13, -inf }
0x167a   :  { %3200 = vmax.xlane.f32.xlu1 %v3199_v15  ;;  %v3196_v58 = vsel %vm504_vm3, %v3096_v14, -inf }
0x167b   :  { %3197 = vmax.xlane.f32.xlu0 %v3196_v58 }
0x1681   :  { %v5596_v59 = vpop.f32.mrb[34].mxu1 }
0x1682   :  { %3013 = vst.msk [vmem:[#allocation2 + $0x18] sm:$0xff] %vm327_vm1, %v5596_v59  ;;  %v3001_v7 = vpop.f32.mrb[35].mxu1 }
0x1683   :  { %3012 = vst.msk [vmem:[#allocation2 + $0x10] sm:$0xff] %vm327_vm1, %v3001_v7 }
0x1689   :  { %v5610_v10 = vpop.f32.mrb[36].mxu1 }
0x168a   :  { %v3187_v18 = vpop.f32.mrb[37].mxu1  ;;  %v3205_v20 = vsel %vm504_vm3, %v5610_v10, -inf }
0x168b   :  { %v3202_v19 = vsel %vm504_vm3, %v3187_v18, -inf }
0x168c   :  { %3203 = vmax.xlane.f32.xlu0 %v3202_v19 }
0x1690   :  { %3206 = vmax.xlane.f32.xlu0 %v3205_v20 }
0x1707   :  { %v3201_v23 = vpop.xlane.xlu1 %3200 }
0x1708   :  { %v3209_v24 = vsub.f32 %v5603_v13, %v3201_v23  ;;  %v3198_v25 = vpop.xlane.xlu0 %3197 }
0x1709   :  { %v3208_v27 = vsub.f32 %v3096_v14, %v3198_v25 }
0x170a   :  { %v3214_v28 = vmul.f32 1.442695, %v3209_v24 }
0x170b   :  { %v3212_v17 = vmul.f32 1.442695, %v3208_v27 }
0x170c   :  { %6371 = vpow2.f32 %v3214_v28 }
0x170d   :  { %6373 = vpow2.f32 %v3212_v17 }
0x1716   :  { %v6372_v29 = vpop.eup %6371 }
0x1717   :  { %v6374_v30 = vpop.eup %6373  ;;  %v3223_v35 = vsel %vm504_vm3, %v6372_v29, 0.0 }
0x1718   :  { %3224 = vadd.xlane.f32.xlu1 %v3223_v35  ;;  %v3220_v36 = vsel %vm504_vm3, %v6374_v30, 0.0 }
0x1719   :  { %3221 = vadd.xlane.f32.xlu0 %v3220_v36  ;;  %v3204_v37 = vpop.xlane.xlu0 %3203 }
0x171a   :  { %v3210_v38 = vsub.f32 %v3187_v18, %v3204_v37 }
0x171c   :  { %v3216_v3 = vmul.f32 1.442695, %v3210_v38 }
0x171d   :  { %v3207_v41 = vpop.xlane.xlu0 %3206 }
0x171e   :  { %v3211_v22 = vsub.f32 %v5610_v10, %v3207_v41  ;;  %6375 = vpow2.f32 %v3216_v3 }
0x1720   :  { %v3218_v33 = vmul.f32 1.442695, %v3211_v22 }
0x1722   :  { %6377 = vpow2.f32 %v3218_v33 }
0x1728   :  { %v6376_v16 = vpop.eup %6375 }
0x1729   :  { %6215 = vrot.lane.b32.xlu1 %v7230_v32, %s6570_s19  ;;  %v3226_v21 = vsel %vm504_vm3, %v6376_v16, 0.0 }
0x172c   :  { %v6378_v34 = vpop.eup %6377 }
0x172d   :  { %6220 = vrot.lane.b32.xlu1 %v7222_v9, %s6571_s1  ;;  %v3229_v4 = vsel %vm504_vm3, %v6378_v34, 0.0 }
0x172f   :  { %6210 = vrot.lane.b32.xlu0 %v7222_v9, %s6570_s19 }
0x1731   :  { %6225 = vrot.lane.b32.xlu1 %v7230_v32, %s6571_s1 }
0x174e   :  { %3227 = vadd.xlane.f32.xlu0 %v3226_v21 }
0x1755   :  { %3230 = vadd.xlane.f32.xlu1 %v3229_v4 }
0x1764   :  { %3434 = vrot.lane.b32.xlu0 %v7224_v44, %s6572_s13 }
0x1766   :  { %3436 = vrot.lane.b32.xlu1 %v7238_v51, %s6572_s13 }
0x1768   :  { %3525 = vrot.lane.b32.xlu0 %v7240_v54, %s6572_s13 }
0x176a   :  { %3527 = vrot.lane.b32.xlu1 %v7250_v61, %s6572_s13 }
0x17a5   :  { %v3225_v53 = vpop.xlane.xlu1 %3224 }
0x17a6   :  { %6379 = vrcp.f32 %v3225_v53  ;;  %v3222_v43 = vpop.xlane.xlu0 %3221 }
0x17a7   :  { %6381 = vrcp.f32 %v3222_v43 }
0x17a9   :  { %v6216_v45 = vpop.permute.xlu1 %6215 }
0x17aa   :  { %v6218_v8 = vunpack.i.h.bf16 %v6216_v45  ;;  %v6217_v52 = vunpack.i.l.bf16 %v6216_v45  ;;  %v6211_v46 = vpop.permute.xlu0 %6210 }
0x17ab   :  { %v6213_v47 = vunpack.i.h.bf16 %v6211_v46  ;;  %v6212_v48 = vunpack.i.l.bf16 %v6211_v46 }
0x17ac   :  { %v5963_v49 = vpack.c.bf16 %v6218_v8, %v6217_v52 }
0x17ad   :  { %v5959_v50 = vpack.c.bf16 %v6213_v47, %v6212_v48  ;;  %v6221_v55 = vpop.permute.xlu1 %6220 }
0x17ae   :  { %v6223_v56 = vunpack.i.h.bf16 %v6221_v55  ;;  %v6222_v57 = vunpack.i.l.bf16 %v6221_v55  ;;  %5964 = vmatprep.subr.bf16.mxu1 %v5963_v49 }
0x17af   :  { %5960 = vmatprep.subr.bf16.mxu0 %v5959_v50  ;;  %5966 = vmatpush3.bf16.msra.mxu1 %v5963_v49 }
0x17b0   :  { %v6380_v60 = vpop.eup %6379  ;;  %v5967_v62 = vpack.c.bf16 %v6223_v56, %v6222_v57  ;;  %5962 = vmatpush3.bf16.msra.mxu0 %v5959_v50 }
0x17b1   :  { %v6382_v63 = vpop.eup %6381  ;;  %v6226_v0 = vpop.permute.xlu1 %6225  ;;  %v3237_v6 = vmul.f32 %v6380_v60, %v6372_v29 }
0x17b2   :  { %v6228_v1 = vunpack.i.h.bf16 %v6226_v0  ;;  %v6227_v2 = vunpack.i.l.bf16 %v6226_v0  ;;  %5969 = vmatprep.subr.msk.bf16.mxu0 %vm6843_vm2, %v5967_v62  ;;  %v3236_v5 = vmul.f32 %v6382_v63, %v6374_v30 }
0x17b4   :  { %v5973_v11 = vpack.c.bf16 %v6228_v1, %v6227_v2  ;;  %5615 = vmatprep.mubr.msk.f32.mxu0 %vm504_vm3, %v3236_v5 }
0x17b5   :  { %5616 = vmatmul.mubr.msk.f32.vlgmr.msra.gmra.mrb[26].mxu0 %vm504_vm3, %v3237_v6 }
0x17b6   :  { %5975 = vmatprep.subr.msk.bf16.mxu1 %vm6843_vm2, %v5973_v11 }
0x17b9   :  { %5972 = vmatpush3.bf16.xpose.msk.msra.mxu0 %vm6843_vm2, %v5967_v62 }
0x17db   :  { %v3228_v12 = vpop.xlane.xlu0 %3227 }
0x17dc   :  { %6383 = vrcp.f32 %v3228_v12 }
0x17df   :  { %v3435_v13 = vpop.permute.xlu0 %3434 }
0x17e0   :  { %5629 = vmatprep.mubr.msk.f32.mxu0 %vm327_vm1, %v3435_v13 }
0x17e2   :  { %v3231_v14 = vpop.xlane.xlu1 %3230 }
0x17e3   :  { %6385 = vrcp.f32 %v3231_v14  ;;  %v3526_v18 = vpop.permute.xlu0 %3525 }
0x17e6   :  { %v6384_v15 = vpop.eup %6383  ;;  %v3437_v58 = vpop.permute.xlu1 %3436 }
0x17e7   :  { %5630 = vmatmul.mubr.msk.f32.vlgmr.msra.gmra.mrb[28].mxu0 %vm327_vm1, %v3437_v58  ;;  %v3238_v59 = vmul.f32 %v6384_v15, %v6376_v16 }
0x17e9   :  { %5622 = vmatprep.mubr.msk.f32.mxu1 %vm504_vm3, %v3238_v59 }
0x17ea   :  { %v3528_v19 = vpop.permute.xlu1 %3527 }
0x17ed   :  { %v6386_v7 = vpop.eup %6385 }
0x17ee   :  { %v3239_v10 = vmul.f32 %v6386_v7, %v6378_v34 }
0x17f0   :  { %5623 = vmatmul.mubr.msk.f32.vlgmr.msra.gmra.mrb[38].mxu1 %vm504_vm3, %v3239_v10 }
0x17f1   :  { %5978 = vmatpush3.bf16.xpose.msk.msra.mxu1 %vm6843_vm2, %v5973_v11  ;;  %5636 = vmatprep.mubr.msk.f32.mxu1 %vm327_vm1, %v3526_v18 }
0x17f8   :  { %5637 = vmatmul.mubr.msk.f32.vlgmr.msra.gmra.mrb[40].mxu1 %vm327_vm1, %v3528_v19 }
0x1888   :  { %v7338_v20 = vpop.f32.mrb[26].mxu0 }
0x1889   :  { %v7340_v23 = vpop.f32.mrb[27].mxu0 }
0x18ba   :  { %v5631_v24 = vpop.f32.mrb[28].mxu0 }
0x18bb   :  { %v3516_v25 = vpop.f32.mrb[29].mxu0  ;;  %v3619_v27 = vsel %vm504_vm3, %v5631_v24, -inf }
0x18bc   :  { %3620 = vmax.xlane.f32.xlu1 %v3619_v27  ;;  %v3616_v28 = vsel %vm504_vm3, %v3516_v25, -inf }
0x18bd   :  { %3617 = vmax.xlane.f32.xlu0 %v3616_v28 }
0x18c3   :  { %v7344_v17 = vpop.f32.mrb[38].mxu1 }
0x18c4   :  { %v7346_v29 = vpop.f32.mrb[39].mxu1 }
0x18cb   :  { %v5638_v30 = vpop.f32.mrb[40].mxu1 }
0x18cc   :  { %v3607_v35 = vpop.f32.mrb[41].mxu1  ;;  %v3625_v37 = vsel %vm504_vm3, %v5638_v30, -inf }
0x18cd   :  { %v3622_v36 = vsel %vm504_vm3, %v3607_v35, -inf }
0x18ce   :  { %3623 = vmax.xlane.f32.xlu0 %v3622_v36 }
0x18d2   :  { %3626 = vmax.xlane.f32.xlu0 %v3625_v37 }
0x1949   :  { %v3621_v38 = vpop.xlane.xlu1 %3620 }
0x194a   :  { %v3629_v3 = vsub.f32 %v5631_v24, %v3621_v38  ;;  %v3618_v41 = vpop.xlane.xlu0 %3617 }
0x194b   :  { %v3628_v22 = vsub.f32 %v3516_v25, %v3618_v41 }
0x194c   :  { %v3634_v33 = vmul.f32 1.442695, %v3629_v3 }
0x194d   :  { %v3632_v16 = vmul.f32 1.442695, %v3628_v22 }
0x194e   :  { %6387 = vpow2.f32 %v3634_v33 }
0x194f   :  { %6389 = vpow2.f32 %v3632_v16 }
0x1958   :  { %v6388_v21 = vpop.eup %6387 }
0x1959   :  { %v6390_v34 = vpop.eup %6389  ;;  %v3643_v4 = vsel %vm504_vm3, %v6388_v21, 0.0 }
0x195a   :  { %3644 = vadd.xlane.f32.xlu1 %v3643_v4  ;;  %v3640_v53 = vsel %vm504_vm3, %v6390_v34, 0.0 }
0x195b   :  { %3641 = vadd.xlane.f32.xlu0 %v3640_v53  ;;  %v3624_v43 = vpop.xlane.xlu0 %3623 }
0x195c   :  { %v3630_v45 = vsub.f32 %v3607_v35, %v3624_v43 }
0x195e   :  { %v3636_v8 = vmul.f32 1.442695, %v3630_v45 }
0x195f   :  { %v3627_v52 = vpop.xlane.xlu0 %3626 }
0x1960   :  { %v3631_v46 = vsub.f32 %v5638_v30, %v3627_v52  ;;  %6391 = vpow2.f32 %v3636_v8 }
0x1962   :  { %v3638_v47 = vmul.f32 1.442695, %v3631_v46 }
0x1964   :  { %6393 = vpow2.f32 %v3638_v47 }
0x196a   :  { %v6392_v48 = vpop.eup %6391 }
0x196b   :  { %6235 = vrot.lane.b32.xlu1 %v7230_v32, %s6573_s25  ;;  %v3646_v49 = vsel %vm504_vm3, %v6392_v48, 0.0 }
0x196e   :  { %v6394_v50 = vpop.eup %6393 }
0x196f   :  { %6240 = vrot.lane.b32.xlu1 %v7222_v9, %s6574_s0  ;;  %v3649_v55 = vsel %vm504_vm3, %v6394_v50, 0.0 }
0x1971   :  { %6230 = vrot.lane.b32.xlu0 %v7222_v9, %s6573_s25 }
0x1973   :  { %6245 = vrot.lane.b32.xlu1 %v7230_v32, %s6574_s0 }
0x1990   :  { %3647 = vadd.xlane.f32.xlu0 %v3646_v49 }
0x1997   :  { %3650 = vadd.xlane.f32.xlu1 %v3649_v55 }
0x19a6   :  { %3854 = vrot.lane.b32.xlu0 %v7224_v44, %s7664_s5 }
0x19a8   :  { %3856 = vrot.lane.b32.xlu1 %v7238_v51, %s7664_s5 }
0x19aa   :  { %3945 = vrot.lane.b32.xlu0 %v7240_v54, %s7664_s5 }
0x19ac   :  { %3947 = vrot.lane.b32.xlu1 %v7250_v61, %s7664_s5 }
0x19e7   :  { %v3645_v56 = vpop.xlane.xlu1 %3644 }
0x19e8   :  { %6395 = vrcp.f32 %v3645_v56  ;;  %v3642_v57 = vpop.xlane.xlu0 %3641 }
0x19e9   :  { %6397 = vrcp.f32 %v3642_v57 }
0x19eb   :  { %v6236_v60 = vpop.permute.xlu1 %6235 }
0x19ec   :  { %v6238_v62 = vunpack.i.h.bf16 %v6236_v60  ;;  %v6237_v63 = vunpack.i.l.bf16 %v6236_v60  ;;  %v6231_v0 = vpop.permute.xlu0 %6230 }
0x19ed   :  { %v6233_v1 = vunpack.i.h.bf16 %v6231_v0  ;;  %v6232_v2 = vunpack.i.l.bf16 %v6231_v0 }
0x19ee   :  { %v5983_v44 = vpack.c.bf16 %v6238_v62, %v6237_v63 }
0x19ef   :  { %v5979_v5 = vpack.c.bf16 %v6233_v1, %v6232_v2  ;;  %v6241_v6 = vpop.permute.xlu1 %6240 }
0x19f0   :  { %v6243_v51 = vunpack.i.h.bf16 %v6241_v6  ;;  %v6242_v11 = vunpack.i.l.bf16 %v6241_v6  ;;  %5984 = vmatprep.subr.bf16.mxu1 %v5983_v44 }
0x19f1   :  { %5980 = vmatprep.subr.bf16.mxu0 %v5979_v5  ;;  %5986 = vmatpush3.bf16.msra.mxu1 %v5983_v44 }
0x19f2   :  { %v6396_v54 = vpop.eup %6395  ;;  %v5987_v61 = vpack.c.bf16 %v6243_v51, %v6242_v11  ;;  %5982 = vmatpush3.bf16.msra.mxu0 %v5979_v5 }
0x19f3   :  { %v6398_v12 = vpop.eup %6397  ;;  %v6246_v13 = vpop.permute.xlu1 %6245  ;;  %v3657_v59 = vmul.f32 %v6396_v54, %v6388_v21 }
0x19f4   :  { %v6248_v14 = vunpack.i.h.bf16 %v6246_v13  ;;  %v6247_v15 = vunpack.i.l.bf16 %v6246_v13  ;;  %5989 = vmatprep.subr.msk.bf16.mxu0 %vm6843_vm2, %v5987_v61  ;;  %v3656_v58 = vmul.f32 %v6398_v12, %v6390_v34 }
0x19f6   :  { %v5993_v7 = vpack.c.bf16 %v6248_v14, %v6247_v15  ;;  %5643 = vmatprep.mubr.msk.f32.mxu0 %vm504_vm3, %v3656_v58 }
0x19f7   :  { %5644 = vmatmul.mubr.msk.f32.vlgmr.msra.gmra.mrb[30].mxu0 %vm504_vm3, %v3657_v59 }
0x19f8   :  { %5995 = vmatprep.subr.msk.bf16.mxu1 %vm6843_vm2, %v5993_v7 }
0x19fb   :  { %5992 = vmatpush3.bf16.xpose.msk.msra.mxu0 %vm6843_vm2, %v5987_v61 }
0x1a1d   :  { %v3648_v10 = vpop.xlane.xlu0 %3647 }
0x1a1e   :  { %6399 = vrcp.f32 %v3648_v10 }
0x1a21   :  { %v3855_v18 = vpop.permute.xlu0 %3854 }
0x1a22   :  { %5657 = vmatprep.mubr.msk.f32.mxu0 %vm327_vm1, %v3855_v18 }
0x1a24   :  { %v3651_v19 = vpop.xlane.xlu1 %3650 }
0x1a25   :  { %6401 = vrcp.f32 %v3651_v19  ;;  %v3946_v35 = vpop.permute.xlu0 %3945 }
0x1a28   :  { %v6400_v24 = vpop.eup %6399  ;;  %v3857_v25 = vpop.permute.xlu1 %3856 }
0x1a29   :  { %5658 = vmatmul.mubr.msk.f32.vlgmr.msra.gmra.mrb[32].mxu0 %vm327_vm1, %v3857_v25  ;;  %v3658_v27 = vmul.f32 %v6400_v24, %v6392_v48 }
0x1a2b   :  { %5650 = vmatprep.mubr.msk.f32.mxu1 %vm504_vm3, %v3658_v27 }
0x1a2c   :  { %v3948_v36 = vpop.permute.xlu1 %3947 }
0x1a2f   :  { %v6402_v28 = vpop.eup %6401 }
0x1a30   :  { %v3659_v30 = vmul.f32 %v6402_v28, %v6394_v50 }
0x1a32   :  { %5651 = vmatmul.mubr.msk.f32.vlgmr.msra.gmra.mrb[42].mxu1 %vm504_vm3, %v3659_v30 }
0x1a33   :  { %5998 = vmatpush3.bf16.xpose.msk.msra.mxu1 %vm6843_vm2, %v5993_v7  ;;  %5664 = vmatprep.mubr.msk.f32.mxu1 %vm327_vm1, %v3946_v35  ;;  %v5078_v35 = vld [vmem:[%s7630_s6 + $0x20] sm:$0xff] }
0x1a3a   :  { %5665 = vmatmul.mubr.msk.f32.vlgmr.msra.gmra.mrb[44].mxu1 %vm327_vm1, %v3948_v36  ;;  %v5079_v36 = vld [vmem:[%s7630_s6 + $0x28] sm:$0xff] }
0x1aca   :  { %v5645_v37 = vpop.f32.mrb[30].mxu0 }
0x1acb   :  { %v3738_v38 = vpop.f32.mrb[31].mxu0 }
0x1afc   :  { %v5659_v3 = vpop.f32.mrb[32].mxu0 }
0x1afd   :  { %v3936_v41 = vpop.f32.mrb[33].mxu0  ;;  %v4039_v22 = vsel %vm504_vm3, %v5659_v3, -inf }
0x1afe   :  { %4040 = vmax.xlane.f32.xlu1 %v4039_v22  ;;  %v4036_v33 = vsel %vm504_vm3, %v3936_v41, -inf }
0x1aff   :  { %4037 = vmax.xlane.f32.xlu0 %v4036_v33 }
0x1b05   :  { %v7388_v16 = vpop.f32.mrb[42].mxu1 }
0x1b06   :  { %v7390_v21 = vpop.f32.mrb[43].mxu1 }
0x1b0d   :  { %v5666_v26 = vpop.f32.mrb[44].mxu1 }
0x1b0e   :  { %v4027_v34 = vpop.f32.mrb[45].mxu1  ;;  %v4045_v53 = vsel %vm504_vm3, %v5666_v26, -inf }
0x1b0f   :  { %v4042_v4 = vsel %vm504_vm3, %v4027_v34, -inf }
0x1b10   :  { %4043 = vmax.xlane.f32.xlu0 %v4042_v4 }
0x1b14   :  { %4046 = vmax.xlane.f32.xlu0 %v4045_v53 }
0x1b8b   :  { %v4041_v43 = vpop.xlane.xlu1 %4040 }
0x1b8c   :  { %v4049_v45 = vsub.f32 %v5659_v3, %v4041_v43  ;;  %v4038_v8 = vpop.xlane.xlu0 %4037  ;;  %v5081_v3 = vld [vmem:[%s7630_s6 + $0x38] sm:$0xff] }
0x1b8d   :  { %v4048_v52 = vsub.f32 %v3936_v41, %v4038_v8 }
0x1b8e   :  { %v4054_v46 = vmul.f32 1.442695, %v4049_v45 }
0x1b8f   :  { %v4052_v47 = vmul.f32 1.442695, %v4048_v52 }
0x1b90   :  { %6403 = vpow2.f32 %v4054_v46 }
0x1b91   :  { %6405 = vpow2.f32 %v4052_v47 }
0x1b9a   :  { %v6404_v48 = vpop.eup %6403 }
0x1b9b   :  { %v6406_v49 = vpop.eup %6405  ;;  %v4063_v50 = vsel %vm504_vm3, %v6404_v48, 0.0 }
0x1b9c   :  { %4064 = vadd.xlane.f32.xlu1 %v4063_v50  ;;  %v4060_v55 = vsel %vm504_vm3, %v6406_v49, 0.0 }
0x1b9d   :  { %v4044_v56 = vpop.xlane.xlu0 %4043  ;;  %4061 = vadd.xlane.f32.xlu0 %v4060_v55 }
0x1b9e   :  { %v4050_v57 = vsub.f32 %v4027_v34, %v4044_v56 }
0x1ba0   :  { %v4056_v60 = vmul.f32 1.442695, %v4050_v57 }
0x1ba1   :  { %v4047_v62 = vpop.xlane.xlu0 %4046 }
0x1ba2   :  { %6407 = vpow2.f32 %v4056_v60  ;;  %v4051_v63 = vsub.f32 %v5666_v26, %v4047_v62 }
0x1ba4   :  { %v4058_v0 = vmul.f32 1.442695, %v4051_v63 }
0x1ba6   :  { %6409 = vpow2.f32 %v4058_v0 }
0x1bac   :  { %v6408_v1 = vpop.eup %6407 }
0x1bad   :  { %v4066_v2 = vsel %vm504_vm3, %v6408_v1, 0.0 }
0x1bae   :  { %4067 = vadd.xlane.f32.xlu0 %v4066_v2 }
0x1bb0   :  { %v6410_v44 = vpop.eup %6409 }
0x1bb1   :  { %v4069_v5 = vsel %vm504_vm3, %v6410_v44, 0.0 }
0x1bb2   :  { %4070 = vadd.xlane.f32.xlu1 %v4069_v5 }
0x1bc3   :  { %6255 = vrot.lane.b32.xlu1 %v7230_v32, %s7665_s28 }
0x1bc4   :  { %6250 = vrot.lane.b32.xlu0 %v7222_v9, %s7665_s28 }
0x1bc7   :  { %3418 = vrot.lane.b32.xlu1 %v7340_v23, %s7666_s23 }
0x1bc8   :  { %3838 = vrot.lane.b32.xlu0 %v3738_v38, %s7667_s26  ;;  %v5080_v38 = vld [vmem:[%s7630_s6 + $0x30] sm:$0xff] }
0x1bc9   :  { %v6011_v41 = vpack.c.bf16 %v5081_v3, %v5080_v38  ;;  %v5102_v38 = vld [vmem:[%s7636_s12 + $0x90] sm:$0xff] }
0x1bcb   :  { %3420 = vrot.lane.b32.xlu1 %v7338_v20, %s7666_s23 }
0x1bcf   :  { %3840 = vrot.lane.b32.xlu1 %v5645_v37, %s7667_s26  ;;  %v6007_v37 = vpack.c.bf16 %v5079_v36, %v5078_v35  ;;  %v5100_v36 = vld [vmem:[%s7636_s12 + $0x80] sm:$0xff] }
0x1c29   :  { %v4065_v11 = vpop.xlane.xlu1 %4064 }
0x1c2a   :  { %v4062_v6 = vpop.xlane.xlu0 %4061 }
0x1c2b   :  { %6411 = vrcp.f32 %v4062_v6 }
0x1c2c   :  { %6413 = vrcp.f32 %v4065_v11 }
0x1c35   :  { %v6412_v51 = vpop.eup %6411 }
0x1c36   :  { %v4076_v54 = vmul.f32 %v6412_v51, %v6406_v49  ;;  %v6414_v14 = vpop.eup %6413 }
0x1c37   :  { %v4077_v7 = vmul.f32 %v6414_v14, %v6404_v48  ;;  %v5082_v48 = vld [vmem:[#allocation3 + $0x1] ss:$0 sm:$0xff] }
0x1c38   :  { %5671 = vmatprep.mubr.msk.f32.mxu0 %vm504_vm3, %v4076_v54 }
0x1c3b   :  { %v4068_v32 = vpop.xlane.xlu0 %4067 }
0x1c3c   :  { %6415 = vrcp.f32 %v4068_v32 }
0x1c3f   :  { %v4071_v9 = vpop.xlane.xlu1 %4070  ;;  %v6251_v61 = vpop.permute.xlu0 %6250 }
0x1c40   :  { %6417 = vrcp.f32 %v4071_v9  ;;  %v6253_v23 = vunpack.i.h.bf16 %v6251_v61  ;;  %v6252_v12 = vunpack.i.l.bf16 %v6251_v61 }
0x1c42   :  { %v5999_v13 = vpack.c.bf16 %v6253_v23, %v6252_v12 }
0x1c43   :  { %v6256_v20 = vpop.permute.xlu1 %6255  ;;  %v3839_v24 = vpop.permute.xlu0 %3838 }
0x1c44   :  { %v6258_v15 = vunpack.i.h.bf16 %v6256_v20  ;;  %v6257_v58 = vunpack.i.l.bf16 %v6256_v20  ;;  %6000 = vmatprep.subr.bf16.mxu0 %v5999_v13 }
0x1c45   :  { %6002 = vmatpush3.bf16.msra.mxu0 %v5999_v13 }
0x1c46   :  { %v6416_v59 = vpop.eup %6415  ;;  %v6003_v10 = vpack.c.bf16 %v6258_v15, %v6257_v58  ;;  %6008 = vmatprep.subr.bf16.mxu0 %v6007_v37 }
0x1c47   :  { %v3419_v18 = vpop.permute.xlu1 %3418  ;;  %v4078_v19 = vmul.f32 %v6416_v59, %v6408_v1 }
0x1c48   :  { %3430 = vst.msk [vmem:[#allocation2] sm:$0xff] %vm1143_vm4, %v3419_v18  ;;  %5672 = vmatmul.mubr.msk.f32.vlgmr.msra.gmra.mrb[34].mxu0 %vm504_vm3, %v4077_v7  ;;  %6004 = vmatprep.subr.bf16.mxu1 %v6003_v10 }
0x1c49   :  { %3850 = vst.msk [vmem:[#allocation2] sm:$0xff] %vm1564_vm5, %v3839_v24  ;;  %6006 = vmatpush3.bf16.msra.mxu1 %v6003_v10  ;;  %5678 = vmatprep.mubr.msk.f32.mxu1 %vm504_vm3, %v4078_v19  ;;  %v5091_v24 = vld [vmem:[%s7634_s10 + $0x20] sm:$0xff] }
0x1c4a   :  { %v6418_v25 = vpop.eup %6417  ;;  %6010 = vmatpush3.bf16.msra.mxu0 %v6007_v37  ;;  %v5101_v37 = vld [vmem:[%s7636_s12 + $0x88] sm:$0xff] }
0x1c4b   :  { %v4079_v27 = vmul.f32 %v6418_v25, %v6410_v44  ;;  %v3421_v28 = vpop.permute.xlu1 %3420  ;;  %6012 = vmatprep.subr.bf16.mxu0 %v6011_v41  ;;  %v5092_v25 = vld [vmem:[%s7634_s10 + $0x28] sm:$0xff]  ;;  %v6023_v3 = vpack.c.bf16 %v5101_v37, %v5100_v36 }
0x1c4c   :  { %3431 = vst.msk [vmem:[#allocation2 + $0x8] sm:$0xff] %vm1143_vm4, %v3421_v28  ;;  %v5093_v28 = vld [vmem:[%s7634_s10 + $0x30] sm:$0xff] }
0x1c4d   :  { %5679 = vmatmul.mubr.msk.f32.vlgmr.msra.gmra.mrb[46].mxu1 %vm504_vm3, %v4079_v27  ;;  %v6015_v27 = vpack.c.bf16 %v5092_v25, %v5091_v24  ;;  %v4712_v24 = vld [vmem:[%s7638_s14] sm:$0xff]  ;;  %v4713_v25 = vld [vmem:[%s7638_s14 + $0x8] sm:$0xff] }
0x1c4e   :  { %6014 = vmatpush3.bf16.msra.mxu0 %v6011_v41  ;;  %v5103_v41 = vld [vmem:[%s7636_s12 + $0x98] sm:$0xff] }
0x1c4f   :  { %v3841_v30 = vpop.permute.xlu1 %3840  ;;  %6016 = vmatprep.subr.bf16.mxu1 %v6015_v27  ;;  %6024 = vmatprep.subr.bf16.mxu0 %v6023_v3 }
0x1c50   :  { %3851 = vst.msk [vmem:[#allocation2 + $0x8] sm:$0xff] %vm1564_vm5, %v3841_v30  ;;  %6018 = vmatpush3.bf16.msra.mxu1 %v6015_v27  ;;  %v5094_v30 = vld [vmem:[%s7634_s10 + $0x38] sm:$0xff]  ;;  %v6055_v27 = vpack.c.bf16 %v4713_v25, %v4712_v24 }
0x1c51   :  { %v6019_v35 = vpack.c.bf16 %v5094_v30, %v5093_v28  ;;  %v5095_v28 = vld [vmem:[#allocation5 + $0x1] ss:$0 sm:$0xff] }
0x1c53   :  { %6020 = vmatprep.subr.bf16.mxu1 %v6019_v35 }
0x1c54   :  { %6022 = vmatpush3.bf16.msra.mxu1 %v6019_v35 }
0x1c55   :  { %6056 = vmatprep.subr.bf16.mxu1 %v6055_v27 }
0x1d1b   :  { %v5673_v22 = vpop.f32.mrb[34].mxu0 }
0x1d1c   :  { %4260 = vrot.lane.b32.xlu1 %v5673_v22, %s7668_s11  ;;  %v4158_v33 = vpop.f32.mrb[35].mxu0  ;;  %v6027_v22 = vpack.c.bf16 %v5103_v41, %v5102_v38 }
0x1d1d   :  { %4258 = vrot.lane.b32.xlu0 %v4158_v33, %s7668_s11  ;;  %v5104_v33 = vld [vmem:[%s7636_s12 + $0xa0] sm:$0xff] }
0x1d20   :  { %v5680_v26 = vpop.f32.mrb[46].mxu1  ;;  %3424 = vrot.lane.b32.xlu1 %v7344_v17, %s7666_s23 }
0x1d21   :  { %v4245_v34 = vpop.f32.mrb[47].mxu1  ;;  %3422 = vrot.lane.b32.xlu0 %v7346_v29, %s7666_s23 }
0x1d24   :  { %3844 = vrot.lane.b32.xlu1 %v7388_v16, %s7667_s26 }
0x1d25   :  { %3842 = vrot.lane.b32.xlu0 %v7390_v21, %s7667_s26 }
0x1d28   :  { %4264 = vrot.lane.b32.xlu1 %v5680_v26, %s7668_s11  ;;  %v5105_v26 = vld [vmem:[%s7636_s12 + $0xa8] sm:$0xff] }
0x1d29   :  { %4262 = vrot.lane.b32.xlu0 %v4245_v34, %s7668_s11  ;;  %v6031_v34 = vpack.c.bf16 %v5105_v26, %v5104_v33 }
0x1d8e   :  { %v4261_v4 = vpop.permute.xlu1 %4260 }
0x1d8f   :  { %4271 = vst.msk [vmem:[#allocation2 + $0x8] sm:$0xff] %vm1985_vm6, %v4261_v4  ;;  %v4259_v53 = vpop.permute.xlu0 %4258 }
0x1d90   :  { %4270 = vst.msk [vmem:[#allocation2] sm:$0xff] %vm1985_vm6, %v4259_v53 }
0x1d92   :  { %v3425_v17 = vpop.permute.xlu1 %3424 }
0x1d93   :  { %3433 = vst.msk [vmem:[#allocation2 + $0x18] sm:$0xff] %vm1143_vm4, %v3425_v17  ;;  %v3423_v29 = vpop.permute.xlu0 %3422 }
0x1d94   :  { %3432 = vst.msk [vmem:[#allocation2 + $0x10] sm:$0xff] %vm1143_vm4, %v3423_v29 }
0x1d96   :  { %v3845_v16 = vpop.permute.xlu1 %3844  ;;  %v4275_v45 = vld [vmem:[#allocation2 + $0x8] sm:$0xff] }
0x1d97   :  { %3853 = vst.msk [vmem:[#allocation2 + $0x18] sm:$0xff] %vm1564_vm5, %v3845_v16  ;;  %v3843_v21 = vpop.permute.xlu0 %3842  ;;  %v4274_v43 = vld [vmem:[#allocation2] sm:$0xff] }
0x1d98   :  { %3852 = vst.msk [vmem:[#allocation2 + $0x10] sm:$0xff] %vm1564_vm5, %v3843_v21  ;;  %5689 = vmatprep.mubr.msk.f32.mxu0 %vm135_vm0, %v4274_v43 }
0x1d99   :  { %5690 = vmatmul.mubr.msk.f32.vlgmr.msra.gmra.mrb[36].mxu0 %vm135_vm0, %v4275_v45 }
0x1d9a   :  { %v4265_v8 = vpop.permute.xlu1 %4264  ;;  %6026 = vmatpush3.bf16.msra.mxu0 %v6023_v3 }
0x1d9b   :  { %4273 = vst.msk [vmem:[#allocation2 + $0x18] sm:$0xff] %vm1985_vm6, %v4265_v8  ;;  %v4263_v52 = vpop.permute.xlu0 %4262  ;;  %6028 = vmatprep.subr.bf16.mxu0 %v6027_v22 }
0x1d9c   :  { %4272 = vst.msk [vmem:[#allocation2 + $0x10] sm:$0xff] %vm1985_vm6, %v4263_v52  ;;  %v5089_v52 = vld [vmem:[%s7632_s8 + $0x1] ss:$0 sm:$0xff] }
0x1d9e   :  { %6030 = vmatpush3.bf16.msra.mxu0 %v6027_v22 }
0x1d9f   :  { %6032 = vmatprep.subr.bf16.mxu0 %v6031_v34 }
0x1da2   :  { %v4277_v47 = vld [vmem:[#allocation2 + $0x18] sm:$0xff]  ;;  %6034 = vmatpush3.bf16.msra.mxu0 %v6031_v34 }
0x1da3   :  { %v4276_v46 = vld [vmem:[#allocation2 + $0x10] sm:$0xff] }
0x1da4   :  { %5692 = vmatprep.mubr.msk.f32.mxu0 %vm135_vm0, %v4276_v46 }
0x1da5   :  { %5693 = vmatmul.mubr.msk.f32.gmra.mrb[38].mxu0 %vm135_vm0, %v4277_v47 }
0x1e6c   :  { %v5691_v49 = vpop.f32.mrb[36].mxu0 }
0x1e6d   :  { %v4375_v50 = vadd.f32 %v5691_v49, %v5082_v48  ;;  %v4369_v55 = vpop.f32.mrb[37].mxu0 }
0x1e6e   :  { %v4370_v56 = vadd.f32 %v5082_v48, %v4369_v55 }
0x1e6f   :  { %v7453_v57 = vadd.f32 %v4375_v50, %v7170_v39 }
0x1e70   :  { %v7456_v60 = vadd.f32 %v4370_v56, %v7173_v40  ;;  %v5090_v56 = vld [vmem:[%s7633_s9 + $0x1] ss:$0 sm:$0xff] }
0x1e71   :  { %v4399_v62 = vsel %vm135_vm0, %v7453_v57, 0.0 }
0x1e72   :  { %4400 = vadd.xlane.f32.xlu1 %v4399_v62  ;;  %v4396_v63 = vsel %vm135_vm0, %v7456_v60, 0.0 }
0x1e73   :  { %4397 = vadd.xlane.f32.xlu0 %v4396_v63 }
0x1e78   :  { %v5694_v0 = vpop.f32.mrb[38].mxu0 }
0x1e79   :  { %v4379_v1 = vpop.f32.mrb[39].mxu0  ;;  %v4385_v2 = vadd.f32 %v5694_v0, %v5082_v48 }
0x1e7a   :  { %v4380_v44 = vadd.f32 %v5082_v48, %v4379_v1 }
0x1e7b   :  { %v7466_v39 = vadd.f32 %v4385_v2, %v7180_v42 }
0x1e7c   :  { %v7463_v5 = vadd.f32 %v4380_v44, %v7183_v31 }
0x1e7d   :  { %v4405_v6 = vsel %vm135_vm0, %v7466_v39, 0.0 }
0x1e7e   :  { %v4402_v40 = vsel %vm135_vm0, %v7463_v5, 0.0 }
0x1e7f   :  { %4403 = vadd.xlane.f32.xlu0 %v4402_v40 }
0x1e83   :  { %4406 = vadd.xlane.f32.xlu0 %v4405_v6 }
0x1eff   :  { %v4401_v51 = vpop.xlane.xlu1 %4400 }
0x1f00   :  { %v4409_v11 = vmul.f32 0.03125, %v4401_v51  ;;  %v4398_v54 = vpop.xlane.xlu0 %4397 }
0x1f01   :  { %v4408_v32 = vmul.f32 0.03125, %v4398_v54 }
0x1f02   :  { %v4413_v9 = vsub.f32 %v7453_v57, %v4409_v11 }
0x1f03   :  { %v4412_v31 = vsub.f32 %v7456_v60, %v4408_v32 }
0x1f04   :  { %v4417_v61 = vmul.f32 %v4413_v9, %v4413_v9 }
0x1f05   :  { %v4416_v23 = vmul.f32 %v4412_v31, %v4412_v31 }
0x1f06   :  { %v4423_v42 = vsel %vm135_vm0, %v4417_v61, 0.0  ;;  %v5107_v61 = vld [vmem:[%s7636_s12 + $0xb8] sm:$0xff] }
0x1f07   :  { %4424 = vadd.xlane.f32.xlu1 %v4423_v42  ;;  %v4420_v12 = vsel %vm135_vm0, %v4416_v23, 0.0  ;;  %v5108_v42 = vld [vmem:[%s7636_s12 + $0xc0] sm:$0xff] }
0x1f08   :  { %4421 = vadd.xlane.f32.xlu0 %v4420_v12  ;;  %v5109_v12 = vld [vmem:[%s7636_s12 + $0xc8] sm:$0xff] }
0x1f0c   :  { %v4404_v13 = vpop.xlane.xlu0 %4403 }
0x1f0d   :  { %v4410_v14 = vmul.f32 0.03125, %v4404_v13  ;;  %v6039_v13 = vpack.c.bf16 %v5109_v12, %v5108_v42 }
0x1f0f   :  { %v7477_v20 = vsub.f32 %v7463_v5, %v4410_v14  ;;  %v5110_v14 = vld [vmem:[%s7636_s12 + $0xd0] sm:$0xff] }
0x1f10   :  { %v4407_v15 = vpop.xlane.xlu0 %4406 }
0x1f11   :  { %v4411_v58 = vmul.f32 0.03125, %v4407_v15  ;;  %v4418_v59 = vmul.f32 %v7477_v20, %v7477_v20 }
0x1f13   :  { %v7482_v7 = vsub.f32 %v7466_v39, %v4411_v58  ;;  %v4426_v10 = vsel %vm135_vm0, %v4418_v59, 0.0  ;;  %v5112_v58 = vld [vmem:[%s7636_s12 + $0xe0] sm:$0xff]  ;;  %v5113_v59 = vld [vmem:[%s7636_s12 + $0xe8] sm:$0xff] }
0x1f14   :  { %4427 = vadd.xlane.f32.xlu0 %v4426_v10  ;;  %v5114_v10 = vld [vmem:[%s7636_s12 + $0xf0] sm:$0xff] }
0x1f15   :  { %v4419_v18 = vmul.f32 %v7482_v7, %v7482_v7 }
0x1f17   :  { %v4429_v19 = vsel %vm135_vm0, %v4419_v18, 0.0  ;;  %v5115_v18 = vld [vmem:[%s7636_s12 + $0xf8] sm:$0xff] }
0x1f18   :  { %4430 = vadd.xlane.f32.xlu1 %v4429_v19  ;;  %v6051_v19 = vpack.c.bf16 %v5115_v18, %v5114_v10 }
0x1f94   :  { %v4425_v4 = vpop.xlane.xlu1 %4424 }
0x1f95   :  { %v4433_v53 = vmul.f32 0.03125, %v4425_v4  ;;  %v4422_v17 = vpop.xlane.xlu0 %4421 }
0x1f96   :  { %v4432_v29 = vmul.f32 0.03125, %v4422_v17 }
0x1f97   :  { %v4437_v16 = vadd.f32 1e-05, %v4433_v53 }
0x1f98   :  { %v4436_v21 = vadd.f32 1e-05, %v4432_v29 }
0x1f99   :  { %6419 = vrsqrt.f32 %v4437_v16 }
0x1f9a   :  { %6421 = vrsqrt.f32 %v4436_v21 }
0x1fa1   :  { %v4428_v43 = vpop.xlane.xlu0 %4427 }
0x1fa2   :  { %v4434_v45 = vmul.f32 0.03125, %v4428_v43 }
0x1fa3   :  { %v6420_v8 = vpop.eup %6419 }
0x1fa4   :  { %v6422_v46 = vpop.eup %6421  ;;  %v4445_v47 = vmul.f32 %v6420_v8, %v4413_v9  ;;  %v4438_v48 = vadd.f32 1e-05, %v4434_v45 }
0x1fa5   :  { %v4431_v49 = vpop.xlane.xlu1 %4430  ;;  %v4444_v50 = vmul.f32 %v6422_v46, %v4412_v31  ;;  %v5106_v31 = vld [vmem:[%s7636_s12 + $0xb0] sm:$0xff] }
0x1fa6   :  { %6423 = vrsqrt.f32 %v4438_v48  ;;  %v4435_v55 = vmul.f32 0.03125, %v4431_v49  ;;  %v4455_v62 = vmul.f32 %v5089_v52, %v4445_v47  ;;  %v6035_v23 = vpack.c.bf16 %v5107_v61, %v5106_v31 }
0x1fa7   :  { %v4454_v63 = vmul.f32 %v5089_v52, %v4444_v50 }
0x1fa8   :  { %v4439_v0 = vadd.f32 1e-05, %v4435_v55  ;;  %v4465_v2 = vadd.f32 %v5090_v56, %v4455_v62  ;;  %6036 = vmatprep.subr.bf16.mxu0 %v6035_v23  ;;  %v4714_v62 = vld [vmem:[%s7638_s14 + $0x10] sm:$0xff] }
0x1fa9   :  { %v4464_v1 = vadd.f32 %v5090_v56, %v4454_v63  ;;  %6038 = vmatpush3.bf16.msra.mxu0 %v6035_v23  ;;  %v4715_v63 = vld [vmem:[%s7638_s14 + $0x18] sm:$0xff] }
0x1faa   :  { %6425 = vrsqrt.f32 %v4439_v0  ;;  %6040 = vmatprep.subr.bf16.mxu0 %v6039_v13  ;;  %v6059_v0 = vpack.c.bf16 %v4715_v63, %v4714_v62 }
0x1fab   :  { %5703 = vmatprep.mubr.msk.f32.mxu1 %vm135_vm0, %v4464_v1  ;;  %v5116_v1 = vld [vmem:[#allocation7 + $0x1] ss:$0 sm:$0xff] }
0x1fac   :  { %5704 = vmatmul.mubr.msk.f32.vlgmr.msra.gmra.mrb[48].mxu1 %vm135_vm0, %v4465_v2 }
0x1fad   :  { %6042 = vmatpush3.bf16.msra.mxu0 %v6039_v13  ;;  %6058 = vmatpush3.bf16.msra.mxu1 %v6055_v27  ;;  %v4828_v13 = vld [vmem:[%s7640_s16 + $0x20] sm:$0xff] }
0x1fae   :  { %6060 = vmatprep.subr.bf16.mxu1 %v6059_v0 }
0x1fb0   :  { %v6424_v44 = vpop.eup %6423 }
0x1fb1   :  { %v4446_v40 = vmul.f32 %v6424_v44, %v7477_v20  ;;  %v5111_v20 = vld [vmem:[%s7636_s12 + $0xd8] sm:$0xff]  ;;  %6062 = vmatpush3.bf16.msra.mxu1 %v6059_v0 }
0x1fb2   :  { %v6043_v15 = vpack.c.bf16 %v5111_v20, %v5110_v14  ;;  %v4829_v14 = vld [vmem:[%s7640_s16 + $0x28] sm:$0xff]  ;;  %v4830_v20 = vld [vmem:[%s7640_s16 + $0x30] sm:$0xff] }
0x1fb3   :  { %v4456_v6 = vmul.f32 %v5089_v52, %v4446_v40 }
0x1fb4   :  { %v6426_v51 = vpop.eup %6425  ;;  %6044 = vmatprep.subr.bf16.mxu0 %v6043_v15 }
0x1fb5   :  { %v4466_v11 = vadd.f32 %v5090_v56, %v4456_v6  ;;  %v4447_v54 = vmul.f32 %v6426_v51, %v7482_v7  ;;  %6046 = vmatpush3.bf16.msra.mxu0 %v6043_v15  ;;  %v6047_v7 = vpack.c.bf16 %v5113_v59, %v5112_v58  ;;  %v6071_v15 = vpack.c.bf16 %v4829_v14, %v4828_v13  ;;  %v4831_v58 = vld [vmem:[%s7640_s16 + $0x38] sm:$0xff] }
0x1fb6   :  { %v6075_v59 = vpack.c.bf16 %v4831_v58, %v4830_v20 }
0x1fb7   :  { %5706 = vmatprep.mubr.msk.f32.mxu1 %vm135_vm0, %v4466_v11  ;;  %v4457_v32 = vmul.f32 %v5089_v52, %v4447_v54  ;;  %6048 = vmatprep.subr.bf16.mxu0 %v6047_v7 }
0x1fb9   :  { %v4467_v9 = vadd.f32 %v5090_v56, %v4457_v32  ;;  %6050 = vmatpush3.bf16.msra.mxu0 %v6047_v7  ;;  %v5117_v7 = vld [vmem:[#allocation8] ss:$0 sm:$0xff] }
0x1fba   :  { %6052 = vmatprep.subr.bf16.mxu0 %v6051_v19 }
0x1fbb   :  { %5707 = vmatmul.mubr.msk.f32.gmra.mrb[50].mxu1 %vm135_vm0, %v4467_v9 }
0x1fbd   :  { %6054 = vmatpush3.bf16.msra.mxu0 %v6051_v19 }
0x207f   :  { %v5705_v30 = vpop.f32.mrb[48].mxu1 }
0x2080   :  { %v4565_v35 = vadd.f32 %v5705_v30, %v5095_v28  ;;  %v4559_v36 = vpop.f32.mrb[49].mxu1 }
0x2081   :  { %v4560_v37 = vadd.f32 %v5095_v28, %v4559_v36 }
0x2082   :  { %v4583_v38 = vmul.f32 0.70710677, %v4565_v35  ;;  %v4579_v16 = vmul.f32 0.5, %v4565_v35 }
0x2083   :  { %v4582_v3 = vmul.f32 0.70710677, %v4560_v37  ;;  %v4578_v53 = vmul.f32 0.5, %v4560_v37 }
0x2084   :  { %6427 = verf.f32 %v4583_v38 }
0x2085   :  { %6429 = verf.f32 %v4582_v3  ;;  %v5122_v3 = vld [vmem:[#allocation10] ss:$0 sm:$0xff] }
0x208e   :  { %v6428_v41 = vpop.eup %6427  ;;  %v5708_v22 = vpop.f32.mrb[50].mxu1 }
0x208f   :  { %v6430_v33 = vpop.eup %6429  ;;  %v4591_v26 = vadd.f32 1.0, %v6428_v41  ;;  %v4575_v34 = vadd.f32 %v5708_v22, %v5095_v28  ;;  %v4569_v4 = vpop.f32.mrb[51].mxu1 }
0x2090   :  { %v4590_v17 = vadd.f32 1.0, %v6430_v33  ;;  %v4570_v29 = vadd.f32 %v5095_v28, %v4569_v4 }
0x2091   :  { %v4585_v21 = vmul.f32 0.70710677, %v4575_v34  ;;  %v4595_v8 = vmul.f32 %v4591_v26, %v4579_v16  ;;  %v4581_v50 = vmul.f32 0.5, %v4575_v34 }
0x2092   :  { %v4584_v43 = vmul.f32 0.70710677, %v4570_v29  ;;  %v4594_v45 = vmul.f32 %v4590_v17, %v4578_v53  ;;  %v4580_v48 = vmul.f32 0.5, %v4570_v29 }
0x2093   :  { %6431 = verf.f32 %v4585_v21 }
0x2094   :  { %6433 = verf.f32 %v4584_v43  ;;  %5741 = vmatprep.mubr.f32.mxu0 %v4594_v45 }
0x2095   :  { %5742 = vmatmul.mubr.f32.vlgmr.msra.gmra.mrb[40].mxu0 %v4595_v8 }
0x209d   :  { %v6432_v52 = vpop.eup %6431 }
0x209e   :  { %v6434_v46 = vpop.eup %6433  ;;  %v4593_v47 = vadd.f32 1.0, %v6432_v52 }
0x209f   :  { %v4592_v49 = vadd.f32 1.0, %v6434_v46 }
0x20a0   :  { %v4597_v56 = vmul.f32 %v4593_v47, %v4581_v50 }
0x20a1   :  { %v4596_v55 = vmul.f32 %v4592_v49, %v4580_v48 }
0x20a3   :  { %5744 = vmatprep.mubr.f32.mxu0 %v4596_v55 }
0x20a4   :  { %5745 = vmatmul.mubr.f32.gmra.mrb[42].mxu0 %v4597_v56 }
0x2168   :  { %v5743_v2 = vpop.f32.mrb[40].mxu0 }
0x2169   :  { %v4695_v44 = vadd.f32 %v5743_v2, %v5116_v1  ;;  %v4689_v40 = vpop.f32.mrb[41].mxu0 }
0x216a   :  { %v4690_v6 = vadd.f32 %v5116_v1, %v4689_v40 }
0x216b   :  { %v4709_v11 = vadd.f32 %v4695_v44, %v7453_v57  ;;  %v4824_v57 = vld [vmem:[%s7640_s16] sm:$0xff] }
0x216c   :  { %v4708_v51 = vadd.f32 %v4690_v6, %v7456_v60  ;;  %v4825_v60 = vld [vmem:[%s7640_s16 + $0x8] sm:$0xff] }
0x216d   :  { %v6063_v42 = vpack.c.bf16 %v4825_v60, %v4824_v57 }
0x216e   :  { %5755 = vmatprep.mubr.msk.f32.mxu1 %vm135_vm0, %v4708_v51 }
0x216f   :  { %5756 = vmatmul.mubr.msk.f32.vlgmr.msra.gmra.mrb[52].mxu1 %vm135_vm0, %v4709_v11  ;;  %6064 = vmatprep.subr.bf16.mxu1 %v6063_v42 }
0x2170   :  { %6066 = vmatpush3.bf16.msra.mxu1 %v6063_v42 }
0x2177   :  { %v5746_v54 = vpop.f32.mrb[42].mxu0 }
0x2178   :  { %v4705_v32 = vadd.f32 %v5746_v54, %v5116_v1  ;;  %v4699_v9 = vpop.f32.mrb[43].mxu0 }
0x2179   :  { %v4700_v31 = vadd.f32 %v5116_v1, %v4699_v9 }
0x217a   :  { %v4711_v23 = vadd.f32 %v4705_v32, %v7466_v39  ;;  %v4827_v39 = vld [vmem:[%s7640_s16 + $0x18] sm:$0xff] }
0x217b   :  { %v4710_v61 = vadd.f32 %v4700_v31, %v7463_v5  ;;  %v4826_v5 = vld [vmem:[%s7640_s16 + $0x10] sm:$0xff] }
0x217c   :  { %v6067_v12 = vpack.c.bf16 %v4827_v39, %v4826_v5 }
0x217d   :  { %5758 = vmatprep.mubr.msk.f32.mxu1 %vm135_vm0, %v4710_v61 }
0x217e   :  { %5759 = vmatmul.mubr.msk.f32.gmra.mrb[54].mxu1 %vm135_vm0, %v4711_v23  ;;  %6068 = vmatprep.subr.bf16.mxu1 %v6067_v12 }
0x217f   :  { %6070 = vmatpush3.bf16.msra.mxu1 %v6067_v12 }
0x2180   :  { %6072 = vmatprep.subr.bf16.mxu1 %v6071_v15 }
0x2183   :  { %6074 = vmatpush3.bf16.msra.mxu1 %v6071_v15 }
0x2184   :  { %6076 = vmatprep.subr.bf16.mxu1 %v6075_v59 }
0x2187   :  { %6078 = vmatpush3.bf16.msra.mxu1 %v6075_v59 }
0x2242   :  { %v5757_v10 = vpop.f32.mrb[52].mxu1 }
0x2243   :  { %v4807_v18 = vadd.f32 %v5757_v10, %v5117_v7  ;;  %v4801_v19 = vpop.f32.mrb[53].mxu1 }
0x2244   :  { %v4802_v24 = vadd.f32 %v5117_v7, %v4801_v19 }
0x2246   :  { %6435 = vtanh.f32 %v4802_v24 }
0x2247   :  { %6437 = vtanh.f32 %v4807_v18 }
0x2250   :  { %v6436_v25 = vpop.eup %6435 }
0x2251   :  { %v6438_v27 = vpop.eup %6437  ;;  %v5760_v28 = vpop.f32.mrb[54].mxu1  ;;  %5777 = vmatprep.mubr.msk.f32.mxu1 %vm4839_vm7, %v6436_v25 }
0x2252   :  { %v4817_v30 = vadd.f32 %v5760_v28, %v5117_v7  ;;  %v4811_v35 = vpop.f32.mrb[55].mxu1  ;;  %5778 = vmatmul.mubr.msk.f32.vlgmr.msra.gmra.mrb[56].mxu1 %vm4839_vm7, %v6438_v27 }
0x2253   :  { %v4812_v36 = vadd.f32 %v5117_v7, %v4811_v35 }
0x2255   :  { %6439 = vtanh.f32 %v4812_v36 }
0x2256   :  { %6441 = vtanh.f32 %v4817_v30 }
0x225f   :  { %v6440_v37 = vpop.eup %6439 }
0x2260   :  { %v6442_v38 = vpop.eup %6441  ;;  %5780 = vmatprep.mubr.msk.f32.mxu1 %vm4839_vm7, %v6440_v37 }
0x2261   :  { %5781 = vmatmul.mubr.msk.f32.gmra.mrb[58].mxu1 %vm4839_vm7, %v6442_v38 }
0x2325   :  { %v5779_v41 = vpop.f32.mrb[56].mxu1 }
0x2326   :  { %v4924_v22 = vadd.f32 %v5779_v41, %v5122_v3  ;;  %v4918_v33 = vpop.f32.mrb[57].mxu1 }
0x2327   :  { %v4919_v26 = vadd.f32 %v5122_v3, %v4918_v33 }
0x2328   :  { %4938 = vst.msk [vmem:[%s7642_s18 + $0x8] sm:$0xff] %vm4839_vm7, %v4924_v22 }
0x2329   :  { %4937 = vst.msk [vmem:[%s7642_s18] sm:$0xff] %vm4839_vm7, %v4919_v26 }
0x2334   :  { %v5782_v34 = vpop.f32.mrb[58].mxu1 }
0x2335   :  { %v4934_v4 = vadd.f32 %v5782_v34, %v5122_v3  ;;  %v4928_v53 = vpop.f32.mrb[59].mxu1 }
0x2336   :  { %v4929_v17 = vadd.f32 %v5122_v3, %v4928_v53 }
0x2337   :  { %4940 = vst.msk [vmem:[%s7642_s18 + $0x18] sm:$0xff] %vm4839_vm7, %v4934_v4 }
0x2338   :  { %4939 = vst.msk [vmem:[%s7642_s18 + $0x10] sm:$0xff] %vm4839_vm7, %v4929_v17 }
0x2339   :  { %4945 = vsyncpa [#allocation4], 1 }
0x233a   :  { %4946 = vsyncpa [#allocation6], 1 }
0x233b   :  { %4947 = vsyncpa [#allocation9], 1 }

</bundles_post_ra>
